<compile_context>
chip_gen: v7x
topology: tpu7x:2x2x1
jax: 0.10.0
libtpu: 0.0.40
codegen_flags: <defaults>
</compile_context>

<pallas_src>
import functools

import jax
import jax.numpy as jnp
from jax.experimental import pallas as pl
from jax.experimental.pallas import tpu as pltpu


# ----------------------------- fused kernel ----------------------------------
def _fused_vgae_kernel(n_gcn_layers,
                       adj_ref, emb0_ref, noise_ref,
                       w1_ref, b1_ref, w2_ref, b2_ref,
                       x_ref, mean_ref, std_ref):
    H = mean_ref.shape[-1]

    adj = adj_ref[...]                     # (N, N) bf16, VMEM-resident
    acc = emb0_ref[...]                    # (N, H) f32 running layer-sum
    e_bf = acc.astype(jnp.bfloat16)        # bf16 activation fed to the MXU

    # forward_graphcl: iterative GCN propagation, summing all layer outputs.
    # n_gcn_layers is a compile-time constant -> fully unrolled (2 layers).
    for _ in range(n_gcn_layers):
        e = jnp.dot(adj, e_bf, preferred_element_type=jnp.float32)
        acc = acc + e
        e_bf = e.astype(jnp.bfloat16)

    # Fused first stage of both encoders:
    #   [h_m | h_s] = relu(acc @ [wm1 | ws1] + [bm1 | bs1])   (one 2H-wide matmul)
    h = jnp.dot(acc.astype(jnp.bfloat16), w1_ref[...],
                preferred_element_type=jnp.float32) + b1_ref[...]
    h = jnp.maximum(h, 0.0).astype(jnp.bfloat16)

    # Fused second stage via block-diagonal weights (fills the 256-wide MXU
    # tile on v6e/v7x):
    #   [mean | y_s] = h @ [[wm2, 0], [0, ws2]] + [bm2 | bs2]
    y = jnp.dot(h, w2_ref[...], preferred_element_type=jnp.float32) + b2_ref[...]
    mean = y[:, :H]
    y_s = y[:, H:]

    # numerically-stable softplus (matches torch.nn.Softplus)
    std = jnp.maximum(y_s, 0.0) + jnp.log1p(jnp.exp(-jnp.abs(y_s)))

    mean_ref[...] = mean
    std_ref[...] = std
    # reparameterization: x = noise * std + mean
    x_ref[...] = noise_ref[...] * std + mean


# --------------------------- forward wrapper ----------------------------------
def vgae_encoder_forward(adj_bf16, emb0, prep, noise, n_gcn_layers):
    N, H = emb0.shape
    full = lambda i: (0, 0)

    # actual working set (single buffers); pallas double-buffers each spec
    vmem_need = (N * N * 2                      # adj (bf16)
                 + 2 * N * H * 4                # emb0, noise (f32)
                 + H * 2 * H * 2 + 2 * H * 4    # w1, b1
                 + 2 * H * 2 * H * 2 + 2 * H * 4  # w2 (block-diag), b2
                 + 3 * N * H * 4)               # x, mean, std outputs
    vmem_limit = min(max(4 * vmem_need, 16 * 1024 * 1024), 48 * 1024 * 1024)

    kernel = functools.partial(_fused_vgae_kernel, n_gcn_layers)
    flops = (2 * n_gcn_layers * N * N * H       # GCN propagation
             + 2 * N * H * (2 * H)              # fused first stage
             + 2 * N * (2 * H) * (2 * H))       # block-diag second stage
    return pl.pallas_call(
        kernel,
        out_shape=(jax.ShapeDtypeStruct((N, H), jnp.float32),
                   jax.ShapeDtypeStruct((N, H), jnp.float32),
                   jax.ShapeDtypeStruct((N, H), jnp.float32)),
        grid_spec=pltpu.PrefetchScalarGridSpec(
            num_scalar_prefetch=0,
            grid=(1,),
            in_specs=[
                pl.BlockSpec((N, N), full),          # adj (bf16)
                pl.BlockSpec((N, H), full),          # emb0
                pl.BlockSpec((N, H), full),          # gaussian noise
                pl.BlockSpec((H, 2 * H), full),      # [wm1 | ws1]  (bf16)
                pl.BlockSpec((1, 2 * H), full),      # [bm1 | bs1]
                pl.BlockSpec((2 * H, 2 * H), full),  # block-diag [wm2, ws2] (bf16)
                pl.BlockSpec((1, 2 * H), full),      # [bm2 | bs2]
            ],
            out_specs=[pl.BlockSpec((N, H), full),
                       pl.BlockSpec((N, H), full),
                       pl.BlockSpec((N, H), full)],
        ),
        compiler_params=pltpu.CompilerParams(
            dimension_semantics=("arbitrary",),
            vmem_limit_bytes=vmem_limit,
        ),
        cost_estimate=pl.CostEstimate(
            flops=flops,
            transcendentals=2 * N * H,
            bytes_accessed=vmem_need),
    )(adj_bf16, emb0, noise, prep["w1"], prep["b1"], prep["w2"], prep["b2"])


# --------------------- one-time parameter preparation -------------------------
def prepare_encoder_params(params):
    """Hoisted out of the jitted forward: fuse/cast weights once at load time."""
    H = params["wm1"].shape[0]
    w1 = jnp.concatenate([params["wm1"], params["ws1"]], axis=1).astype(jnp.bfloat16)
    b1 = jnp.concatenate([params["bm1"], params["bs1"]], axis=1).astype(jnp.float32)
    zero = jnp.zeros((H, H), jnp.float32)
    w2 = jnp.concatenate(
        [jnp.concatenate([params["wm2"], zero], axis=1),
         jnp.concatenate([zero, params["ws2"]], axis=1)],
        axis=0).astype(jnp.bfloat16)
    b2 = jnp.concatenate([params["bm2"], params["bs2"]], axis=1).astype(jnp.float32)
    return {"w1": w1, "b1": b1, "w2": w2, "b2": b2}


# ------------------------------ reference ------------------------------------
def _softplus(y):
    return jnp.maximum(y, 0.0) + jnp.log1p(jnp.exp(-jnp.abs(y)))


def _ref_forward(adj, emb0, p, noise, n_gcn_layers):
    e = emb0
    acc = emb0
    for _ in range(n_gcn_layers):
        e = adj @ e
        acc = acc + e
    h_m = jnp.maximum(acc @ p["wm1"] + p["bm1"], 0.0)
    mean = h_m @ p["wm2"] + p["bm2"]
    h_s = jnp.maximum(acc @ p["ws1"] + p["bs1"], 0.0)
    std = _softplus(h_s @ p["ws2"] + p["bs2"])
    return noise * std + mean, mean, std


def _xavier(key, shape):
    fan_in, fan_out = shape
    a = (6.0 / (fan_in + fan_out)) ** 0.5
    return jax.random.uniform(key, shape, jnp.float32, -a, a)


if __name__ == "__main__":
    user, item, hidden, n_gcn = 192, 192, 128, 2
    N = user + item

    key = jax.random.PRNGKey(0)
    keys = jax.random.split(key, 10)

    # model parameters (deterministic, synthetic); Linear weights pre-transposed
    # to (in, out), biases as (1, H).
    uEmbeds = _xavier(keys[0], (user, hidden))
    iEmbeds = _xavier(keys[1], (item, hidden))
    emb0 = jnp.concatenate([uEmbeds, iEmbeds], axis=0)

    params = {
        "wm1": _xavier(keys[2], (hidden, hidden)),
        "bm1": jnp.zeros((1, hidden), jnp.float32),
        "wm2": _xavier(keys[3], (hidden, hidden)),
        "bm2": jnp.zeros((1, hidden), jnp.float32),
        "ws1": _xavier(keys[4], (hidden, hidden)),
        "bs1": jnp.zeros((1, hidden), jnp.float32),
        "ws2": _xavier(keys[5], (hidden, hidden)),
        "bs2": jnp.zeros((1, hidden), jnp.float32),
    }

    # synthetic symmetric normalized adjacency (dense stand-in for sparse adj)
    A = (jax.random.uniform(keys[6], (N, N)) < 0.1).astype(jnp.float32)
    A = jnp.minimum(jnp.maximum(A, A.T) + jnp.eye(N, dtype=jnp.float32), 1.0)
    dinv = 1.0 / jnp.sqrt(A.sum(axis=1))
    adj = A * dinv[:, None] * dinv[None, :]

    # gaussian_noise = torch.randn_like(x_mean)
    noise = jax.random.normal(keys[7], (N, hidden), jnp.float32)

    # one-time prep OUTSIDE the jitted forward (adj bf16 cast + fused weights)
    adj_bf16 = adj.astype(jnp.bfloat16)
    prep = prepare_encoder_params(params)

    fwd = jax.jit(functools.partial(vgae_encoder_forward, n_gcn_layers=n_gcn))
    x, x_mean, x_std = fwd(adj_bf16, emb0, prep, noise)
    jax.block_until_ready((x, x_mean, x_std))

    # sanity check against a pure-JAX f32 reference (kernel uses bf16 matmuls
    # with f32 accumulation, hence the 2e-2 tolerance)
    rx, rm, rs = _ref_forward(adj, emb0, params, noise, n_gcn)
    assert jnp.allclose(x_mean, rm, rtol=2e-2, atol=2e-2)
    assert jnp.allclose(x_std, rs, rtol=2e-2, atol=2e-2)
    assert jnp.allclose(x, rx, rtol=2e-2, atol=2e-2)

    print("KERNEL_OK")
</pallas_src>

<mosaic_0001>
module attributes {stable_mosaic.version = 11 : i64} {
  func.func @_fused_vgae_kernel(%arg0: i32, %arg1: memref<384x384xbf16, #tpu.memory_space<vmem>>, %arg2: memref<384x128xf32, #tpu.memory_space<vmem>>, %arg3: memref<384x128xf32, #tpu.memory_space<vmem>>, %arg4: memref<128x256xbf16, #tpu.memory_space<vmem>>, %arg5: memref<1x256xf32, #tpu.memory_space<vmem>>, %arg6: memref<256x256xbf16, #tpu.memory_space<vmem>>, %arg7: memref<1x256xf32, #tpu.memory_space<vmem>>, %arg8: memref<384x128xf32, #tpu.memory_space<vmem>>, %arg9: memref<384x128xf32, #tpu.memory_space<vmem>>, %arg10: memref<384x128xf32, #tpu.memory_space<vmem>>) attributes {dimension_semantics = [#tpu.dimension_semantics<arbitrary>], iteration_bounds = array<i64: 1>, scalar_prefetch = 0 : i64, scratch_operands = 0 : i64, tpu.core_type = #tpu.core_type<tc>, window_params = [{pipeline_mode = #tpu.pipeline_mode<synchronous>, transform_indices = @transform_0, window_bounds = array<i64: 384, 384>}, {pipeline_mode = #tpu.pipeline_mode<synchronous>, transform_indices = @transform_1, window_bounds = array<i64: 384, 128>}, {pipeline_mode = #tpu.pipeline_mode<synchronous>, transform_indices = @transform_2, window_bounds = array<i64: 384, 128>}, {pipeline_mode = #tpu.pipeline_mode<synchronous>, transform_indices = @transform_3, window_bounds = array<i64: 128, 256>}, {pipeline_mode = #tpu.pipeline_mode<synchronous>, transform_indices = @transform_4, window_bounds = array<i64: 1, 256>}, {pipeline_mode = #tpu.pipeline_mode<synchronous>, transform_indices = @transform_5, window_bounds = array<i64: 256, 256>}, {pipeline_mode = #tpu.pipeline_mode<synchronous>, transform_indices = @transform_6, window_bounds = array<i64: 1, 256>}, {pipeline_mode = #tpu.pipeline_mode<synchronous>, transform_indices = @transform_7, window_bounds = array<i64: 384, 128>}, {pipeline_mode = #tpu.pipeline_mode<synchronous>, transform_indices = @transform_8, window_bounds = array<i64: 384, 128>}, {pipeline_mode = #tpu.pipeline_mode<synchronous>, transform_indices = @transform_9, window_bounds = array<i64: 384, 128>}]} {
    %c0 = arith.constant 0 : index
    %c0_0 = arith.constant 0 : index
    %0 = vector.load %arg1[%c0, %c0_0] : memref<384x384xbf16, #tpu.memory_space<vmem>>, vector<384x384xbf16>
    %c0_1 = arith.constant 0 : index
    %c0_2 = arith.constant 0 : index
    %1 = vector.load %arg2[%c0_1, %c0_2] : memref<384x128xf32, #tpu.memory_space<vmem>>, vector<384x128xf32>
    %2 = arith.truncf %1 : vector<384x128xf32> to vector<384x128xbf16>
    %cst = arith.constant dense<0.000000e+00> : vector<384x128xf32>
    %3 = tpu.matmul %0, %2, %cst {dimension_numbers = #tpu.dot_dimension_numbers<[1], [0], [0], [1], [0, 0, 1, 1], [], []>} : vector<384x384xbf16>, vector<384x128xbf16>, vector<384x128xf32> -> vector<384x128xf32>
    %4 = arith.addf %1, %3 : vector<384x128xf32>
    %5 = arith.truncf %3 : vector<384x128xf32> to vector<384x128xbf16>
    %cst_3 = arith.constant dense<0.000000e+00> : vector<384x128xf32>
    %6 = tpu.matmul %0, %5, %cst_3 {dimension_numbers = #tpu.dot_dimension_numbers<[1], [0], [0], [1], [0, 0, 1, 1], [], []>} : vector<384x384xbf16>, vector<384x128xbf16>, vector<384x128xf32> -> vector<384x128xf32>
    %7 = arith.addf %4, %6 : vector<384x128xf32>
    %8 = arith.truncf %7 : vector<384x128xf32> to vector<384x128xbf16>
    %c0_4 = arith.constant 0 : index
    %c0_5 = arith.constant 0 : index
    %9 = vector.load %arg4[%c0_4, %c0_5] : memref<128x256xbf16, #tpu.memory_space<vmem>>, vector<128x256xbf16>
    %cst_6 = arith.constant dense<0.000000e+00> : vector<384x256xf32>
    %10 = tpu.matmul %8, %9, %cst_6 {dimension_numbers = #tpu.dot_dimension_numbers<[1], [0], [0], [1], [0, 0, 1, 1], [], []>} : vector<384x128xbf16>, vector<128x256xbf16>, vector<384x256xf32> -> vector<384x256xf32>
    %c0_7 = arith.constant 0 : index
    %c0_8 = arith.constant 0 : index
    %11 = vector.load %arg5[%c0_7, %c0_8] : memref<1x256xf32, #tpu.memory_space<vmem>>, vector<1x256xf32>
    %12 = vector.broadcast %11 : vector<1x256xf32> to vector<384x256xf32>
    %13 = arith.addf %10, %12 : vector<384x256xf32>
    %cst_9 = arith.constant 0.000000e+00 : f32
    %14 = vector.broadcast %cst_9 : f32 to vector<384x256xf32>
    %15 = arith.maximumf %13, %14 : vector<384x256xf32>
    %16 = arith.truncf %15 : vector<384x256xf32> to vector<384x256xbf16>
    %c0_10 = arith.constant 0 : index
    %c0_11 = arith.constant 0 : index
    %17 = vector.load %arg6[%c0_10, %c0_11] : memref<256x256xbf16, #tpu.memory_space<vmem>>, vector<256x256xbf16>
    %cst_12 = arith.constant dense<0.000000e+00> : vector<384x256xf32>
    %18 = tpu.matmul %16, %17, %cst_12 {dimension_numbers = #tpu.dot_dimension_numbers<[1], [0], [0], [1], [0, 0, 1, 1], [], []>} : vector<384x256xbf16>, vector<256x256xbf16>, vector<384x256xf32> -> vector<384x256xf32>
    %c0_13 = arith.constant 0 : index
    %c0_14 = arith.constant 0 : index
    %19 = vector.load %arg7[%c0_13, %c0_14] : memref<1x256xf32, #tpu.memory_space<vmem>>, vector<1x256xf32>
    %20 = vector.broadcast %19 : vector<1x256xf32> to vector<384x256xf32>
    %21 = arith.addf %18, %20 : vector<384x256xf32>
    %22 = vector.extract_strided_slice %21 {offsets = [0, 0], sizes = [384, 128], strides = [1, 1]} : vector<384x256xf32> to vector<384x128xf32>
    %23 = vector.extract_strided_slice %21 {offsets = [0, 128], sizes = [384, 128], strides = [1, 1]} : vector<384x256xf32> to vector<384x128xf32>
    %cst_15 = arith.constant 0.000000e+00 : f32
    %24 = vector.broadcast %cst_15 : f32 to vector<384x128xf32>
    %25 = arith.maximumf %23, %24 : vector<384x128xf32>
    %26 = math.absf %23 : vector<384x128xf32>
    %cst_16 = arith.constant 0.000000e+00 : f32
    %27 = vector.broadcast %cst_16 : f32 to vector<384x128xf32>
    %28 = arith.subf %27, %26 : vector<384x128xf32>
    %29 = math.exp %28 : vector<384x128xf32>
    %30 = math.log1p %29 : vector<384x128xf32>
    %31 = arith.addf %25, %30 : vector<384x128xf32>
    %c0_17 = arith.constant 0 : index
    %c0_18 = arith.constant 0 : index
    %32 = vector.load %arg9[%c0_17, %c0_18] : memref<384x128xf32, #tpu.memory_space<vmem>>, vector<384x128xf32>
    tpu.vector_store %arg9[%c0_17, %c0_18], %22 {strides = array<i32>} : memref<384x128xf32, #tpu.memory_space<vmem>>, vector<384x128xf32>,
    %c0_19 = arith.constant 0 : index
    %c0_20 = arith.constant 0 : index
    %33 = vector.load %arg10[%c0_19, %c0_20] : memref<384x128xf32, #tpu.memory_space<vmem>>, vector<384x128xf32>
    tpu.vector_store %arg10[%c0_19, %c0_20], %31 {strides = array<i32>} : memref<384x128xf32, #tpu.memory_space<vmem>>, vector<384x128xf32>,
    %c0_21 = arith.constant 0 : index
    %c0_22 = arith.constant 0 : index
    %34 = vector.load %arg3[%c0_21, %c0_22] : memref<384x128xf32, #tpu.memory_space<vmem>>, vector<384x128xf32>
    %35 = arith.mulf %34, %31 : vector<384x128xf32>
    %36 = arith.addf %35, %22 : vector<384x128xf32>
    %c0_23 = arith.constant 0 : index
    %c0_24 = arith.constant 0 : index
    %37 = vector.load %arg8[%c0_23, %c0_24] : memref<384x128xf32, #tpu.memory_space<vmem>>, vector<384x128xf32>
    tpu.vector_store %arg8[%c0_23, %c0_24], %36 {strides = array<i32>} : memref<384x128xf32, #tpu.memory_space<vmem>>, vector<384x128xf32>,
    return
  }
  func.func @transform_0(%arg0: i32) -> (i32, i32) {
    %c0_i32 = arith.constant 0 : i32
    %c0_i32_0 = arith.constant 0 : i32
    %c0_i32_1 = arith.constant 0 : i32
    return %c0_i32, %c0_i32_0 : i32, i32
  }
  func.func @transform_1(%arg0: i32) -> (i32, i32) {
    %c0_i32 = arith.constant 0 : i32
    %c0_i32_0 = arith.constant 0 : i32
    %c0_i32_1 = arith.constant 0 : i32
    return %c0_i32, %c0_i32_0 : i32, i32
  }
  func.func @transform_2(%arg0: i32) -> (i32, i32) {
    %c0_i32 = arith.constant 0 : i32
    %c0_i32_0 = arith.constant 0 : i32
    %c0_i32_1 = arith.constant 0 : i32
    return %c0_i32, %c0_i32_0 : i32, i32
  }
  func.func @transform_3(%arg0: i32) -> (i32, i32) {
    %c0_i32 = arith.constant 0 : i32
    %c0_i32_0 = arith.constant 0 : i32
    %c0_i32_1 = arith.constant 0 : i32
    return %c0_i32, %c0_i32_0 : i32, i32
  }
  func.func @transform_4(%arg0: i32) -> (i32, i32) {
    %c0_i32 = arith.constant 0 : i32
    %c0_i32_0 = arith.constant 0 : i32
    %c0_i32_1 = arith.constant 0 : i32
    return %c0_i32, %c0_i32_0 : i32, i32
  }
  func.func @transform_5(%arg0: i32) -> (i32, i32) {
    %c0_i32 = arith.constant 0 : i32
    %c0_i32_0 = arith.constant 0 : i32
    %c0_i32_1 = arith.constant 0 : i32
    return %c0_i32, %c0_i32_0 : i32, i32
  }
  func.func @transform_6(%arg0: i32) -> (i32, i32) {
    %c0_i32 = arith.constant 0 : i32
    %c0_i32_0 = arith.constant 0 : i32
    %c0_i32_1 = arith.constant 0 : i32
    return %c0_i32, %c0_i32_0 : i32, i32
  }
  func.func @transform_7(%arg0: i32) -> (i32, i32) {
    %c0_i32 = arith.constant 0 : i32
    %c0_i32_0 = arith.constant 0 : i32
    %c0_i32_1 = arith.constant 0 : i32
    return %c0_i32, %c0_i32_0 : i32, i32
  }
  func.func @transform_8(%arg0: i32) -> (i32, i32) {
    %c0_i32 = arith.constant 0 : i32
    %c0_i32_0 = arith.constant 0 : i32
    %c0_i32_1 = arith.constant 0 : i32
    return %c0_i32, %c0_i32_0 : i32, i32
  }
  func.func @transform_9(%arg0: i32) -> (i32, i32) {
    %c0_i32 = arith.constant 0 : i32
    %c0_i32_0 = arith.constant 0 : i32
    %c0_i32_1 = arith.constant 0 : i32
    return %c0_i32, %c0_i32_0 : i32, i32
  }
}

</mosaic_0001>

<bundles_post_ra>
// kernel: vgae_encoder_forward.1
= control target key start
LH: loop header
LB: loop body
LE: loop exit
PB: predicated region body
PF: predicated region fallthrough
CT: control target
= control target key end

     0   :  { %15 = vsyncpa [#allocation3], 0  ;;  %s6978_s0 = inlined_call_operand.hbm [shape: bf16[384,384], index: 0, kind: input, shape index: {}]   ;;  %s6979_s1 = inlined_call_operand.hbm [shape: f32[384,128], index: 1, kind: input, shape index: {}]   ;;  %s6980_s2 = inlined_call_operand.hbm [shape: f32[384,128], index: 2, kind: input, shape index: {}]   ;;  %s6981_s3 = inlined_call_operand.hbm [shape: bf16[128,256], index: 3, kind: input, shape index: {}]   ;;  %s6982_s4 = inlined_call_operand.vmem [shape: f32[1,256], index: 4, kind: input, shape index: {}]   ;;  %s6983_s5 = inlined_call_operand.hbm [shape: bf16[256,256], index: 5, kind: input, shape index: {}]   ;;  %s6984_s6 = inlined_call_operand.vmem [shape: f32[1,256], index: 6, kind: input, shape index: {}]   ;;  %s6985_s7 = inlined_call_operand.hbm [shape: f32[384,128], index: 7, kind: output, shape index: {0}]   ;;  %s6986_s8 = inlined_call_operand.hbm [shape: f32[384,128], index: 8, kind: output, shape index: {1}]   ;;  %s6987_s9 = inlined_call_operand.hbm [shape: f32[384,128], index: 9, kind: output, shape index: {2}]  }
   0x1   :  { %16 = vsyncpa [#allocation6], 0 }
   0x2   :  { %17 = vsyncpa [#allocation9], 0 }
   0x3   :  { %18 = vsyncpa [#allocation4], 0 }
   0x4   :  { %19 = vsyncpa [#allocation13], 0  ;;  %s4715_s30 = smov [#allocation5]   ;;  %s4529_s13 = scalar_lea.hbm %s6979_s1, 6144 }
   0x5   :  { %s37_s10 = sshll.u32 %s4715_s30, 4  ;;  %p4530_p0 = scmp.ne.s32.totalorder %s6979_s1, %s4529_s13  ;;  %s38_s10 = int_to_ptr.vmem [resolvable:$true] %s37_s10 }
   0x6   :  { %p4533_p1 = scmp.lt.u32.totalorder %s4529_s13, %s6979_s1 }
   0x8   :  { %p4535_p2 = pnand %p4533_p1, %p4530_p0 }
   0xa   :  { %4538 = shalt.err (!%p4535_p2)
}
   0xb   :  { %s4539_s18 = scalar_lea.vmem %s38_s10, 6144  ;;  %p4544_p4 = scmp.lt.s32.totalorder %s38_s10, %s38_s10 }
   0xc   :  { %p4540_p3 = scmp.ne.s32.totalorder %s38_s10, %s4539_s18  ;;  %p4545_p5 = scmp.lt.s32.totalorder %s4539_s18, %s4539_s18 }
   0xe   :  { %p4546_p6 = por %p4545_p5, %p4544_p4 }
  0x10   :  { %p4547_p7 = pnand %p4546_p6, %p4540_p3 }
  0x12   :  { %4550 = shalt.err (!%p4547_p7)
}
  0x13   :  { %s4716_s19 = smov 128   ;;  %s4717_s20 = smov 8  }
  0x14   :  { %43 = dma.hbm_to_vmem [thread:$0]  %s6979_s1, 6144, %s38_s10, [#allocation6], %s4716_s19, %s4716_s19, %s4717_s20  }
  0x15   :  { %s4718_s23 = smov [#allocation8]   ;;  %s4719_s25 = smov [#allocation2]  }
  0x16   :  { %s61_s24 = sshll.u32 %s4718_s23, 4  ;;  %s25_s26 = sshll.u32 %s4719_s25, 4  ;;  %s62_s24 = int_to_ptr.vmem [resolvable:$true] %s61_s24  ;;  %s26_s26 = int_to_ptr.vmem [resolvable:$true] %s25_s26 }
  0x17   :  { %s4551_s29 = scalar_lea.hbm %s6981_s3, 2048 }
  0x18   :  { %p4552_p8 = scmp.ne.s32.totalorder %s6981_s3, %s4551_s29  ;;  %p4555_p9 = scmp.lt.u32.totalorder %s4551_s29, %s6981_s3 }
  0x1a   :  { %p4557_p10 = pnand %p4555_p9, %p4552_p8 }
  0x1c   :  { %4560 = shalt.err (!%p4557_p10)
}
  0x1d   :  { %s4561_s1 = scalar_lea.vmem %s62_s24, 2048  ;;  %p4566_p12 = scmp.lt.s32.totalorder %s62_s24, %s62_s24 }
  0x1e   :  { %p4562_p11 = scmp.ne.s32.totalorder %s62_s24, %s4561_s1  ;;  %p4567_p13 = scmp.lt.s32.totalorder %s4561_s1, %s4561_s1 }
  0x20   :  { %p4568_p0 = por %p4567_p13, %p4566_p12 }
  0x22   :  { %p4569_p1 = pnand %p4568_p0, %p4562_p11 }
  0x24   :  { %4572 = shalt.err (!%p4569_p1)
}
  0x25   :  { %67 = dma.hbm_to_vmem [thread:$0]  %s6981_s3, 2048, %s62_s24, [#allocation9], %s4716_s19, %s4716_s19, %s4717_s20  }
  0x26   :  { %s4573_s17 = scalar_lea.hbm %s6978_s0, 9216 }
  0x27   :  { %p4574_p2 = scmp.ne.s32.totalorder %s6978_s0, %s4573_s17  ;;  %p4577_p3 = scmp.lt.u32.totalorder %s4573_s17, %s6978_s0 }
  0x29   :  { %p4579_p4 = pnand %p4577_p3, %p4574_p2 }
  0x2b   :  { %4582 = shalt.err (!%p4579_p4)
}
  0x2c   :  { %s4583_s25 = scalar_lea.vmem %s26_s26, 9216  ;;  %p4588_p6 = scmp.lt.s32.totalorder %s26_s26, %s26_s26 }
  0x2d   :  { %p4584_p5 = scmp.ne.s32.totalorder %s26_s26, %s4583_s25  ;;  %p4589_p7 = scmp.lt.s32.totalorder %s4583_s25, %s4583_s25 }
  0x2f   :  { %p4590_p8 = por %p4589_p7, %p4588_p6 }
  0x31   :  { %p4591_p9 = pnand %p4590_p8, %p4584_p5 }
  0x33   :  { %4594 = shalt.err (!%p4591_p9)
}
  0x34   :  { %s4720_s3 = smov 192   ;;  %s4721_s24 = smov 12  }
  0x35   :  { %31 = dma.hbm_to_vmem [thread:$0]  %s6978_s0, 9216, %s26_s26, [#allocation3], %s4720_s3, %s4720_s3, %s4721_s24  }
  0x36   :  { %s4722_s29 = smov [#allocation7]   ;;  %s4723_s11 = smov [#allocation10]  }
  0x37   :  { %s49_s30 = sshll.u32 %s4722_s29, 4  ;;  %s75_s12 = sshll.u32 %s4723_s11, 4  ;;  %s50_s30 = int_to_ptr.vmem [resolvable:$true] %s49_s30  ;;  %s76_s12 = int_to_ptr.vmem [resolvable:$true] %s75_s12 }
  0x38   :  { %s4595_s10 = scalar_lea.hbm %s6980_s2, 6144 }
  0x39   :  { %p4596_p10 = scmp.ne.s32.totalorder %s6980_s2, %s4595_s10  ;;  %p4599_p11 = scmp.lt.u32.totalorder %s4595_s10, %s6980_s2 }
  0x3b   :  { %p4601_p12 = pnand %p4599_p11, %p4596_p10 }
  0x3d   :  { %4604 = shalt.err (!%p4601_p12)
}
  0x3e   :  { %s4605_s0 = scalar_lea.vmem %s50_s30, 6144  ;;  %p4610_p0 = scmp.lt.s32.totalorder %s50_s30, %s50_s30 }
  0x3f   :  { %p4606_p13 = scmp.ne.s32.totalorder %s50_s30, %s4605_s0  ;;  %p4611_p1 = scmp.lt.s32.totalorder %s4605_s0, %s4605_s0 }
  0x41   :  { %p4612_p2 = por %p4611_p1, %p4610_p0 }
  0x43   :  { %p4613_p3 = pnand %p4612_p2, %p4606_p13 }
  0x45   :  { %4616 = shalt.err (!%p4613_p3)
}
  0x46   :  { %55 = dma.hbm_to_vmem [thread:$0]  %s6980_s2, 6144, %s50_s30, [#allocation6], %s4716_s19, %s4716_s19, %s4717_s20  }
  0x47   :  { %s4617_s23 = scalar_lea.hbm %s6983_s5, 4096 }
  0x48   :  { %p4618_p4 = scmp.ne.s32.totalorder %s6983_s5, %s4617_s23  ;;  %p4621_p5 = scmp.lt.u32.totalorder %s4617_s23, %s6983_s5 }
  0x4a   :  { %p4623_p6 = pnand %p4621_p5, %p4618_p4 }
  0x4c   :  { %4626 = shalt.err (!%p4623_p6)
}
  0x4d   :  { %s4627_s28 = scalar_lea.vmem %s76_s12, 4096  ;;  %p4632_p8 = scmp.lt.s32.totalorder %s76_s12, %s76_s12 }
  0x4e   :  { %p4628_p7 = scmp.ne.s32.totalorder %s76_s12, %s4627_s28  ;;  %p4633_p9 = scmp.lt.s32.totalorder %s4627_s28, %s4627_s28 }
  0x50   :  { %p4634_p10 = por %p4633_p9, %p4632_p8 }
  0x52   :  { %p4635_p11 = pnand %p4634_p10, %p4628_p7 }
  0x54   :  { %4638 = shalt.err (!%p4635_p11)
}
  0x55   :  { %81 = dma.hbm_to_vmem [thread:$0]  %s6983_s5, 4096, %s76_s12, [#allocation9], %s4716_s19, %s4716_s19, %s4717_s20  }
  0x56   :  { %4705 = dma.done.wait [#allocation3], 9216  }
  0x57   :  { %4706 = vsyncadd [#allocation3], 4294958080 }
  0x58   :  { %4707 = dma.done.wait [#allocation6], 12288  }
  0x59   :  { %4708 = vsyncadd [#allocation6], 4294955008 }
  0x5a   :  { %4709 = dma.done.wait [#allocation9], 6144  }
  0x5b   :  { %4710 = vsyncadd [#allocation9], 4294961152  ;;  %v6988_v0 = vmov 0   ;;  %v196_v1 = vld [vmem:[#allocation5] sm:$0xff]  ;;  %v197_v2 = vld [vmem:[#allocation5 + $0x8] sm:$0xff] }
  0x5c   :  { %652 = vmatprep.subr.bf16.mxu0 %v6988_v0  ;;  %v198_v3 = vld [vmem:[#allocation5 + $0x10] sm:$0xff]  ;;  %v244_v4 = vpack.c.bf16 %v197_v2, %v196_v1  ;;  %v199_v5 = vld [vmem:[#allocation5 + $0x18] sm:$0xff]  ;;  %v200_v7 = vld [vmem:[#allocation5 + $0x20] sm:$0xff] }
  0x5d   :  { %v245_v6 = vpack.c.bf16 %v199_v5, %v198_v3  ;;  %v201_v8 = vld [vmem:[#allocation5 + $0x28] sm:$0xff]  ;;  %v228_v9 = vld [vmem:[#allocation5 + $0x100] sm:$0xff]  ;;  %v230_v12 = vld [vmem:[#allocation5 + $0x110] sm:$0xff] }
  0x5e   :  { %653 = vmatpush1.bf16.msra.mxu0 %v244_v4  ;;  %v229_v10 = vld [vmem:[#allocation5 + $0x108] sm:$0xff]  ;;  %v246_v13 = vpack.c.bf16 %v201_v8, %v200_v7  ;;  %v202_v14 = vld [vmem:[#allocation5 + $0x30] sm:$0xff]  ;;  %v231_v15 = vld [vmem:[#allocation5 + $0x118] sm:$0xff] }
  0x5f   :  { %654 = vmatprep.subr.bf16.mxu0 %v6988_v0  ;;  %v260_v11 = vpack.c.bf16 %v229_v10, %v228_v9  ;;  %v203_v16 = vld [vmem:[#allocation5 + $0x38] sm:$0xff]  ;;  %v261_v17 = vpack.c.bf16 %v231_v15, %v230_v12  ;;  %v232_v18 = vld [vmem:[#allocation5 + $0x120] sm:$0xff]  ;;  %v233_v19 = vld [vmem:[#allocation5 + $0x128] sm:$0xff] }
  0x60   :  { %v262_v20 = vpack.c.bf16 %v233_v19, %v232_v18  ;;  %v247_v21 = vpack.c.bf16 %v203_v16, %v202_v14  ;;  %v234_v22 = vld [vmem:[#allocation5 + $0x130] sm:$0xff]  ;;  %v235_v23 = vld [vmem:[#allocation5 + $0x138] sm:$0xff]  ;;  %v204_v24 = vld [vmem:[#allocation5 + $0x40] sm:$0xff] }
  0x61   :  { %3940 = vmatprep.subr.bf16.mxu1 %v260_v11  ;;  %v205_v25 = vld [vmem:[#allocation5 + $0x48] sm:$0xff]  ;;  %v206_v26 = vld [vmem:[#allocation5 + $0x50] sm:$0xff]  ;;  %v263_v27 = vpack.c.bf16 %v235_v23, %v234_v22  ;;  %v207_v29 = vld [vmem:[#allocation5 + $0x58] sm:$0xff] }
  0x62   :  { %655 = vmatpush1.bf16.msra.mxu0 %v245_v6  ;;  %3941 = vmatpush3.bf16.msra.mxu1 %v260_v11  ;;  %v248_v28 = vpack.c.bf16 %v205_v25, %v204_v24  ;;  %v236_v30 = vld [vmem:[#allocation5 + $0x140] sm:$0xff]  ;;  %v237_v31 = vld [vmem:[#allocation5 + $0x148] sm:$0xff]  ;;  %v238_v33 = vld [vmem:[#allocation5 + $0x150] sm:$0xff]  ;;  %v249_v36 = vpack.c.bf16 %v207_v29, %v206_v26 }
  0x63   :  { %656 = vmatprep.subr.bf16.mxu0 %v6988_v0  ;;  %3942 = vmatprep.subr.bf16.mxu1 %v261_v17  ;;  %v4855_v32 = vld [vmem:[#allocation2 + $0x8] ss:$12 sps:$4 sm:$0xff]   ;;  %v264_v34 = vpack.c.bf16 %v237_v31, %v236_v30  ;;  %v4858_v35 = vld [vmem:[#allocation2 + $0x4] ss:$12 sps:$4 sm:$0xff]   ;;  %v239_v37 = vld [vmem:[#allocation5 + $0x158] sm:$0xff] }
  0x64   :  { %3956 = vmatprep.mubr.bf16.mxu1 %v4855_v32  ;;  %v208_v38 = vld [vmem:[#allocation5 + $0x60] sm:$0xff]  ;;  %v209_v39 = vld [vmem:[#allocation5 + $0x68] sm:$0xff]  ;;  %684 = vmatprep.mubr.bf16.mxu0 %v4858_v35  ;;  %v210_v40 = vld [vmem:[#allocation5 + $0x70] sm:$0xff]  ;;  %v265_v41 = vpack.c.bf16 %v239_v37, %v238_v33 }
  0x65   :  { %v250_v42 = vpack.c.bf16 %v209_v39, %v208_v38  ;;  %v240_v43 = vld [vmem:[#allocation5 + $0x160] sm:$0xff]  ;;  %v241_v44 = vld [vmem:[#allocation5 + $0x168] sm:$0xff]  ;;  %v211_v45 = vld [vmem:[#allocation5 + $0x78] sm:$0xff] }
  0x66   :  { %657 = vmatpush1.bf16.msra.mxu0 %v246_v13  ;;  %3943 = vmatpush3.bf16.msra.mxu1 %v261_v17  ;;  %v266_v46 = vpack.c.bf16 %v241_v44, %v240_v43  ;;  %v242_v47 = vld [vmem:[#allocation5 + $0x170] sm:$0xff]  ;;  %v251_v48 = vpack.c.bf16 %v211_v45, %v210_v40  ;;  %v243_v49 = vld [vmem:[#allocation5 + $0x178] sm:$0xff]  ;;  %v212_v50 = vld [vmem:[#allocation5 + $0x80] sm:$0xff] }
  0x67   :  { %658 = vmatprep.subr.bf16.mxu0 %v6988_v0  ;;  %3944 = vmatprep.subr.bf16.mxu1 %v262_v20  ;;  %v213_v51 = vld [vmem:[#allocation5 + $0x88] sm:$0xff]  ;;  %v267_v52 = vpack.c.bf16 %v243_v49, %v242_v47  ;;  %v214_v54 = vld [vmem:[#allocation5 + $0x90] sm:$0xff]  ;;  %v215_v55 = vld [vmem:[#allocation5 + $0x98] sm:$0xff] }
  0x68   :  { %v252_v53 = vpack.c.bf16 %v213_v51, %v212_v50  ;;  %v216_v56 = vld [vmem:[#allocation5 + $0xa0] sm:$0xff]  ;;  %v253_v57 = vpack.c.bf16 %v215_v55, %v214_v54  ;;  %v217_v58 = vld [vmem:[#allocation5 + $0xa8] sm:$0xff]  ;;  %v218_v62 = vld [vmem:[#allocation5 + $0xb0] sm:$0xff] }
  0x69   :  { %v4117_v59 = vld [vmem:[#allocation2 + $0x20] ss:$12 sps:$4 sm:$0xff]   ;;  %v4121_v60 = vld [vmem:[#allocation2 + $0x38] ss:$12 sps:$4 sm:$0xff]   ;;  %v254_v61 = vpack.c.bf16 %v217_v58, %v216_v56  ;;  %v4124_v4 = vld [vmem:[#allocation2 + $0x50] ss:$12 sps:$4 sm:$0xff]  }
  0x6a   :  { %659 = vmatpush1.bf16.msra.mxu0 %v247_v21  ;;  %3945 = vmatpush3.bf16.msra.mxu1 %v262_v20  ;;  %v219_v63 = vld [vmem:[#allocation5 + $0xb8] sm:$0xff]  ;;  %v220_v2 = vld [vmem:[#allocation5 + $0xc0] sm:$0xff]  ;;  %v221_v3 = vld [vmem:[#allocation5 + $0xc8] sm:$0xff] }
  0x6b   :  { %660 = vmatprep.subr.bf16.mxu0 %v6988_v0  ;;  %3946 = vmatprep.subr.bf16.mxu1 %v263_v27  ;;  %v255_v1 = vpack.c.bf16 %v219_v63, %v218_v62  ;;  %v4129_v5 = vld [vmem:[#allocation2 + $0x68] ss:$12 sps:$4 sm:$0xff]   ;;  %v256_v6 = vpack.c.bf16 %v221_v3, %v220_v2  ;;  %v223_v8 = vld [vmem:[#allocation5 + $0xd8] sm:$0xff]  ;;  %v224_v10 = vld [vmem:[#allocation5 + $0xe0] sm:$0xff] }
  0x6c   :  { %v222_v7 = vld [vmem:[#allocation5 + $0xd0] sm:$0xff]  ;;  %v225_v11 = vld [vmem:[#allocation5 + $0xe8] sm:$0xff]  ;;  %v4137_v13 = vld [vmem:[#allocation2 + $0x98] ss:$12 sps:$4 sm:$0xff]  }
  0x6d   :  { %v257_v9 = vpack.c.bf16 %v223_v8, %v222_v7  ;;  %v4132_v12 = vld [vmem:[#allocation2 + $0x80] ss:$12 sps:$4 sm:$0xff]   ;;  %v226_v14 = vld [vmem:[#allocation5 + $0xf0] sm:$0xff]  ;;  %v227_v15 = vld [vmem:[#allocation5 + $0xf8] sm:$0xff]  ;;  %v258_v16 = vpack.c.bf16 %v225_v11, %v224_v10 }
  0x6e   :  { %661 = vmatpush1.bf16.msra.mxu0 %v248_v28  ;;  %3947 = vmatpush3.bf16.msra.mxu1 %v263_v27  ;;  %v4140_v17 = vld [vmem:[#allocation2 + $0xb0] ss:$12 sps:$4 sm:$0xff]   ;;  %v259_v18 = vpack.c.bf16 %v227_v15, %v226_v14  ;;  %v4145_v19 = vld [vmem:[#allocation2 + $0xc8] ss:$12 sps:$4 sm:$0xff]   ;;  %v4873_v20 = vld [vmem:[#allocation2] ss:$12 sps:$4 sm:$0xff]  }
  0x6f   :  { %662 = vmatprep.subr.bf16.mxu0 %v6988_v0  ;;  %3948 = vmatprep.subr.bf16.mxu1 %v264_v34  ;;  %v4875_v21 = vld [vmem:[#allocation2 + $0x1c] ss:$12 sps:$4 sm:$0xff]   ;;  %v4878_v22 = vld [vmem:[#allocation2 + $0xe0] ss:$12 sps:$4 sm:$0xff]   ;;  %v4881_v23 = vld [vmem:[#allocation2 + $0xf8] ss:$12 sps:$4 sm:$0xff]  }
  0x70   :  { %7058 = vst [vmem:[#allocation20_spill] sm:$0xff] %v4878_v22  ;;  %7059 = vst [vmem:[#allocation21_spill] sm:$0xff] %v4881_v23  ;;  %v4883_v24 = vld [vmem:[#allocation2 + $0x18] ss:$12 sps:$4 sm:$0xff]   ;;  %v4885_v25 = vld [vmem:[#allocation2 + $0x34] ss:$12 sps:$4 sm:$0xff]  }
  0x71   :  { %v4890_v26 = vld [vmem:[#allocation2 + $0x110] ss:$12 sps:$4 sm:$0xff]   ;;  %v4893_v27 = vld [vmem:[#allocation2 + $0x128] ss:$12 sps:$4 sm:$0xff]   ;;  %v4897_v29 = vld [vmem:[#allocation2 + $0x4c] ss:$12 sps:$4 sm:$0xff]  }
  0x72   :  { %663 = vmatpush1.bf16.msra.mxu0 %v249_v36  ;;  %3949 = vmatpush3.bf16.msra.mxu1 %v264_v34  ;;  %7060 = vst [vmem:[#allocation22_spill] sm:$0xff] %v4890_v26  ;;  %7061 = vst [vmem:[#allocation23_spill] sm:$0xff] %v4893_v27  ;;  %v4895_v28 = vld [vmem:[#allocation2 + $0x30] ss:$12 sps:$4 sm:$0xff]   ;;  %v4903_v30 = vld [vmem:[#allocation2 + $0x140] ss:$12 sps:$4 sm:$0xff]  }
  0x73   :  { %664 = vmatprep.subr.bf16.mxu0 %v6988_v0  ;;  %3950 = vmatprep.subr.bf16.mxu1 %v265_v41  ;;  %7062 = vst [vmem:[#allocation24_spill] sm:$0xff] %v4903_v30  ;;  %v4905_v31 = vld [vmem:[#allocation2 + $0x158] ss:$12 sps:$4 sm:$0xff]   ;;  %v4907_v33 = vld [vmem:[#allocation2 + $0x48] ss:$12 sps:$4 sm:$0xff]  }
  0x74   :  { %7063 = vst [vmem:[#allocation25_spill] sm:$0xff] %v4905_v31  ;;  %v4909_v34 = vld [vmem:[#allocation2 + $0x64] ss:$12 sps:$4 sm:$0xff]   ;;  %v4917_v37 = vld [vmem:[#allocation2 + $0x188] ss:$12 sps:$4 sm:$0xff]  }
  0x75   :  { %v4915_v36 = vld [vmem:[#allocation2 + $0x170] ss:$12 sps:$4 sm:$0xff]   ;;  %7065 = vst [vmem:[#allocation27_spill] sm:$0xff] %v4917_v37  ;;  %v4919_v38 = vld [vmem:[#allocation2 + $0x60] ss:$12 sps:$4 sm:$0xff]  }
  0x76   :  { %665 = vmatpush1.bf16.msra.mxu0 %v250_v42  ;;  %3951 = vmatpush3.bf16.msra.mxu1 %v265_v41  ;;  %7064 = vst [vmem:[#allocation26_spill] sm:$0xff] %v4915_v36  ;;  %v4921_v39 = vld [vmem:[#allocation2 + $0x7c] ss:$12 sps:$4 sm:$0xff]   ;;  %v4927_v40 = vld [vmem:[#allocation2 + $0x1a0] ss:$12 sps:$4 sm:$0xff]  }
  0x77   :  { %666 = vmatprep.subr.bf16.mxu0 %v6988_v0  ;;  %3952 = vmatprep.subr.bf16.mxu1 %v266_v46  ;;  %7066 = vst [vmem:[#allocation28_spill] sm:$0xff] %v4927_v40  ;;  %v4929_v41 = vld [vmem:[#allocation2 + $0x1b8] ss:$12 sps:$4 sm:$0xff]   ;;  %v4933_v43 = vld [vmem:[#allocation2 + $0x94] ss:$12 sps:$4 sm:$0xff]  }
  0x78   :  { %7067 = vst [vmem:[#allocation29_spill] sm:$0xff] %v4929_v41  ;;  %v4931_v42 = vld [vmem:[#allocation2 + $0x78] ss:$12 sps:$4 sm:$0xff]   ;;  %v4939_v44 = vld [vmem:[#allocation2 + $0x1d0] ss:$12 sps:$4 sm:$0xff]  }
  0x79   :  { %7068 = vst [vmem:[#allocation30_spill] sm:$0xff] %v4939_v44  ;;  %v4941_v45 = vld [vmem:[#allocation2 + $0x1e8] ss:$12 sps:$4 sm:$0xff]   ;;  %v4945_v47 = vld [vmem:[#allocation2 + $0xac] ss:$12 sps:$4 sm:$0xff]  }
  0x7a   :  { %667 = vmatpush1.bf16.msra.mxu0 %v251_v48  ;;  %3953 = vmatpush3.bf16.msra.mxu1 %v266_v46  ;;  %7069 = vst [vmem:[#allocation31_spill] sm:$0xff] %v4941_v45  ;;  %v4943_v46 = vld [vmem:[#allocation2 + $0x90] ss:$12 sps:$4 sm:$0xff]   ;;  %v4951_v48 = vld [vmem:[#allocation2 + $0x200] ss:$12 sps:$4 sm:$0xff]  }
  0x7b   :  { %668 = vmatprep.subr.bf16.mxu0 %v6988_v0  ;;  %3954 = vmatprep.subr.bf16.mxu1 %v267_v52  ;;  %7070 = vst [vmem:[#allocation32_spill] sm:$0xff] %v4951_v48  ;;  %v4953_v49 = vld [vmem:[#allocation2 + $0x218] ss:$12 sps:$4 sm:$0xff]   ;;  %v4955_v50 = vld [vmem:[#allocation2 + $0xa8] ss:$12 sps:$4 sm:$0xff]  }
  0x7c   :  { %7071 = vst [vmem:[#allocation33_spill] sm:$0xff] %v4953_v49  ;;  %v4957_v51 = vld [vmem:[#allocation2 + $0xc4] ss:$12 sps:$4 sm:$0xff]   ;;  %v4967_v54 = vld [vmem:[#allocation2 + $0xdc] ss:$12 sps:$4 sm:$0xff]  }
  0x7d   :  { %v4973_v55 = vld [vmem:[#allocation2 + $0xd8] ss:$12 sps:$4 sm:$0xff]   ;;  %v4975_v56 = vld [vmem:[#allocation2 + $0xf4] ss:$12 sps:$4 sm:$0xff]   ;;  %v5041_v14 = vld [vmem:[#allocation2 + $0x1fc] ss:$12 sps:$4 sm:$0xff]  }
  0x7e   :  { %669 = vmatpush1.bf16.msra.mxu0 %v252_v53  ;;  %3955 = vmatpush3.bf16.msra.mxu1 %v267_v52  ;;  %v4963_v52 = vld [vmem:[#allocation2 + $0x230] ss:$12 sps:$4 sm:$0xff]   ;;  %v4965_v53 = vld [vmem:[#allocation2 + $0xc0] ss:$12 sps:$4 sm:$0xff]   ;;  %v4997_v62 = vld [vmem:[#allocation2 + $0x138] ss:$12 sps:$4 sm:$0xff]  }
  0x7f   :  { %670 = vmatprep.subr.bf16.mxu0 %v6988_v0  ;;  %1174 = vmatprep.subr.bf16.mxu1 %v6988_v0  ;;  %7072 = vst [vmem:[#allocation34_spill] sm:$0xff] %v4963_v52  ;;  %v4981_v58 = vld [vmem:[#allocation2 + $0x10c] ss:$12 sps:$4 sm:$0xff]   ;;  %7078 = vst [vmem:[#allocation40_spill] sm:$0xff] %v4997_v62  ;;  %v4999_v63 = vld [vmem:[#allocation2 + $0x154] ss:$12 sps:$4 sm:$0xff]  }
  0x80   :  { %7073 = vst [vmem:[#allocation35_spill] sm:$0xff] %v4981_v58  ;;  %7079 = vst [vmem:[#allocation41_spill] sm:$0xff] %v4999_v63  ;;  %v5005_v2 = vld [vmem:[#allocation2 + $0x16c] ss:$12 sps:$4 sm:$0xff]   ;;  %v5009_v3 = vld [vmem:[#allocation2 + $0x168] ss:$12 sps:$4 sm:$0xff]  }
  0x81   :  { %3957 = vmatmul.mubr.bf16.vlgmr.msra.gmra.mrb[0].mxu1 %v4117_v59  ;;  %v4987_v59 = vld [vmem:[#allocation2 + $0x124] ss:$12 sps:$4 sm:$0xff]   ;;  %7081 = vst [vmem:[#allocation43_spill] sm:$0xff] %v5005_v2  ;;  %7082 = vst [vmem:[#allocation44_spill] sm:$0xff] %v5009_v3  ;;  %v5023_v8 = vld [vmem:[#allocation2 + $0x1b4] ss:$12 sps:$4 sm:$0xff]  }
  0x82   :  { %671 = vmatpush1.bf16.msra.mxu0 %v253_v57  ;;  %3960 = vmatprep.mubr.bf16.mxu1 %v4121_v60  ;;  %v4979_v57 = vld [vmem:[#allocation2 + $0xf0] ss:$12 sps:$4 sm:$0xff]   ;;  %7075 = vst [vmem:[#allocation37_spill] sm:$0xff] %v4987_v59  ;;  %v4991_v60 = vld [vmem:[#allocation2 + $0x120] ss:$12 sps:$4 sm:$0xff]   ;;  %7087 = vst [vmem:[#allocation49_spill] sm:$0xff] %v5023_v8 }
  0x83   :  { %672 = vmatprep.subr.bf16.mxu0 %v6988_v0  ;;  %7076 = vst [vmem:[#allocation38_spill] sm:$0xff] %v4991_v60  ;;  %v5021_v7 = vld [vmem:[#allocation2 + $0x198] ss:$12 sps:$4 sm:$0xff]   ;;  %v5033_v11 = vld [vmem:[#allocation2 + $0x1c8] ss:$12 sps:$4 sm:$0xff]   ;;  %7093 = vst [vmem:[#allocation55_spill] sm:$0xff] %v5041_v14 }
  0x84   :  { %7086 = vst [vmem:[#allocation48_spill] sm:$0xff] %v5021_v7  ;;  %v5029_v10 = vld [vmem:[#allocation2 + $0x1cc] ss:$12 sps:$4 sm:$0xff]   ;;  %7090 = vst [vmem:[#allocation52_spill] sm:$0xff] %v5033_v11 }
  0x85   :  { %7089 = vst [vmem:[#allocation51_spill] sm:$0xff] %v5029_v10  ;;  %v5045_v15 = vld [vmem:[#allocation2 + $0x1f8] ss:$12 sps:$4 sm:$0xff]  }
  0x86   :  { %673 = vmatpush1.bf16.msra.mxu0 %v254_v61  ;;  %v4993_v61 = vld [vmem:[#allocation2 + $0x13c] ss:$12 sps:$4 sm:$0xff]   ;;  %7094 = vst [vmem:[#allocation56_spill] sm:$0xff] %v5045_v15 }
  0x87   :  { %674 = vmatprep.subr.bf16.mxu0 %v6988_v0  ;;  %7077 = vst [vmem:[#allocation39_spill] sm:$0xff] %v4993_v61 }
  0x89   :  { %3961 = vmatmul.mubr.bf16.gmra.mrb[4].mxu1 %v4124_v4  ;;  %v5011_v4 = vld [vmem:[#allocation2 + $0x184] ss:$12 sps:$4 sm:$0xff]  }
  0x8a   :  { %675 = vmatpush1.bf16.msra.mxu0 %v255_v1  ;;  %3964 = vmatprep.mubr.bf16.mxu1 %v4129_v5  ;;  %v5003_v1 = vld [vmem:[#allocation2 + $0x150] ss:$12 sps:$4 sm:$0xff]   ;;  %7083 = vst [vmem:[#allocation45_spill] sm:$0xff] %v5011_v4  ;;  %v5015_v5 = vld [vmem:[#allocation2 + $0x180] ss:$12 sps:$4 sm:$0xff]  }
  0x8b   :  { %676 = vmatprep.subr.bf16.mxu0 %v6988_v0  ;;  %7080 = vst [vmem:[#allocation42_spill] sm:$0xff] %v5003_v1  ;;  %7084 = vst [vmem:[#allocation46_spill] sm:$0xff] %v5015_v5 }
  0x8e   :  { %677 = vmatpush1.bf16.msra.mxu0 %v256_v6  ;;  %v5017_v6 = vld [vmem:[#allocation2 + $0x19c] ss:$12 sps:$4 sm:$0xff]  }
  0x8f   :  { %678 = vmatprep.subr.bf16.mxu0 %v6988_v0  ;;  %7085 = vst [vmem:[#allocation47_spill] sm:$0xff] %v5017_v6 }
  0x91   :  { %3965 = vmatmul.mubr.bf16.gmra.mrb[8].mxu1 %v4132_v12  ;;  %v5035_v12 = vld [vmem:[#allocation2 + $0x1e4] ss:$12 sps:$4 sm:$0xff]  }
  0x92   :  { %679 = vmatpush1.bf16.msra.mxu0 %v257_v9  ;;  %3968 = vmatprep.mubr.bf16.mxu1 %v4137_v13  ;;  %v5027_v9 = vld [vmem:[#allocation2 + $0x1b0] ss:$12 sps:$4 sm:$0xff]   ;;  %7091 = vst [vmem:[#allocation53_spill] sm:$0xff] %v5035_v12  ;;  %v5039_v13 = vld [vmem:[#allocation2 + $0x1e0] ss:$12 sps:$4 sm:$0xff]  }
  0x93   :  { %680 = vmatprep.subr.bf16.mxu0 %v6988_v0  ;;  %7088 = vst [vmem:[#allocation50_spill] sm:$0xff] %v5027_v9  ;;  %7092 = vst [vmem:[#allocation54_spill] sm:$0xff] %v5039_v13 }
  0x96   :  { %681 = vmatpush1.bf16.msra.mxu0 %v258_v16  ;;  %v5047_v16 = vld [vmem:[#allocation2 + $0x214] ss:$12 sps:$4 sm:$0xff]  }
  0x97   :  { %682 = vmatprep.subr.bf16.mxu0 %v6988_v0  ;;  %7095 = vst [vmem:[#allocation57_spill] sm:$0xff] %v5047_v16 }
  0x99   :  { %3969 = vmatmul.mubr.bf16.gmra.mrb[12].mxu1 %v4140_v17  ;;  %v5051_v17 = vld [vmem:[#allocation2 + $0x210] ss:$12 sps:$4 sm:$0xff]  }
  0x9a   :  { %683 = vmatpush1.bf16.msra.mxu0 %v259_v18  ;;  %3972 = vmatprep.mubr.bf16.mxu1 %v4145_v19  ;;  %7096 = vst [vmem:[#allocation58_spill] sm:$0xff] %v5051_v17  ;;  %v5053_v18 = vld [vmem:[#allocation2 + $0x22c] ss:$12 sps:$4 sm:$0xff]   ;;  %v5057_v19 = vld [vmem:[#allocation2 + $0x228] ss:$12 sps:$4 sm:$0xff]  }
  0x9b   :  { %7097 = vst [vmem:[#allocation59_spill] sm:$0xff] %v5053_v18  ;;  %7098 = vst [vmem:[#allocation60_spill] sm:$0xff] %v5057_v19 }
  0x9d   :  { %685 = vmatmul.mubr.bf16.vlgmr.msra.gmra.mrb[0].mxu0 %v4873_v20 }
  0x9e   :  { %692 = vmatprep.mubr.bf16.mxu0 %v4875_v21 }
  0xa1   :  { %3973 = vmatmul.mubr.bf16.gmra.mrb[16].mxu1 %v4878_v22 }
  0xa2   :  { %3976 = vmatprep.mubr.bf16.mxu1 %v4881_v23 }
  0xa5   :  { %693 = vmatmul.mubr.bf16.gmra.mrb[4].mxu0 %v4883_v24 }
  0xa6   :  { %700 = vmatprep.mubr.bf16.mxu0 %v4885_v25 }
  0xa9   :  { %3977 = vmatmul.mubr.bf16.gmra.mrb[20].mxu1 %v4890_v26 }
  0xaa   :  { %3980 = vmatprep.mubr.bf16.mxu1 %v4893_v27 }
  0xad   :  { %701 = vmatmul.mubr.bf16.gmra.mrb[8].mxu0 %v4895_v28 }
  0xae   :  { %708 = vmatprep.mubr.bf16.mxu0 %v4897_v29 }
  0xb1   :  { %3981 = vmatmul.mubr.bf16.gmra.mrb[24].mxu1 %v4903_v30 }
  0xb2   :  { %3984 = vmatprep.mubr.bf16.mxu1 %v4905_v31 }
  0xb5   :  { %709 = vmatmul.mubr.bf16.gmra.mrb[12].mxu0 %v4907_v33 }
  0xb6   :  { %716 = vmatprep.mubr.bf16.mxu0 %v4909_v34 }
  0xb9   :  { %3985 = vmatmul.mubr.bf16.gmra.mrb[28].mxu1 %v4915_v36  ;;  %v7101_v36 = vmov 0  }
  0xba   :  { %3988 = vmatprep.mubr.bf16.mxu1 %v4917_v37 }
  0xbd   :  { %717 = vmatmul.mubr.bf16.gmra.mrb[16].mxu0 %v4919_v38 }
  0xbe   :  { %724 = vmatprep.mubr.bf16.mxu0 %v4921_v39 }
  0xc1   :  { %3989 = vmatmul.mubr.bf16.gmra.mrb[32].mxu1 %v4927_v40 }
  0xc2   :  { %3992 = vmatprep.mubr.bf16.mxu1 %v4929_v41 }
  0xc5   :  { %725 = vmatmul.mubr.bf16.gmra.mrb[20].mxu0 %v4931_v42 }
  0xc6   :  { %732 = vmatprep.mubr.bf16.mxu0 %v4933_v43 }
  0xc9   :  { %3993 = vmatmul.mubr.bf16.gmra.mrb[36].mxu1 %v4939_v44 }
  0xca   :  { %3996 = vmatprep.mubr.bf16.mxu1 %v4941_v45 }
  0xcd   :  { %733 = vmatmul.mubr.bf16.gmra.mrb[24].mxu0 %v4943_v46 }
  0xce   :  { %740 = vmatprep.mubr.bf16.mxu0 %v4945_v47 }
  0xd1   :  { %3997 = vmatmul.mubr.bf16.gmra.mrb[40].mxu1 %v4951_v48 }
  0xd2   :  { %4000 = vmatprep.mubr.bf16.mxu1 %v4953_v49 }
  0xd5   :  { %741 = vmatmul.mubr.bf16.gmra.mrb[28].mxu0 %v4955_v50 }
  0xd6   :  { %748 = vmatprep.mubr.bf16.mxu0 %v4957_v51 }
  0xd9   :  { %4001 = vmatmul.mubr.bf16.gmra.mrb[44].mxu1 %v4963_v52 }
  0xda   :  { %1206 = vmatprep.mubr.bf16.mxu1 %v4858_v35  ;;  %v4985_v35 = vld [vmem:[#allocation2 + $0x108] ss:$12 sps:$4 sm:$0xff]  }
  0xdb   :  { %7074 = vst [vmem:[#allocation36_spill] sm:$0xff] %v4985_v35 }
  0xdd   :  { %749 = vmatmul.mubr.bf16.gmra.mrb[32].mxu0 %v4965_v53 }
  0xde   :  { %756 = vmatprep.mubr.bf16.mxu0 %v4967_v54 }
  0xe5   :  { %757 = vmatmul.mubr.bf16.gmra.mrb[36].mxu0 %v4973_v55 }
  0xe6   :  { %764 = vmatprep.mubr.bf16.mxu0 %v4975_v56 }
  0xed   :  { %765 = vmatmul.mubr.bf16.gmra.mrb[40].mxu0 %v4979_v57 }
  0xee   :  { %772 = vmatprep.mubr.bf16.mxu0 %v4981_v58 }
  0xf5   :  { %773 = vmatmul.mubr.bf16.gmra.mrb[44].mxu0 %v4985_v35 }
  0xf6   :  { %780 = vmatprep.mubr.bf16.mxu0 %v4987_v59 }
  0xfd   :  { %781 = vmatmul.mubr.bf16.gmra.mrb[48].mxu0 %v4991_v60 }
  0xfe   :  { %788 = vmatprep.mubr.bf16.mxu0 %v4993_v61 }
 0x105   :  { %789 = vmatmul.mubr.bf16.gmra.mrb[52].mxu0 %v4997_v62 }
 0x106   :  { %796 = vmatprep.mubr.bf16.mxu0 %v4999_v63 }
 0x10d   :  { %797 = vmatmul.mubr.bf16.gmra.mrb[56].mxu0 %v5003_v1 }
 0x10e   :  { %804 = vmatprep.mubr.bf16.mxu0 %v5005_v2 }
 0x115   :  { %805 = vmatmul.mubr.bf16.gmra.mrb[60].mxu0 %v5009_v3 }
 0x116   :  { %812 = vmatprep.mubr.bf16.mxu0 %v5011_v4 }
 0x11d   :  { %813 = vmatmul.mubr.bf16.gmra.mrb[64].mxu0 %v5015_v5 }
 0x11e   :  { %820 = vmatprep.mubr.bf16.mxu0 %v5017_v6 }
 0x125   :  { %821 = vmatmul.mubr.bf16.gmra.mrb[68].mxu0 %v5021_v7 }
 0x126   :  { %828 = vmatprep.mubr.bf16.mxu0 %v5023_v8 }
 0x12d   :  { %829 = vmatmul.mubr.bf16.gmra.mrb[72].mxu0 %v5027_v9 }
 0x12e   :  { %836 = vmatprep.mubr.bf16.mxu0 %v5029_v10 }
 0x135   :  { %837 = vmatmul.mubr.bf16.gmra.mrb[76].mxu0 %v5033_v11 }
 0x136   :  { %844 = vmatprep.mubr.bf16.mxu0 %v5035_v12 }
 0x13d   :  { %845 = vmatmul.mubr.bf16.gmra.mrb[80].mxu0 %v5039_v13 }
 0x13e   :  { %852 = vmatprep.mubr.bf16.mxu0 %v5041_v14 }
 0x145   :  { %853 = vmatmul.mubr.bf16.gmra.mrb[84].mxu0 %v5045_v15 }
 0x146   :  { %860 = vmatprep.mubr.bf16.mxu0 %v5047_v16 }
 0x14d   :  { %861 = vmatmul.mubr.bf16.gmra.mrb[88].mxu0 %v5051_v17 }
 0x14e   :  { %868 = vmatprep.mubr.bf16.mxu0 %v5053_v18 }
 0x154   :  { %v3958_v0 = vpop.f32.mrb[0].mxu1 }
 0x155   :  { %869 = vmatmul.mubr.bf16.gmra.mrb[92].mxu0 %v5057_v19  ;;  %v911_v14 = vpop.f32.mrb[1].mxu1 }
 0x156   :  { %4020 = vmatprep.mubr.bf16.mxu0 %v4855_v32  ;;  %v3959_v13 = vpop.f32.mrb[2].mxu1 }
 0x157   :  { %v914_v15 = vpop.f32.mrb[3].mxu1 }
 0x15c   :  { %v3962_v52 = vpop.f32.mrb[4].mxu1 }
 0x15d   :  { %v927_v16 = vpop.f32.mrb[5].mxu1 }
 0x15e   :  { %v3963_v12 = vpop.f32.mrb[6].mxu1 }
 0x15f   :  { %v930_v11 = vpop.f32.mrb[7].mxu1 }
 0x164   :  { %v5061_v49 = vpop.f32.mrb[8].mxu1 }
 0x165   :  { %v943_v48 = vpop.f32.mrb[9].mxu1 }
 0x166   :  { %v5063_v17 = vpop.f32.mrb[10].mxu1 }
 0x167   :  { %v946_v18 = vpop.f32.mrb[11].mxu1 }
 0x16c   :  { %v5065_v10 = vpop.f32.mrb[12].mxu1 }
 0x16d   :  { %v5067_v9 = vpop.f32.mrb[13].mxu1 }
 0x16e   :  { %v5069_v45 = vpop.f32.mrb[14].mxu1 }
 0x16f   :  { %v5073_v8 = vpop.f32.mrb[15].mxu1 }
 0x170   :  { %v686_v19 = vpop.f32.mrb[0].mxu0 }
 0x171   :  { %v5071_v32 = vadd.f32 %v911_v14, %v686_v19  ;;  %v688_v44 = vpop.f32.mrb[1].mxu0 }
 0x172   :  { %v689_v7 = vpop.f32.mrb[2].mxu0 }
 0x173   :  { %7099 = vst [vmem:[#allocation61_spill] sm:$0xff] %v5071_v32  ;;  %v5075_v41 = vadd.f32 %v914_v15, %v689_v7  ;;  %v691_v6 = vpop.f32.mrb[3].mxu0 }
 0x174   :  { %v5079_v5 = vpop.f32.mrb[16].mxu1 }
 0x175   :  { %7100 = vst [vmem:[#allocation62_spill] sm:$0xff] %v5075_v41  ;;  %v1150_v40 = vpack.c.bf16 %v5075_v41, %v5071_v32  ;;  %v5081_v37 = vpop.f32.mrb[17].mxu1 }
 0x176   :  { %v5084_v14 = vpop.f32.mrb[18].mxu1 }
 0x177   :  { %1175 = vmatpush1.bf16.msra.mxu1 %v1150_v40  ;;  %v5088_v3 = vpop.f32.mrb[19].mxu1 }
 0x178   :  { %v694_v4 = vpop.f32.mrb[4].mxu0  ;;  %1176 = vmatprep.subr.bf16.mxu1 %v7101_v36 }
 0x179   :  { %v5086_v44 = vadd.f32 %v3958_v0, %v694_v4  ;;  %v696_v19 = vpop.f32.mrb[5].mxu0 }
 0x17a   :  { %v697_v7 = vpop.f32.mrb[6].mxu0 }
 0x17b   :  { %7102 = vst [vmem:[#allocation63_spill] sm:$0xff] %v5086_v44  ;;  %v5090_v6 = vadd.f32 %v3959_v13, %v697_v7  ;;  %v699_v15 = vpop.f32.mrb[7].mxu0 }
 0x17c   :  { %v5094_v40 = vpop.f32.mrb[20].mxu1 }
 0x17d   :  { %7103 = vst [vmem:[#allocation64_spill] sm:$0xff] %v5090_v6  ;;  %v1151_v41 = vpack.c.bf16 %v5090_v6, %v5086_v44  ;;  %v5096_v32 = vpop.f32.mrb[21].mxu1 }
 0x17e   :  { %v5099_v0 = vpop.f32.mrb[22].mxu1 }
 0x17f   :  { %1177 = vmatpush1.bf16.msra.mxu1 %v1151_v41  ;;  %v5103_v2 = vpop.f32.mrb[23].mxu1 }
 0x180   :  { %v702_v31 = vpop.f32.mrb[8].mxu0  ;;  %1178 = vmatprep.subr.bf16.mxu1 %v7101_v36 }
 0x181   :  { %v5101_v4 = vadd.f32 %v927_v16, %v702_v31  ;;  %v704_v19 = vpop.f32.mrb[9].mxu0 }
 0x182   :  { %v705_v13 = vpop.f32.mrb[10].mxu0 }
 0x183   :  { %7104 = vst [vmem:[#allocation65_spill] sm:$0xff] %v5101_v4  ;;  %v5105_v7 = vadd.f32 %v930_v11, %v705_v13  ;;  %v707_v15 = vpop.f32.mrb[11].mxu0 }
 0x184   :  { %v5109_v41 = vpop.f32.mrb[24].mxu1 }
 0x185   :  { %7105 = vst [vmem:[#allocation66_spill] sm:$0xff] %v5105_v7  ;;  %v1152_v6 = vpack.c.bf16 %v5105_v7, %v5101_v4  ;;  %v5111_v44 = vpop.f32.mrb[25].mxu1 }
 0x186   :  { %v5114_v31 = vpop.f32.mrb[26].mxu1 }
 0x187   :  { %1179 = vmatpush1.bf16.msra.mxu1 %v1152_v6  ;;  %v5118_v1 = vpop.f32.mrb[27].mxu1 }
 0x188   :  { %v710_v30 = vpop.f32.mrb[12].mxu0  ;;  %1180 = vmatprep.subr.bf16.mxu1 %v7101_v36 }
 0x189   :  { %v5116_v16 = vadd.f32 %v3962_v52, %v710_v30  ;;  %v712_v19 = vpop.f32.mrb[13].mxu0 }
 0x18a   :  { %v713_v11 = vpop.f32.mrb[14].mxu0 }
 0x18b   :  { %7106 = vst [vmem:[#allocation67_spill] sm:$0xff] %v5116_v16  ;;  %v5120_v13 = vadd.f32 %v3963_v12, %v713_v11  ;;  %v715_v15 = vpop.f32.mrb[15].mxu0 }
 0x18c   :  { %v5124_v6 = vpop.f32.mrb[28].mxu1 }
 0x18d   :  { %7107 = vst [vmem:[#allocation68_spill] sm:$0xff] %v5120_v13  ;;  %v1153_v7 = vpack.c.bf16 %v5120_v13, %v5116_v16  ;;  %v5126_v4 = vpop.f32.mrb[29].mxu1 }
 0x18e   :  { %v5129_v30 = vpop.f32.mrb[30].mxu1 }
 0x18f   :  { %1181 = vmatpush1.bf16.msra.mxu1 %v1153_v7  ;;  %v5133_v63 = vpop.f32.mrb[31].mxu1 }
 0x190   :  { %v718_v27 = vpop.f32.mrb[16].mxu0  ;;  %1182 = vmatprep.subr.bf16.mxu1 %v7101_v36 }
 0x191   :  { %v5131_v52 = vadd.f32 %v943_v48, %v718_v27  ;;  %v720_v19 = vpop.f32.mrb[17].mxu0 }
 0x192   :  { %v721_v12 = vpop.f32.mrb[18].mxu0 }
 0x193   :  { %7108 = vst [vmem:[#allocation69_spill] sm:$0xff] %v5131_v52  ;;  %v5135_v11 = vadd.f32 %v946_v18, %v721_v12  ;;  %v723_v15 = vpop.f32.mrb[19].mxu0 }
 0x194   :  { %v5139_v7 = vpop.f32.mrb[32].mxu1 }
 0x195   :  { %7109 = vst [vmem:[#allocation70_spill] sm:$0xff] %v5135_v11  ;;  %v1154_v13 = vpack.c.bf16 %v5135_v11, %v5131_v52  ;;  %v5141_v16 = vpop.f32.mrb[33].mxu1 }
 0x196   :  { %v5144_v27 = vpop.f32.mrb[34].mxu1 }
 0x197   :  { %1183 = vmatpush1.bf16.msra.mxu1 %v1154_v13  ;;  %v5149_v18 = vpop.f32.mrb[35].mxu1 }
 0x198   :  { %v726_v26 = vpop.f32.mrb[20].mxu0  ;;  %1184 = vmatprep.subr.bf16.mxu1 %v7101_v36 }
 0x199   :  { %v5147_v48 = vadd.f32 %v5061_v49, %v726_v26  ;;  %v728_v19 = vpop.f32.mrb[21].mxu0 }
 0x19a   :  { %v729_v12 = vpop.f32.mrb[22].mxu0 }
 0x19b   :  { %7110 = vst [vmem:[#allocation71_spill] sm:$0xff] %v5147_v48  ;;  %v5152_v15 = vadd.f32 %v5063_v17, %v729_v12  ;;  %v731_v11 = vpop.f32.mrb[23].mxu0 }
 0x19c   :  { %v5156_v52 = vpop.f32.mrb[36].mxu1 }
 0x19d   :  { %7111 = vst [vmem:[#allocation72_spill] sm:$0xff] %v5152_v15  ;;  %v1155_v13 = vpack.c.bf16 %v5152_v15, %v5147_v48  ;;  %v5158_v62 = vpop.f32.mrb[37].mxu1 }
 0x19e   :  { %v5161_v26 = vpop.f32.mrb[38].mxu1 }
 0x19f   :  { %1185 = vmatpush1.bf16.msra.mxu1 %v1155_v13  ;;  %v5166_v17 = vpop.f32.mrb[39].mxu1 }
 0x1a0   :  { %v734_v23 = vpop.f32.mrb[24].mxu0  ;;  %1186 = vmatprep.subr.bf16.mxu1 %v7101_v36 }
 0x1a1   :  { %v5164_v49 = vadd.f32 %v5067_v9, %v734_v23  ;;  %v736_v19 = vpop.f32.mrb[25].mxu0 }
 0x1a2   :  { %v737_v11 = vpop.f32.mrb[26].mxu0 }
 0x1a3   :  { %7112 = vst [vmem:[#allocation73_spill] sm:$0xff] %v5164_v49  ;;  %v5169_v12 = vadd.f32 %v5073_v8, %v737_v11  ;;  %v739_v15 = vpop.f32.mrb[27].mxu0 }
 0x1a4   :  { %v5173_v48 = vpop.f32.mrb[40].mxu1 }
 0x1a5   :  { %7113 = vst [vmem:[#allocation74_spill] sm:$0xff] %v5169_v12  ;;  %v1156_v13 = vpack.c.bf16 %v5169_v12, %v5164_v49  ;;  %v5175_v61 = vpop.f32.mrb[41].mxu1 }
 0x1a6   :  { %v5178_v23 = vpop.f32.mrb[42].mxu1 }
 0x1a7   :  { %1187 = vmatpush1.bf16.msra.mxu1 %v1156_v13  ;;  %v5183_v8 = vpop.f32.mrb[43].mxu1 }
 0x1a8   :  { %v742_v22 = vpop.f32.mrb[28].mxu0  ;;  %1188 = vmatprep.subr.bf16.mxu1 %v7101_v36 }
 0x1a9   :  { %v5181_v9 = vadd.f32 %v5065_v10, %v742_v22  ;;  %v744_v19 = vpop.f32.mrb[29].mxu0 }
 0x1aa   :  { %v745_v15 = vpop.f32.mrb[30].mxu0 }
 0x1ab   :  { %7114 = vst [vmem:[#allocation75_spill] sm:$0xff] %v5181_v9  ;;  %v5186_v11 = vadd.f32 %v5069_v45, %v745_v15  ;;  %v747_v12 = vpop.f32.mrb[31].mxu0 }
 0x1ac   :  { %v5190_v49 = vpop.f32.mrb[44].mxu1 }
 0x1ad   :  { %7115 = vst [vmem:[#allocation76_spill] sm:$0xff] %v5186_v11  ;;  %v1157_v13 = vpack.c.bf16 %v5186_v11, %v5181_v9  ;;  %v5192_v60 = vpop.f32.mrb[45].mxu1 }
 0x1ae   :  { %v5195_v22 = vpop.f32.mrb[46].mxu1 }
 0x1af   :  { %1189 = vmatpush1.bf16.msra.mxu1 %v1157_v13  ;;  %v5200_v45 = vpop.f32.mrb[47].mxu1 }
 0x1b0   :  { %v750_v59 = vpop.f32.mrb[32].mxu0  ;;  %1190 = vmatprep.subr.bf16.mxu1 %v7101_v36 }
 0x1b1   :  { %v5198_v10 = vadd.f32 %v5081_v37, %v750_v59  ;;  %v752_v19 = vpop.f32.mrb[33].mxu0 }
 0x1b2   :  { %v753_v12 = vpop.f32.mrb[34].mxu0 }
 0x1b3   :  { %v5203_v15 = vadd.f32 %v5088_v3, %v753_v12  ;;  %v755_v11 = vpop.f32.mrb[35].mxu0 }
 0x1b5   :  { %7116 = vst [vmem:[#allocation77_spill] sm:$0xff] %v5203_v15  ;;  %v1158_v13 = vpack.c.bf16 %v5203_v15, %v5198_v10 }
 0x1b7   :  { %1191 = vmatpush1.bf16.msra.mxu1 %v1158_v13 }
 0x1b8   :  { %v758_v9 = vpop.f32.mrb[36].mxu0  ;;  %1192 = vmatprep.subr.bf16.mxu1 %v7101_v36 }
 0x1b9   :  { %v5209_v35 = vadd.f32 %v5079_v5, %v758_v9  ;;  %v760_v37 = vpop.f32.mrb[37].mxu0 }
 0x1ba   :  { %v761_v59 = vpop.f32.mrb[38].mxu0 }
 0x1bb   :  { %v5212_v19 = vadd.f32 %v5084_v14, %v761_v59  ;;  %v763_v58 = vpop.f32.mrb[39].mxu0 }
 0x1bd   :  { %v1159_v3 = vpack.c.bf16 %v5212_v19, %v5209_v35 }
 0x1bf   :  { %1193 = vmatpush1.bf16.msra.mxu1 %v1159_v3 }
 0x1c0   :  { %v766_v11 = vpop.f32.mrb[40].mxu0  ;;  %1194 = vmatprep.subr.bf16.mxu1 %v7101_v36 }
 0x1c1   :  { %v5218_v12 = vadd.f32 %v5096_v32, %v766_v11  ;;  %v768_v13 = vpop.f32.mrb[41].mxu0 }
 0x1c2   :  { %v769_v15 = vpop.f32.mrb[42].mxu0 }
 0x1c3   :  { %v5221_v5 = vadd.f32 %v5103_v2, %v769_v15  ;;  %v771_v9 = vpop.f32.mrb[43].mxu0 }
 0x1c5   :  { %v1160_v14 = vpack.c.bf16 %v5221_v5, %v5218_v12 }
 0x1c7   :  { %1195 = vmatpush1.bf16.msra.mxu1 %v1160_v14 }
 0x1c8   :  { %v774_v58 = vpop.f32.mrb[44].mxu0  ;;  %1196 = vmatprep.subr.bf16.mxu1 %v7101_v36 }
 0x1c9   :  { %v5227_v37 = vadd.f32 %v5094_v40, %v774_v58  ;;  %v776_v59 = vpop.f32.mrb[45].mxu0 }
 0x1ca   :  { %v777_v3 = vpop.f32.mrb[46].mxu0 }
 0x1cb   :  { %v5230_v32 = vadd.f32 %v5099_v0, %v777_v3  ;;  %v779_v11 = vpop.f32.mrb[47].mxu0 }
 0x1cd   :  { %v1161_v2 = vpack.c.bf16 %v5230_v32, %v5227_v37 }
 0x1cf   :  { %1197 = vmatpush1.bf16.msra.mxu1 %v1161_v2 }
 0x1d0   :  { %v782_v15 = vpop.f32.mrb[48].mxu0  ;;  %1198 = vmatprep.subr.bf16.mxu1 %v7101_v36 }
 0x1d1   :  { %v5236_v13 = vadd.f32 %v5111_v44, %v782_v15  ;;  %v784_v9 = vpop.f32.mrb[49].mxu0 }
 0x1d2   :  { %v785_v14 = vpop.f32.mrb[50].mxu0 }
 0x1d3   :  { %v5239_v40 = vadd.f32 %v5118_v1, %v785_v14  ;;  %v787_v58 = vpop.f32.mrb[51].mxu0 }
 0x1d5   :  { %v1162_v0 = vpack.c.bf16 %v5239_v40, %v5236_v13 }
 0x1d7   :  { %1199 = vmatpush1.bf16.msra.mxu1 %v1162_v0 }
 0x1d8   :  { %v790_v59 = vpop.f32.mrb[52].mxu0  ;;  %1200 = vmatprep.subr.bf16.mxu1 %v7101_v36 }
 0x1d9   :  { %v5245_v3 = vadd.f32 %v5109_v41, %v790_v59  ;;  %v792_v11 = vpop.f32.mrb[53].mxu0 }
 0x1da   :  { %v793_v2 = vpop.f32.mrb[54].mxu0 }
 0x1db   :  { %v5248_v44 = vadd.f32 %v5114_v31, %v793_v2  ;;  %v795_v15 = vpop.f32.mrb[55].mxu0 }
 0x1dd   :  { %v1163_v1 = vpack.c.bf16 %v5248_v44, %v5245_v3 }
 0x1df   :  { %1201 = vmatpush1.bf16.msra.mxu1 %v1163_v1 }
 0x1e0   :  { %v798_v9 = vpop.f32.mrb[56].mxu0  ;;  %1202 = vmatprep.subr.bf16.mxu1 %v7101_v36 }
 0x1e1   :  { %v5254_v14 = vadd.f32 %v5126_v4, %v798_v9  ;;  %v800_v58 = vpop.f32.mrb[57].mxu0 }
 0x1e2   :  { %v801_v0 = vpop.f32.mrb[58].mxu0 }
 0x1e3   :  { %v5257_v41 = vadd.f32 %v5133_v63, %v801_v0  ;;  %v803_v59 = vpop.f32.mrb[59].mxu0 }
 0x1e5   :  { %v1164_v31 = vpack.c.bf16 %v5257_v41, %v5254_v14 }
 0x1e7   :  { %1203 = vmatpush1.bf16.msra.mxu1 %v1164_v31 }
 0x1e8   :  { %v806_v11 = vpop.f32.mrb[60].mxu0  ;;  %1204 = vmatprep.subr.bf16.mxu1 %v7101_v36 }
 0x1e9   :  { %v5263_v2 = vadd.f32 %v5124_v6, %v806_v11  ;;  %v808_v15 = vpop.f32.mrb[61].mxu0 }
 0x1ea   :  { %v809_v1 = vpop.f32.mrb[62].mxu0 }
 0x1eb   :  { %v5266_v4 = vadd.f32 %v5129_v30, %v809_v1  ;;  %v811_v9 = vpop.f32.mrb[63].mxu0 }
 0x1ed   :  { %v1165_v63 = vpack.c.bf16 %v5266_v4, %v5263_v2 }
 0x1ef   :  { %1205 = vmatpush1.bf16.msra.mxu1 %v1165_v63 }
 0x1f0   :  { %v814_v58 = vpop.f32.mrb[64].mxu0 }
 0x1f1   :  { %v5271_v0 = vadd.f32 %v5141_v16, %v814_v58  ;;  %v816_v59 = vpop.f32.mrb[65].mxu0 }
 0x1f2   :  { %v817_v31 = vpop.f32.mrb[66].mxu0  ;;  %1207 = vmatmul.mubr.bf16.vlgmr.msra.gmra.mrb[48].mxu1 %v4873_v20 }
 0x1f3   :  { %v5275_v6 = vadd.f32 %v5149_v18, %v817_v31  ;;  %v819_v11 = vpop.f32.mrb[67].mxu0  ;;  %1214 = vmatprep.mubr.bf16.mxu1 %v4875_v21 }
 0x1f5   :  { %v1166_v30 = vpack.c.bf16 %v5275_v6, %v5271_v0 }
 0x1f7   :  { %4004 = vmatprep.subr.bf16.mxu0 %v1166_v30 }
 0x1f8   :  { %v822_v15 = vpop.f32.mrb[68].mxu0  ;;  %4005 = vmatpush3.bf16.msra.mxu0 %v1166_v30 }
 0x1f9   :  { %v5281_v1 = vadd.f32 %v5139_v7, %v822_v15  ;;  %v824_v16 = vpop.f32.mrb[69].mxu0 }
 0x1fa   :  { %v825_v9 = vpop.f32.mrb[70].mxu0  ;;  %1215 = vmatmul.mubr.bf16.gmra.mrb[52].mxu1 %v4883_v24 }
 0x1fb   :  { %v5285_v20 = vadd.f32 %v5144_v27, %v825_v9  ;;  %1222 = vmatprep.mubr.bf16.mxu1 %v4885_v25  ;;  %v827_v18 = vpop.f32.mrb[71].mxu0 }
 0x1fd   :  { %v1167_v21 = vpack.c.bf16 %v5285_v20, %v5281_v1 }
 0x1ff   :  { %4006 = vmatprep.subr.bf16.mxu0 %v1167_v21 }
 0x200   :  { %4007 = vmatpush3.bf16.msra.mxu0 %v1167_v21  ;;  %v830_v63 = vpop.f32.mrb[72].mxu0 }
 0x201   :  { %v5291_v58 = vadd.f32 %v5158_v62, %v830_v63  ;;  %v832_v7 = vpop.f32.mrb[73].mxu0 }
 0x202   :  { %1223 = vmatmul.mubr.bf16.gmra.mrb[56].mxu1 %v4895_v28  ;;  %v833_v59 = vpop.f32.mrb[74].mxu0 }
 0x203   :  { %1230 = vmatprep.mubr.bf16.mxu1 %v4897_v29  ;;  %v5296_v24 = vadd.f32 %v5166_v17, %v833_v59  ;;  %v835_v25 = vpop.f32.mrb[75].mxu0 }
 0x205   :  { %v1168_v27 = vpack.c.bf16 %v5296_v24, %v5291_v58 }
 0x207   :  { %4008 = vmatprep.subr.bf16.mxu0 %v1168_v27 }
 0x208   :  { %v838_v31 = vpop.f32.mrb[76].mxu0  ;;  %4009 = vmatpush3.bf16.msra.mxu0 %v1168_v27 }
 0x209   :  { %v5301_v11 = vadd.f32 %v5156_v52, %v838_v31  ;;  %v840_v62 = vpop.f32.mrb[77].mxu0 }
 0x20a   :  { %1231 = vmatmul.mubr.bf16.gmra.mrb[60].mxu1 %v4907_v33  ;;  %v841_v28 = vpop.f32.mrb[78].mxu0 }
 0x20b   :  { %7117 = vst [vmem:[#allocation78_spill] sm:$0xff] %v5301_v11  ;;  %1238 = vmatprep.mubr.bf16.mxu1 %v4909_v34  ;;  %v5306_v29 = vadd.f32 %v5161_v26, %v841_v28  ;;  %v843_v17 = vpop.f32.mrb[79].mxu0  ;;  %v4211_v28 = vld [vmem:[#allocation8 + $0x4] ss:$8 sps:$4 sm:$0xff]  }
 0x20c   :  { %v4214_v17 = vld [vmem:[#allocation8 + $0x14] ss:$8 sps:$4 sm:$0xff]   ;;  %1804 = vmatprep.subr.bf16.mxu1 %v4211_v28 }
 0x20d   :  { %7118 = vst [vmem:[#allocation79_spill] sm:$0xff] %v5306_v29  ;;  %v1169_v30 = vpack.c.bf16 %v5306_v29, %v5301_v11  ;;  %v7138_v28 = vld [vmem:[#allocation42_spill] sm:$0xff] }
 0x20f   :  { %4010 = vmatprep.subr.bf16.mxu0 %v1169_v30 }
 0x210   :  { %v846_v15 = vpop.f32.mrb[80].mxu0  ;;  %4011 = vmatpush3.bf16.msra.mxu0 %v1169_v30 }
 0x211   :  { %v5311_v16 = vadd.f32 %v5175_v61, %v846_v15  ;;  %v848_v52 = vpop.f32.mrb[81].mxu0  ;;  %v4217_v15 = vld [vmem:[#allocation8 + $0x24] ss:$8 sps:$4 sm:$0xff]  }
 0x212   :  { %1239 = vmatmul.mubr.bf16.gmra.mrb[64].mxu1 %v4919_v38  ;;  %v849_v33 = vpop.f32.mrb[82].mxu0  ;;  %v4473_v52 = vld [vmem:[#allocation2 + $0x20] ss:$12 sps:$4 sm:$0xff]  }
 0x213   :  { %7119 = vst [vmem:[#allocation80_spill] sm:$0xff] %v5311_v16  ;;  %1246 = vmatprep.mubr.bf16.mxu1 %v4921_v39  ;;  %v5316_v34 = vadd.f32 %v5183_v8, %v849_v33  ;;  %v851_v26 = vpop.f32.mrb[83].mxu0  ;;  %v4218_v33 = vld [vmem:[#allocation8 + $0x30] ss:$8 sps:$4 sm:$0xff]  }
 0x214   :  { %v4223_v26 = vld [vmem:[#allocation8 + $0x44] ss:$8 sps:$4 sm:$0xff]  }
 0x215   :  { %7120 = vst [vmem:[#allocation81_spill] sm:$0xff] %v5316_v34  ;;  %v1170_v9 = vpack.c.bf16 %v5316_v34, %v5311_v16 }
 0x217   :  { %4012 = vmatprep.subr.bf16.mxu0 %v1170_v9 }
 0x218   :  { %v854_v18 = vpop.f32.mrb[84].mxu0  ;;  %4013 = vmatpush3.bf16.msra.mxu0 %v1170_v9  ;;  %v4221_v9 = vld [vmem:[#allocation8 + $0x40] ss:$8 sps:$4 sm:$0xff]  }
 0x219   :  { %v5321_v21 = vadd.f32 %v5173_v48, %v854_v18  ;;  %v856_v61 = vpop.f32.mrb[85].mxu0  ;;  %v4475_v18 = vld [vmem:[#allocation2 + $0x50] ss:$12 sps:$4 sm:$0xff]  }
 0x21a   :  { %1247 = vmatmul.mubr.bf16.gmra.mrb[68].mxu1 %v4931_v42  ;;  %v857_v38 = vpop.f32.mrb[86].mxu0  ;;  %v7127_v61 = vld [vmem:[#allocation35_spill] sm:$0xff] }
 0x21b   :  { %7121 = vst [vmem:[#allocation82_spill] sm:$0xff] %v5321_v21  ;;  %1254 = vmatprep.mubr.bf16.mxu1 %v4933_v43  ;;  %v5326_v39 = vadd.f32 %v5178_v23, %v857_v38  ;;  %v859_v8 = vpop.f32.mrb[87].mxu0  ;;  %v4478_v38 = vld [vmem:[#allocation2 + $0x98] ss:$12 sps:$4 sm:$0xff]  }
 0x21c   :  { %v4226_v8 = vld [vmem:[#allocation8 + $0x54] ss:$8 sps:$4 sm:$0xff]  }
 0x21d   :  { %7122 = vst [vmem:[#allocation83_spill] sm:$0xff] %v5326_v39  ;;  %v1171_v63 = vpack.c.bf16 %v5326_v39, %v5321_v21  ;;  %v7171_v21 = vld [vmem:[#allocation62_spill] sm:$0xff] }
 0x21f   :  { %4014 = vmatprep.subr.bf16.mxu0 %v1171_v63 }
 0x220   :  { %v862_v7 = vpop.f32.mrb[88].mxu0  ;;  %4015 = vmatpush3.bf16.msra.mxu0 %v1171_v63  ;;  %v4224_v63 = vld [vmem:[#allocation8 + $0x50] ss:$8 sps:$4 sm:$0xff]  }
 0x221   :  { %v5331_v59 = vadd.f32 %v5192_v60, %v862_v7  ;;  %v864_v48 = vpop.f32.mrb[89].mxu0  ;;  %v4479_v7 = vld [vmem:[#allocation2 + $0xb0] ss:$12 sps:$4 sm:$0xff]  }
 0x222   :  { %1255 = vmatmul.mubr.bf16.gmra.mrb[72].mxu1 %v4943_v46  ;;  %v865_v42 = vpop.f32.mrb[90].mxu0  ;;  %v4209_v46 = vld [vmem:[#allocation8] ss:$8 sps:$4 sm:$0xff]  }
 0x223   :  { %7123 = vst [vmem:[#allocation84_spill] sm:$0xff] %v5331_v59  ;;  %v5335_v25 = vadd.f32 %v5200_v45, %v865_v42  ;;  %v867_v43 = vpop.f32.mrb[91].mxu0  ;;  %1262 = vmatprep.mubr.bf16.mxu1 %v4945_v47  ;;  %1805 = vmatpush1.bf16.msra.mxu1 %v4209_v46  ;;  %v7129_v48 = vld [vmem:[#allocation37_spill] sm:$0xff]  ;;  %v7130_v42 = vld [vmem:[#allocation38_spill] sm:$0xff]  ;;  %v7137_v46 = vld [vmem:[#allocation23_spill] sm:$0xff] }
 0x224   :  { %1806 = vmatprep.subr.bf16.mxu1 %v4214_v17  ;;  %v7132_v43 = vld [vmem:[#allocation39_spill] sm:$0xff] }
 0x225   :  { %7124 = vst [vmem:[#allocation85_spill] sm:$0xff] %v5335_v25  ;;  %v1172_v23 = vpack.c.bf16 %v5335_v25, %v5331_v59  ;;  %v7140_v17 = vld [vmem:[#allocation43_spill] sm:$0xff] }
 0x227   :  { %4016 = vmatprep.subr.bf16.mxu0 %v1172_v23 }
 0x228   :  { %v870_v27 = vpop.f32.mrb[92].mxu0  ;;  %4017 = vmatpush3.bf16.msra.mxu0 %v1172_v23  ;;  %v7133_v23 = vld [vmem:[#allocation21_spill] sm:$0xff] }
 0x229   :  { %v5341_v31 = vadd.f32 %v5190_v49, %v870_v27  ;;  %v872_v60 = vpop.f32.mrb[93].mxu0  ;;  %v4212_v49 = vld [vmem:[#allocation8 + $0x10] ss:$8 sps:$4 sm:$0xff]   ;;  %v7134_v27 = vld [vmem:[#allocation40_spill] sm:$0xff] }
 0x22a   :  { %v873_v62 = vpop.f32.mrb[94].mxu0  ;;  %1263 = vmatmul.mubr.bf16.gmra.mrb[76].mxu1 %v4955_v50  ;;  %v4215_v50 = vld [vmem:[#allocation8 + $0x20] ss:$8 sps:$4 sm:$0xff]   ;;  %v7135_v60 = vld [vmem:[#allocation22_spill] sm:$0xff] }
 0x22b   :  { %7125 = vst [vmem:[#allocation86_spill] sm:$0xff] %v5341_v31  ;;  %v5345_v45 = vadd.f32 %v5195_v22, %v873_v62  ;;  %1270 = vmatprep.mubr.bf16.mxu1 %v4957_v51  ;;  %v875_v47 = vpop.f32.mrb[95].mxu0  ;;  %1807 = vmatpush1.bf16.msra.mxu1 %v4212_v49  ;;  %v4220_v22 = vld [vmem:[#allocation8 + $0x34] ss:$8 sps:$4 sm:$0xff]   ;;  %v4474_v51 = vld [vmem:[#allocation2 + $0x38] ss:$12 sps:$4 sm:$0xff]  }
 0x22c   :  { %1808 = vmatprep.subr.bf16.mxu1 %v4217_v15  ;;  %v7136_v62 = vld [vmem:[#allocation41_spill] sm:$0xff]  ;;  %v7139_v47 = vld [vmem:[#allocation24_spill] sm:$0xff]  ;;  %v7143_v15 = vld [vmem:[#allocation26_spill] sm:$0xff] }
 0x22d   :  { %7126 = vst [vmem:[#allocation87_spill] sm:$0xff] %v5345_v45  ;;  %v1173_v30 = vpack.c.bf16 %v5345_v45, %v5341_v31  ;;  %v7142_v49 = vld [vmem:[#allocation44_spill] sm:$0xff]  ;;  %v4483_v45 = vld [vmem:[#allocation5 + $0x18] sm:$0xff] }
 0x22e   :  { %v7170_v31 = vld [vmem:[#allocation64_spill] sm:$0xff] }
 0x22f   :  { %4018 = vmatprep.subr.bf16.mxu0 %v1173_v30  ;;  %1809 = vmatpush1.bf16.msra.mxu1 %v4215_v50  ;;  %v7144_v50 = vld [vmem:[#allocation45_spill] sm:$0xff] }
 0x230   :  { %4019 = vmatpush3.bf16.msra.mxu0 %v1173_v30  ;;  %1810 = vmatprep.subr.bf16.mxu1 %v4220_v22  ;;  %v7141_v30 = vld [vmem:[#allocation25_spill] sm:$0xff]  ;;  %v7145_v22 = vld [vmem:[#allocation27_spill] sm:$0xff] }
 0x232   :  { %1271 = vmatmul.mubr.bf16.gmra.mrb[80].mxu1 %v4965_v53  ;;  %v4476_v53 = vld [vmem:[#allocation2 + $0x68] ss:$12 sps:$4 sm:$0xff]  }
 0x233   :  { %4021 = vmatmul.mubr.bf16.vlgmr.msra.gmra.mrb[96].mxu0 %v4473_v52  ;;  %1278 = vmatprep.mubr.bf16.mxu1 %v4967_v54  ;;  %v4477_v54 = vld [vmem:[#allocation2 + $0x80] ss:$12 sps:$4 sm:$0xff]   ;;  %v7146_v52 = vld [vmem:[#allocation46_spill] sm:$0xff] }
 0x234   :  { %4024 = vmatprep.mubr.bf16.mxu0 %v4474_v51  ;;  %1811 = vmatpush1.bf16.msra.mxu1 %v4218_v33  ;;  %v7147_v51 = vld [vmem:[#allocation28_spill] sm:$0xff]  ;;  %v7148_v33 = vld [vmem:[#allocation47_spill] sm:$0xff] }
 0x235   :  { %1812 = vmatprep.subr.bf16.mxu1 %v4223_v26  ;;  %v7149_v26 = vld [vmem:[#allocation29_spill] sm:$0xff] }
 0x238   :  { %1813 = vmatpush1.bf16.msra.mxu1 %v4221_v9  ;;  %v7150_v9 = vld [vmem:[#allocation48_spill] sm:$0xff] }
 0x239   :  { %1814 = vmatprep.subr.bf16.mxu1 %v4226_v8  ;;  %v7156_v8 = vld [vmem:[#allocation32_spill] sm:$0xff] }
 0x23a   :  { %1279 = vmatmul.mubr.bf16.gmra.mrb[84].mxu1 %v4973_v55  ;;  %v7128_v55 = vld [vmem:[#allocation36_spill] sm:$0xff] }
 0x23b   :  { %4025 = vmatmul.mubr.bf16.gmra.mrb[100].mxu0 %v4475_v18  ;;  %1286 = vmatprep.mubr.bf16.mxu1 %v4975_v56  ;;  %v4480_v56 = vld [vmem:[#allocation2 + $0xc8] ss:$12 sps:$4 sm:$0xff]  }
 0x23c   :  { %4028 = vmatprep.mubr.bf16.mxu0 %v4476_v53  ;;  %1815 = vmatpush1.bf16.msra.mxu1 %v4224_v63  ;;  %v7151_v18 = vld [vmem:[#allocation49_spill] sm:$0xff]  ;;  %v7152_v53 = vld [vmem:[#allocation30_spill] sm:$0xff] }
 0x23d   :  { %v7157_v63 = vld [vmem:[#allocation33_spill] sm:$0xff] }
 0x242   :  { %1287 = vmatmul.mubr.bf16.gmra.mrb[88].mxu1 %v4979_v57  ;;  %v7131_v57 = vld [vmem:[#allocation20_spill] sm:$0xff] }
 0x243   :  { %4029 = vmatmul.mubr.bf16.gmra.mrb[104].mxu0 %v4477_v54  ;;  %1294 = vmatprep.mubr.bf16.mxu1 %v7127_v61  ;;  %v7153_v54 = vld [vmem:[#allocation31_spill] sm:$0xff]  ;;  %v7154_v61 = vld [vmem:[#allocation50_spill] sm:$0xff] }
 0x244   :  { %4032 = vmatprep.mubr.bf16.mxu0 %v4478_v38  ;;  %v7155_v38 = vld [vmem:[#allocation51_spill] sm:$0xff] }
 0x24a   :  { %1295 = vmatmul.mubr.bf16.gmra.mrb[92].mxu1 %v7128_v55  ;;  %v4229_v55 = vld [vmem:[#allocation8 + $0x64] ss:$8 sps:$4 sm:$0xff]  }
 0x24b   :  { %4033 = vmatmul.mubr.bf16.gmra.mrb[108].mxu0 %v4479_v7  ;;  %1302 = vmatprep.mubr.bf16.mxu1 %v7129_v48  ;;  %v4227_v7 = vld [vmem:[#allocation8 + $0x60] ss:$8 sps:$4 sm:$0xff]  }
 0x24c   :  { %4036 = vmatprep.mubr.bf16.mxu0 %v4480_v56  ;;  %1816 = vmatprep.subr.bf16.mxu1 %v4229_v55  ;;  %v7158_v48 = vld [vmem:[#allocation52_spill] sm:$0xff]  ;;  %v4232_v56 = vld [vmem:[#allocation8 + $0x74] ss:$8 sps:$4 sm:$0xff]  }
 0x24d   :  { %1817 = vmatpush1.bf16.msra.mxu1 %v4227_v7 }
 0x24e   :  { %1818 = vmatprep.subr.bf16.mxu1 %v4232_v56 }
 0x252   :  { %1303 = vmatmul.mubr.bf16.gmra.mrb[96].mxu1 %v7130_v42  ;;  %v7159_v42 = vld [vmem:[#allocation53_spill] sm:$0xff] }
 0x253   :  { %4037 = vmatmul.mubr.bf16.gmra.mrb[112].mxu0 %v7131_v57  ;;  %1310 = vmatprep.mubr.bf16.mxu1 %v7132_v43  ;;  %v7160_v57 = vld [vmem:[#allocation34_spill] sm:$0xff] }
 0x254   :  { %4040 = vmatprep.mubr.bf16.mxu0 %v7133_v23  ;;  %v4230_v43 = vld [vmem:[#allocation8 + $0x70] ss:$8 sps:$4 sm:$0xff]  }
 0x255   :  { %1819 = vmatpush1.bf16.msra.mxu1 %v4230_v43  ;;  %v7161_v23 = vld [vmem:[#allocation54_spill] sm:$0xff] }
 0x25a   :  { %1311 = vmatmul.mubr.bf16.gmra.mrb[100].mxu1 %v7134_v27  ;;  %v7162_v27 = vld [vmem:[#allocation55_spill] sm:$0xff] }
 0x25b   :  { %4041 = vmatmul.mubr.bf16.gmra.mrb[116].mxu0 %v7135_v60  ;;  %1318 = vmatprep.mubr.bf16.mxu1 %v7136_v62  ;;  %v7163_v60 = vld [vmem:[#allocation56_spill] sm:$0xff]  ;;  %v7164_v62 = vld [vmem:[#allocation57_spill] sm:$0xff] }
 0x25c   :  { %4044 = vmatprep.mubr.bf16.mxu0 %v7137_v46  ;;  %v7165_v46 = vld [vmem:[#allocation58_spill] sm:$0xff] }
 0x262   :  { %1319 = vmatmul.mubr.bf16.gmra.mrb[104].mxu1 %v7138_v28  ;;  %v7166_v28 = vld [vmem:[#allocation59_spill] sm:$0xff] }
 0x263   :  { %4045 = vmatmul.mubr.bf16.gmra.mrb[120].mxu0 %v7139_v47  ;;  %1326 = vmatprep.mubr.bf16.mxu1 %v7140_v17  ;;  %v7167_v47 = vld [vmem:[#allocation60_spill] sm:$0xff] }
 0x264   :  { %4048 = vmatprep.mubr.bf16.mxu0 %v7141_v30 }
 0x26a   :  { %1327 = vmatmul.mubr.bf16.gmra.mrb[108].mxu1 %v7142_v49 }
 0x26b   :  { %4049 = vmatmul.mubr.bf16.gmra.mrb[124].mxu0 %v7143_v15  ;;  %1334 = vmatprep.mubr.bf16.mxu1 %v7144_v50 }
 0x26c   :  { %4052 = vmatprep.mubr.bf16.mxu0 %v7145_v22 }
 0x272   :  { %1335 = vmatmul.mubr.bf16.gmra.mrb[112].mxu1 %v7146_v52 }
 0x273   :  { %4053 = vmatmul.mubr.bf16.gmra.mrb[128].mxu0 %v7147_v51  ;;  %1342 = vmatprep.mubr.bf16.mxu1 %v7148_v33 }
 0x274   :  { %4056 = vmatprep.mubr.bf16.mxu0 %v7149_v26 }
 0x27a   :  { %1343 = vmatmul.mubr.bf16.gmra.mrb[116].mxu1 %v7150_v9 }
 0x27b   :  { %1350 = vmatprep.mubr.bf16.mxu1 %v7151_v18  ;;  %4057 = vmatmul.mubr.bf16.gmra.mrb[132].mxu0 %v7152_v53 }
 0x27c   :  { %4060 = vmatprep.mubr.bf16.mxu0 %v7153_v54 }
 0x282   :  { %1351 = vmatmul.mubr.bf16.gmra.mrb[120].mxu1 %v7154_v61 }
 0x283   :  { %1358 = vmatprep.mubr.bf16.mxu1 %v7155_v38  ;;  %4061 = vmatmul.mubr.bf16.gmra.mrb[136].mxu0 %v7156_v8 }
 0x284   :  { %4064 = vmatprep.mubr.bf16.mxu0 %v7157_v63 }
 0x28a   :  { %1359 = vmatmul.mubr.bf16.gmra.mrb[124].mxu1 %v7158_v48 }
 0x28b   :  { %1366 = vmatprep.mubr.bf16.mxu1 %v7159_v42  ;;  %4065 = vmatmul.mubr.bf16.gmra.mrb[140].mxu0 %v7160_v57 }
 0x292   :  { %1367 = vmatmul.mubr.bf16.gmra.mrb[128].mxu1 %v7161_v23 }
 0x293   :  { %1374 = vmatprep.mubr.bf16.mxu1 %v7162_v27 }
 0x29a   :  { %1375 = vmatmul.mubr.bf16.gmra.mrb[132].mxu1 %v7163_v60 }
 0x29b   :  { %1382 = vmatprep.mubr.bf16.mxu1 %v7164_v62 }
 0x2a2   :  { %1383 = vmatmul.mubr.bf16.gmra.mrb[136].mxu1 %v7165_v46 }
 0x2a3   :  { %1390 = vmatprep.mubr.bf16.mxu1 %v7166_v28 }
 0x2aa   :  { %1391 = vmatmul.mubr.bf16.gmra.mrb[140].mxu1 %v7167_v47 }
 0x2ab   :  { %1836 = vmatprep.mubr.bf16.mxu1 %v7101_v36 }
 0x2c5   :  { %v1208_v17 = vpop.f32.mrb[48].mxu1 }
 0x2c6   :  { %v1210_v30 = vpop.f32.mrb[49].mxu1 }
 0x2c7   :  { %v1211_v49 = vpop.f32.mrb[50].mxu1 }
 0x2c8   :  { %v1213_v15 = vpop.f32.mrb[51].mxu1 }
 0x2cd   :  { %v1216_v50 = vpop.f32.mrb[52].mxu1 }
 0x2ce   :  { %v1218_v22 = vpop.f32.mrb[53].mxu1 }
 0x2cf   :  { %v1219_v52 = vpop.f32.mrb[54].mxu1 }
 0x2d0   :  { %v1221_v51 = vpop.f32.mrb[55].mxu1 }
 0x2d1   :  { %v4481_v51 = vld [vmem:[#allocation5 + $0x10] sm:$0xff] }
 0x2d5   :  { %v1224_v33 = vpop.f32.mrb[56].mxu1 }
 0x2d6   :  { %v1226_v26 = vpop.f32.mrb[57].mxu1 }
 0x2d7   :  { %v5397_v9 = vpop.f32.mrb[58].mxu1  ;;  %v7168_v26 = vld [vmem:[#allocation63_spill] sm:$0xff] }
 0x2d8   :  { %v1229_v18 = vpop.f32.mrb[59].mxu1 }
 0x2d9   :  { %v1104_v18 = vadd.f32 %v4481_v51, %v7168_v26 }
 0x2dd   :  { %v1232_v53 = vpop.f32.mrb[60].mxu1 }
 0x2de   :  { %v1234_v54 = vpop.f32.mrb[61].mxu1 }
 0x2df   :  { %v1235_v61 = vpop.f32.mrb[62].mxu1 }
 0x2e0   :  { %v1237_v38 = vpop.f32.mrb[63].mxu1 }
 0x2e5   :  { %v5399_v8 = vpop.f32.mrb[64].mxu1 }
 0x2e6   :  { %v1242_v63 = vpop.f32.mrb[65].mxu1 }
 0x2e7   :  { %v5401_v55 = vpop.f32.mrb[66].mxu1 }
 0x2e8   :  { %v1245_v7 = vpop.f32.mrb[67].mxu1 }
 0x2e9   :  { %v4482_v7 = vld [vmem:[#allocation5] sm:$0xff] }
 0x2ed   :  { %v5403_v48 = vpop.f32.mrb[68].mxu1 }
 0x2ee   :  { %v1250_v56 = vpop.f32.mrb[69].mxu1 }
 0x2ef   :  { %v5405_v42 = vpop.f32.mrb[70].mxu1  ;;  %v7169_v56 = vld [vmem:[#allocation61_spill] sm:$0xff] }
 0x2f0   :  { %v1253_v57 = vpop.f32.mrb[71].mxu1 }
 0x2f1   :  { %v1102_v57 = vadd.f32 %v4482_v7, %v7169_v56  ;;  %v4485_v56 = vld [vmem:[#allocation5 + $0x30] sm:$0xff] }
 0x2f5   :  { %v5407_v43 = vpop.f32.mrb[72].mxu1 }
 0x2f6   :  { %v1258_v23 = vpop.f32.mrb[73].mxu1 }
 0x2f7   :  { %v5409_v27 = vpop.f32.mrb[74].mxu1 }
 0x2f8   :  { %v1261_v60 = vpop.f32.mrb[75].mxu1 }
 0x2fd   :  { %v5411_v62 = vpop.f32.mrb[76].mxu1 }
 0x2fe   :  { %v1266_v46 = vpop.f32.mrb[77].mxu1 }
 0x2ff   :  { %v5413_v28 = vpop.f32.mrb[78].mxu1 }
 0x300   :  { %v1269_v47 = vpop.f32.mrb[79].mxu1 }
 0x301   :  { %v1105_v47 = vadd.f32 %v4483_v45, %v7170_v31 }
 0x305   :  { %v5415_v30 = vpop.f32.mrb[80].mxu1 }
 0x306   :  { %v4022_v15 = vpop.f32.mrb[96].mxu0  ;;  %v1274_v22 = vpop.f32.mrb[81].mxu1 }
 0x307   :  { %v1442_v54 = vadd.f32 %v4022_v15, %v1216_v50  ;;  %v1433_v38 = vpop.f32.mrb[97].mxu0  ;;  %v5418_v63 = vpop.f32.mrb[82].mxu1  ;;  %v4484_v22 = vld [vmem:[#allocation5 + $0x8] sm:$0xff] }
 0x308   :  { %v1434_v23 = vadd.f32 %v1433_v38, %v1208_v17  ;;  %v4023_v60 = vpop.f32.mrb[98].mxu0  ;;  %v1277_v46 = vpop.f32.mrb[83].mxu1  ;;  %v1103_v34 = vadd.f32 %v4484_v22, %v7171_v21  ;;  %v7175_v22 = vld [vmem:[#allocation66_spill] sm:$0xff] }
 0x309   :  { %v1626_v25 = vadd.f32 %v1442_v54, %v1104_v18  ;;  %v1445_v59 = vadd.f32 %v4023_v60, %v1219_v52  ;;  %v1436_v39 = vpop.f32.mrb[99].mxu0  ;;  %v7172_v46 = vld [vmem:[#allocation67_spill] sm:$0xff]  ;;  %v4486_v18 = vld [vmem:[#allocation5 + $0x20] sm:$0xff]  ;;  %v7173_v54 = vld [vmem:[#allocation65_spill] sm:$0xff] }
 0x30a   :  { %v1624_v51 = vadd.f32 %v1434_v23, %v1102_v57  ;;  %v1437_v50 = vadd.f32 %v1436_v39, %v1211_v49  ;;  %v1108_v11 = vadd.f32 %v4485_v56, %v7172_v46  ;;  %v1106_v21 = vadd.f32 %v4486_v18, %v7173_v54  ;;  %v4489_v56 = vld [vmem:[#allocation5 + $0x50] sm:$0xff]  ;;  %v7176_v46 = vld [vmem:[#allocation71_spill] sm:$0xff] }
 0x30b   :  { %v1627_v15 = vadd.f32 %v1445_v59, %v1105_v47  ;;  %v4487_v59 = vld [vmem:[#allocation5 + $0x38] sm:$0xff] }
 0x30c   :  { %v1625_v26 = vadd.f32 %v1437_v50, %v1103_v34 }
 0x30d   :  { %v1673_v16 = vpack.c.bf16 %v1627_v15, %v1626_v25  ;;  %v5423_v29 = vpop.f32.mrb[84].mxu1  ;;  %v7174_v25 = vld [vmem:[#allocation68_spill] sm:$0xff] }
 0x30e   :  { %v1672_v7 = vpack.c.bf16 %v1625_v26, %v1624_v51  ;;  %v4026_v17 = vpop.f32.mrb[100].mxu0  ;;  %v1282_v38 = vpop.f32.mrb[85].mxu1  ;;  %v1109_v49 = vadd.f32 %v4487_v59, %v7174_v25  ;;  %v4491_v25 = vld [vmem:[#allocation5 + $0x58] sm:$0xff] }
 0x30f   :  { %v1458_v31 = vadd.f32 %v4026_v17, %v1232_v53  ;;  %v1449_v45 = vpop.f32.mrb[101].mxu0  ;;  %v5426_v52 = vpop.f32.mrb[86].mxu1  ;;  %v4488_v53 = vld [vmem:[#allocation5 + $0x28] sm:$0xff] }
 0x310   :  { %v1450_v57 = vadd.f32 %v1449_v45, %v1224_v33  ;;  %v4027_v39 = vpop.f32.mrb[102].mxu0  ;;  %1837 = vmatmul.mubr.bf16.vlgmr.msra.gmra.mrb[144].mxu1 %v1672_v7  ;;  %v1285_v34 = vpop.f32.mrb[87].mxu1  ;;  %v1107_v51 = vadd.f32 %v4488_v53, %v7175_v22 }
 0x311   :  { %v5430_v23 = vadd.f32 %v1458_v31, %v1108_v11  ;;  %v1461_v60 = vadd.f32 %v4027_v39, %v1235_v61  ;;  %v1452_v47 = vpop.f32.mrb[103].mxu0  ;;  %1846 = vmatprep.mubr.bf16.mxu1 %v7101_v36  ;;  %v1112_v31 = vadd.f32 %v4489_v56, %v7176_v46 }
 0x312   :  { %v1628_v50 = vadd.f32 %v1450_v57, %v1106_v21  ;;  %v1453_v15 = vadd.f32 %v1452_v47, %v5397_v9  ;;  %v4490_v9 = vld [vmem:[#allocation5 + $0x40] sm:$0xff]  ;;  %v7177_v21 = vld [vmem:[#allocation69_spill] sm:$0xff] }
 0x313   :  { %v5435_v26 = vadd.f32 %v1461_v60, %v1109_v49  ;;  %v1110_v57 = vadd.f32 %v4490_v9, %v7177_v21  ;;  %v7178_v49 = vld [vmem:[#allocation72_spill] sm:$0xff] }
 0x314   :  { %v1629_v33 = vadd.f32 %v1453_v15, %v1107_v51  ;;  %v1113_v60 = vadd.f32 %v4491_v25, %v7178_v49  ;;  %v7179_v51 = vld [vmem:[#allocation70_spill] sm:$0xff] }
 0x315   :  { %v1675_v7 = vpack.c.bf16 %v5435_v26, %v5430_v23  ;;  %v5439_v17 = vpop.f32.mrb[88].mxu1 }
 0x316   :  { %v4030_v11 = vpop.f32.mrb[104].mxu0  ;;  %v1674_v38 = vpack.c.bf16 %v1629_v33, %v1628_v50  ;;  %v1290_v61 = vpop.f32.mrb[89].mxu1 }
 0x317   :  { %v1474_v45 = vadd.f32 %v4030_v11, %v5403_v48  ;;  %v1465_v18 = vpop.f32.mrb[105].mxu0  ;;  %v5443_v54 = vpop.f32.mrb[90].mxu1  ;;  %v4492_v48 = vld [vmem:[#allocation5 + $0x48] sm:$0xff] }
 0x318   :  { %v1466_v39 = vadd.f32 %v1465_v18, %v5399_v8  ;;  %v4031_v34 = vpop.f32.mrb[106].mxu0  ;;  %1847 = vmatmul.mubr.bf16.gmra.mrb[148].mxu1 %v1673_v16  ;;  %v1293_v59 = vpop.f32.mrb[91].mxu1  ;;  %v1111_v50 = vadd.f32 %v4492_v48, %v7179_v51 }
 0x319   :  { %v5448_v47 = vadd.f32 %v1474_v45, %v1112_v31  ;;  %v1477_v53 = vadd.f32 %v4031_v34, %v5405_v42  ;;  %v1468_v22 = vpop.f32.mrb[107].mxu0  ;;  %1856 = vmatprep.mubr.bf16.mxu1 %v7101_v36  ;;  %v4493_v31 = vld [vmem:[#allocation5 + $0x70] sm:$0xff]  ;;  %v7180_v45 = vld [vmem:[#allocation75_spill] sm:$0xff] }
 0x31a   :  { %v5453_v15 = vadd.f32 %v1466_v39, %v1110_v57  ;;  %v1469_v8 = vadd.f32 %v1468_v22, %v5401_v55  ;;  %v1116_v18 = vadd.f32 %v4493_v31, %v7180_v45  ;;  %v4494_v57 = vld [vmem:[#allocation5 + $0x60] sm:$0xff]  ;;  %v7181_v39 = vld [vmem:[#allocation73_spill] sm:$0xff] }
 0x31b   :  { %v5456_v33 = vadd.f32 %v1477_v53, %v1113_v60  ;;  %v1114_v34 = vadd.f32 %v4494_v57, %v7181_v39  ;;  %v4495_v60 = vld [vmem:[#allocation5 + $0x78] sm:$0xff]  ;;  %v7182_v53 = vld [vmem:[#allocation76_spill] sm:$0xff]  ;;  %v4497_v57 = vld [vmem:[#allocation5 + $0x90] sm:$0xff] }
 0x31c   :  { %v5458_v16 = vadd.f32 %v1469_v8, %v1111_v50  ;;  %v1117_v22 = vadd.f32 %v4495_v60, %v7182_v53  ;;  %v7183_v8 = vld [vmem:[#allocation74_spill] sm:$0xff]  ;;  %v1120_v39 = vadd.f32 %v4497_v57, %v5209_v35 }
 0x31d   :  { %v5460_v11 = vpop.f32.mrb[92].mxu1  ;;  %v1677_v61 = vpack.c.bf16 %v5456_v33, %v5448_v47 }
 0x31e   :  { %v4034_v42 = vpop.f32.mrb[108].mxu0  ;;  %v1298_v56 = vpop.f32.mrb[93].mxu1  ;;  %v1676_v46 = vpack.c.bf16 %v5458_v16, %v5453_v15 }
 0x31f   :  { %v1490_v9 = vadd.f32 %v4034_v42, %v5411_v62  ;;  %v1481_v55 = vpop.f32.mrb[109].mxu0  ;;  %v5468_v21 = vpop.f32.mrb[94].mxu1  ;;  %v4496_v62 = vld [vmem:[#allocation5 + $0x68] sm:$0xff] }
 0x320   :  { %v1482_v59 = vadd.f32 %v1481_v55, %v5407_v43  ;;  %v4035_v25 = vpop.f32.mrb[110].mxu0  ;;  %1857 = vmatmul.mubr.bf16.gmra.mrb[152].mxu1 %v1674_v38  ;;  %v1301_v49 = vpop.f32.mrb[95].mxu1  ;;  %v1115_v42 = vadd.f32 %v4496_v62, %v7183_v8  ;;  %v4499_v62 = vld [vmem:[#allocation5 + $0x98] sm:$0xff] }
 0x321   :  { %v5473_v48 = vadd.f32 %v1490_v9, %v1116_v18  ;;  %v1493_v51 = vadd.f32 %v4035_v25, %v5413_v28  ;;  %v1484_v50 = vpop.f32.mrb[111].mxu0  ;;  %1866 = vmatprep.mubr.bf16.mxu1 %v7101_v36  ;;  %v4498_v25 = vld [vmem:[#allocation5 + $0x80] sm:$0xff]  ;;  %v1121_v35 = vadd.f32 %v4499_v62, %v5212_v19  ;;  %v4236_v62 = vld [vmem:[#allocation10 + $0x10] ss:$8 sps:$4 sm:$0xff]  }
 0x322   :  { %v5478_v56 = vadd.f32 %v1482_v59, %v1114_v34  ;;  %v1485_v43 = vadd.f32 %v1484_v50, %v5409_v27  ;;  %v1118_v49 = vadd.f32 %v4498_v25, %v5198_v10  ;;  %v4235_v50 = vld [vmem:[#allocation10 + $0x4] ss:$8 sps:$4 sm:$0xff]  }
 0x323   :  { %v5481_v31 = vadd.f32 %v1493_v51, %v1117_v22  ;;  %v4233_v51 = vld [vmem:[#allocation10] ss:$8 sps:$4 sm:$0xff]   ;;  %2425 = vmatprep.subr.bf16.mxu0 %v4235_v50  ;;  %4068 = vmatprep.subr.bf16.mxu1 %v4235_v50 }
 0x324   :  { %v5483_v38 = vadd.f32 %v1485_v43, %v1115_v42  ;;  %v4500_v10 = vld [vmem:[#allocation5 + $0x88] sm:$0xff]  ;;  %2426 = vmatpush1.bf16.msra.mxu0 %v4233_v51  ;;  %4084 = vmatpush1.bf16.msra.mxu1 %v4233_v51 }
 0x325   :  { %v5485_v45 = vpop.f32.mrb[96].mxu1  ;;  %v1679_v18 = vpack.c.bf16 %v5481_v31, %v5473_v48  ;;  %v4262_v31 = vld [vmem:[#allocation10 + $0x94] ss:$8 sps:$4 sm:$0xff]  }
 0x326   :  { %v4038_v28 = vpop.f32.mrb[112].mxu0  ;;  %v1306_v9 = vpop.f32.mrb[97].mxu1  ;;  %v1678_v55 = vpack.c.bf16 %v5483_v38, %v5478_v56 }
 0x327   :  { %v1506_v34 = vadd.f32 %v4038_v28, %v5423_v29  ;;  %v1497_v27 = vpop.f32.mrb[113].mxu0  ;;  %v5493_v59 = vpop.f32.mrb[98].mxu1 }
 0x328   :  { %v1498_v60 = vadd.f32 %v1497_v27, %v5415_v30  ;;  %v4039_v53 = vpop.f32.mrb[114].mxu0  ;;  %1867 = vmatmul.mubr.bf16.gmra.mrb[156].mxu1 %v1675_v7  ;;  %v1309_v22 = vpop.f32.mrb[99].mxu1  ;;  %v7184_v30 = vld [vmem:[#allocation77_spill] sm:$0xff] }
 0x329   :  { %v5501_v29 = vadd.f32 %v1506_v34, %v1120_v39  ;;  %v1509_v8 = vadd.f32 %v4039_v53, %v5426_v52  ;;  %v1500_v42 = vpop.f32.mrb[115].mxu0  ;;  %1876 = vmatprep.mubr.bf16.mxu1 %v7101_v36  ;;  %v1119_v43 = vadd.f32 %v4500_v10, %v7184_v30  ;;  %v4501_v34 = vld [vmem:[#allocation5 + $0xb0] sm:$0xff] }
 0x32a   :  { %v5506_v28 = vadd.f32 %v1498_v60, %v1118_v49  ;;  %v1501_v23 = vadd.f32 %v1500_v42, %v5418_v63  ;;  %v1124_v63 = vadd.f32 %v4501_v34, %v5227_v37  ;;  %v4502_v60 = vld [vmem:[#allocation5 + $0xa0] sm:$0xff] }
 0x32b   :  { %v5509_v26 = vadd.f32 %v1509_v8, %v1121_v35  ;;  %v1122_v53 = vadd.f32 %v4502_v60, %v5218_v12  ;;  %v4238_v35 = vld [vmem:[#allocation10 + $0x14] ss:$8 sps:$4 sm:$0xff]   ;;  %v4241_v12 = vld [vmem:[#allocation10 + $0x24] ss:$8 sps:$4 sm:$0xff]  }
 0x32c   :  { %v5511_v19 = vadd.f32 %v1501_v23, %v1119_v43  ;;  %v4503_v8 = vld [vmem:[#allocation5 + $0xb8] sm:$0xff]  ;;  %2427 = vmatprep.subr.bf16.mxu0 %v4238_v35  ;;  %4069 = vmatprep.subr.bf16.mxu1 %v4238_v35  ;;  %v4506_v60 = vld [vmem:[#allocation5 + $0xc0] sm:$0xff] }
 0x32d   :  { %v1312_v7 = vpop.f32.mrb[100].mxu1  ;;  %v1681_v52 = vpack.c.bf16 %v5509_v26, %v5501_v29  ;;  %v1125_v37 = vadd.f32 %v4503_v8, %v5230_v32  ;;  %2428 = vmatpush1.bf16.msra.mxu0 %v4236_v62  ;;  %v4239_v32 = vld [vmem:[#allocation10 + $0x20] ss:$8 sps:$4 sm:$0xff]   ;;  %4085 = vmatpush1.bf16.msra.mxu1 %v4236_v62  ;;  %v4242_v62 = vld [vmem:[#allocation10 + $0x30] ss:$8 sps:$4 sm:$0xff]  }
 0x32e   :  { %v4042_v9 = vpop.f32.mrb[116].mxu0  ;;  %v1314_v57 = vpop.f32.mrb[101].mxu1  ;;  %v1680_v39 = vpack.c.bf16 %v5511_v19, %v5506_v28  ;;  %2429 = vmatprep.subr.bf16.mxu0 %v4241_v12  ;;  %4070 = vmatprep.subr.bf16.mxu1 %v4241_v12  ;;  %v4244_v35 = vld [vmem:[#allocation10 + $0x34] ss:$8 sps:$4 sm:$0xff]   ;;  %v4517_v19 = vld [vmem:[#allocation5 + $0x120] sm:$0xff] }
 0x32f   :  { %v1522_v27 = vadd.f32 %v4042_v9, %v5460_v11  ;;  %v1513_v25 = vpop.f32.mrb[117].mxu0  ;;  %v1315_v49 = vpop.f32.mrb[102].mxu1  ;;  %v4505_v57 = vld [vmem:[#allocation5 + $0xd0] sm:$0xff]  ;;  %v4507_v8 = vld [vmem:[#allocation5 + $0xd8] sm:$0xff] }
 0x330   :  { %v1514_v22 = vadd.f32 %v1513_v25, %v5439_v17  ;;  %v4043_v51 = vpop.f32.mrb[118].mxu0  ;;  %1877 = vmatmul.mubr.bf16.gmra.mrb[160].mxu1 %v1676_v46  ;;  %v1317_v50 = vpop.f32.mrb[103].mxu1  ;;  %v4504_v17 = vld [vmem:[#allocation5 + $0xa8] sm:$0xff]  ;;  %v1128_v34 = vadd.f32 %v4505_v57, %v5245_v3  ;;  %v1129_v3 = vadd.f32 %v4507_v8, %v5248_v44  ;;  %v4274_v29 = vld [vmem:[#allocation10 + $0xd4] ss:$8 sps:$4 sm:$0xff]  }
 0x331   :  { %v5525_v42 = vadd.f32 %v1522_v27, %v1124_v63  ;;  %v1525_v11 = vadd.f32 %v4043_v51, %v5468_v21  ;;  %v1516_v10 = vpop.f32.mrb[119].mxu0  ;;  %1886 = vmatprep.mubr.bf16.mxu1 %v7101_v36  ;;  %v1123_v30 = vadd.f32 %v4504_v17, %v5221_v5  ;;  %2430 = vmatpush1.bf16.msra.mxu0 %v4239_v32  ;;  %v4245_v44 = vld [vmem:[#allocation10 + $0x40] ss:$8 sps:$4 sm:$0xff]  }
 0x332   :  { %v5530_v43 = vadd.f32 %v1514_v22, %v1122_v53  ;;  %v1517_v15 = vadd.f32 %v1516_v10, %v5443_v54  ;;  %4086 = vmatpush1.bf16.msra.mxu1 %v4239_v32  ;;  %v1126_v53 = vadd.f32 %v4506_v60, %v5236_v13  ;;  %v4247_v13 = vld [vmem:[#allocation10 + $0x44] ss:$8 sps:$4 sm:$0xff]   ;;  %2431 = vmatprep.subr.bf16.mxu0 %v4244_v35 }
 0x333   :  { %v5533_v16 = vadd.f32 %v1525_v11, %v1125_v37  ;;  %v4508_v10 = vld [vmem:[#allocation5 + $0xc8] sm:$0xff]  ;;  %4071 = vmatprep.subr.bf16.mxu1 %v4244_v35 }
 0x334   :  { %v5535_v46 = vadd.f32 %v1517_v15, %v1123_v30  ;;  %v4509_v15 = vld [vmem:[#allocation5 + $0xf0] sm:$0xff] }
 0x335   :  { %v1320_v21 = vpop.f32.mrb[104].mxu1  ;;  %v1683_v23 = vpack.c.bf16 %v5533_v16, %v5525_v42  ;;  %2432 = vmatpush1.bf16.msra.mxu0 %v4242_v62  ;;  %v1132_v32 = vadd.f32 %v4509_v15, %v5263_v2 }
 0x336   :  { %v4046_v5 = vpop.f32.mrb[120].mxu0  ;;  %v1322_v9 = vpop.f32.mrb[105].mxu1  ;;  %v1682_v54 = vpack.c.bf16 %v5535_v46, %v5530_v43  ;;  %4087 = vmatpush1.bf16.msra.mxu1 %v4242_v62  ;;  %2433 = vmatprep.subr.bf16.mxu0 %v4247_v13  ;;  %v4521_v43 = vld [vmem:[#allocation5 + $0x140] sm:$0xff] }
 0x337   :  { %v1538_v63 = vadd.f32 %v4046_v5, %v1312_v7  ;;  %v1529_v27 = vpop.f32.mrb[121].mxu0  ;;  %v1323_v25 = vpop.f32.mrb[106].mxu1  ;;  %4072 = vmatprep.subr.bf16.mxu1 %v4247_v13  ;;  %v7187_v46 = vld [vmem:[#allocation80_spill] sm:$0xff] }
 0x338   :  { %v1530_v22 = vadd.f32 %v1529_v27, %v5485_v45  ;;  %v4047_v51 = vpop.f32.mrb[122].mxu0  ;;  %1887 = vmatmul.mubr.bf16.gmra.mrb[164].mxu1 %v1677_v61  ;;  %v1325_v50 = vpop.f32.mrb[107].mxu1  ;;  %v1127_v45 = vadd.f32 %v4508_v10, %v5239_v40 }
 0x339   :  { %v5548_v7 = vadd.f32 %v1538_v63, %v1128_v34  ;;  %v1541_v37 = vadd.f32 %v4047_v51, %v1315_v49  ;;  %v1532_v11 = vpop.f32.mrb[123].mxu0  ;;  %1896 = vmatprep.mubr.bf16.mxu1 %v7101_v36  ;;  %2434 = vmatpush1.bf16.msra.mxu0 %v4245_v44  ;;  %v4510_v34 = vld [vmem:[#allocation5 + $0xe0] sm:$0xff]  ;;  %v4250_v51 = vld [vmem:[#allocation10 + $0x54] ss:$8 sps:$4 sm:$0xff]  }
 0x33a   :  { %v5552_v12 = vadd.f32 %v1530_v22, %v1126_v53  ;;  %v1533_v47 = vadd.f32 %v1532_v11, %v5493_v59  ;;  %4088 = vmatpush1.bf16.msra.mxu1 %v4245_v44  ;;  %v1130_v63 = vadd.f32 %v4510_v34, %v5254_v14  ;;  %v4248_v22 = vld [vmem:[#allocation10 + $0x50] ss:$8 sps:$4 sm:$0xff]   ;;  %v4512_v14 = vld [vmem:[#allocation5 + $0xe8] sm:$0xff]  ;;  %2435 = vmatprep.subr.bf16.mxu0 %v4250_v51  ;;  %v4513_v44 = vld [vmem:[#allocation5 + $0x100] sm:$0xff] }
 0x33b   :  { %v5555_v33 = vadd.f32 %v1541_v37, %v1129_v3  ;;  %v4511_v50 = vld [vmem:[#allocation5 + $0xf8] sm:$0xff]  ;;  %v4253_v3 = vld [vmem:[#allocation10 + $0x64] ss:$8 sps:$4 sm:$0xff]   ;;  %4073 = vmatprep.subr.bf16.mxu1 %v4250_v51 }
 0x33c   :  { %v5557_v61 = vadd.f32 %v1533_v47, %v1127_v45  ;;  %v1133_v2 = vadd.f32 %v4511_v50, %v5266_v4  ;;  %v4514_v34 = vld [vmem:[#allocation5 + $0x108] sm:$0xff] }
 0x33d   :  { %v1328_v49 = vpop.f32.mrb[108].mxu1  ;;  %v1685_v17 = vpack.c.bf16 %v5555_v33, %v5548_v7  ;;  %2436 = vmatpush1.bf16.msra.mxu0 %v4248_v22 }
 0x33e   :  { %v4050_v40 = vpop.f32.mrb[124].mxu0  ;;  %v1330_v30 = vpop.f32.mrb[109].mxu1  ;;  %v1684_v59 = vpack.c.bf16 %v5557_v61, %v5552_v12  ;;  %4089 = vmatpush1.bf16.msra.mxu1 %v4248_v22  ;;  %2437 = vmatprep.subr.bf16.mxu0 %v4253_v3 }
 0x33f   :  { %v1554_v5 = vadd.f32 %v4050_v40, %v1328_v49  ;;  %v1545_v9 = vpop.f32.mrb[125].mxu0  ;;  %v1331_v57 = vpop.f32.mrb[110].mxu1  ;;  %4074 = vmatprep.subr.bf16.mxu1 %v4253_v3  ;;  %v1134_v49 = vadd.f32 %v4513_v44, %v5271_v0  ;;  %v4257_v0 = vld [vmem:[#allocation10 + $0x80] ss:$8 sps:$4 sm:$0xff]   ;;  %v4260_v3 = vld [vmem:[#allocation10 + $0x90] ss:$8 sps:$4 sm:$0xff]  }
 0x340   :  { %v1546_v27 = vadd.f32 %v1545_v9, %v1320_v21  ;;  %v4051_v60 = vpop.f32.mrb[126].mxu0  ;;  %1897 = vmatmul.mubr.bf16.gmra.mrb[168].mxu1 %v1678_v55  ;;  %v1333_v53 = vpop.f32.mrb[111].mxu1  ;;  %v1131_v21 = vadd.f32 %v4512_v14, %v5257_v41  ;;  %v4251_v55 = vld [vmem:[#allocation10 + $0x60] ss:$8 sps:$4 sm:$0xff]   ;;  %v4516_v14 = vld [vmem:[#allocation5 + $0x118] sm:$0xff] }
 0x341   :  { %v5569_v62 = vadd.f32 %v1554_v5, %v1132_v32  ;;  %v1557_v35 = vadd.f32 %v4051_v60, %v1331_v57  ;;  %v1548_v8 = vpop.f32.mrb[127].mxu0  ;;  %1906 = vmatprep.mubr.bf16.mxu1 %v7101_v36  ;;  %2438 = vmatpush1.bf16.msra.mxu0 %v4251_v55  ;;  %v4254_v32 = vld [vmem:[#allocation10 + $0x70] ss:$8 sps:$4 sm:$0xff]   ;;  %v4256_v5 = vld [vmem:[#allocation10 + $0x74] ss:$8 sps:$4 sm:$0xff]  }
 0x342   :  { %v5573_v37 = vadd.f32 %v1546_v27, %v1130_v63  ;;  %v1549_v56 = vadd.f32 %v1548_v8, %v1323_v25  ;;  %4090 = vmatpush1.bf16.msra.mxu1 %v4251_v55  ;;  %v4259_v57 = vld [vmem:[#allocation10 + $0x84] ss:$8 sps:$4 sm:$0xff]   ;;  %v1135_v63 = vadd.f32 %v4514_v34, %v5275_v6  ;;  %2439 = vmatprep.subr.bf16.mxu0 %v4256_v5  ;;  %v4515_v53 = vld [vmem:[#allocation5 + $0x110] sm:$0xff] }
 0x343   :  { %v5575_v38 = vadd.f32 %v1557_v35, %v1133_v2  ;;  %4075 = vmatprep.subr.bf16.mxu1 %v4256_v5  ;;  %v1136_v22 = vadd.f32 %v4515_v53, %v5281_v1  ;;  %v4268_v44 = vld [vmem:[#allocation10 + $0xb4] ss:$8 sps:$4 sm:$0xff]   ;;  %v4266_v5 = vld [vmem:[#allocation10 + $0xb0] ss:$8 sps:$4 sm:$0xff]  }
 0x344   :  { %v5577_v4 = vadd.f32 %v1549_v56, %v1131_v21  ;;  %v1137_v21 = vadd.f32 %v4516_v14, %v5285_v20 }
 0x345   :  { %v1336_v11 = vpop.f32.mrb[112].mxu1  ;;  %v1687_v13 = vpack.c.bf16 %v5575_v38, %v5569_v62  ;;  %2440 = vmatpush1.bf16.msra.mxu0 %v4254_v32  ;;  %v1714_v62 = vlaneseq }
 0x346   :  { %v4054_v10 = vpop.f32.mrb[128].mxu0  ;;  %v1338_v41 = vpop.f32.mrb[113].mxu1  ;;  %v1686_v25 = vpack.c.bf16 %v5577_v4, %v5573_v37  ;;  %4091 = vmatpush1.bf16.msra.mxu1 %v4254_v32  ;;  %2441 = vmatprep.subr.bf16.mxu0 %v4259_v57  ;;  %v1712_v4 = vld [vmem:[%s6982_s4] sm:$0x3] }
 0x347   :  { %v1561_v45 = vpop.f32.mrb[129].mxu0  ;;  %v1339_v47 = vpop.f32.mrb[114].mxu1  ;;  %4076 = vmatprep.subr.bf16.mxu1 %v4259_v57  ;;  %v5696_v37 = vshrl.u32 %v1714_v62, 7 }
 0x348   :  { %v1562_v40 = vadd.f32 %v1561_v45, %v1336_v11  ;;  %v4055_v30 = vpop.f32.mrb[130].mxu0  ;;  %1907 = vmatmul.mubr.bf16.gmra.mrb[172].mxu1 %v1679_v18  ;;  %v1341_v15 = vpop.f32.mrb[115].mxu1 }
 0x349   :  { %v1564_v9 = vpop.f32.mrb[131].mxu0  ;;  %1916 = vmatprep.mubr.bf16.mxu1 %v7101_v36  ;;  %2442 = vmatpush1.bf16.msra.mxu0 %v4257_v0  ;;  %v1716_v38 = vsub.s32 0, %v5696_v37 }
 0x34a   :  { %v5589_v27 = vadd.f32 %v1562_v40, %v1134_v49  ;;  %v1565_v60 = vadd.f32 %v1564_v9, %v1339_v47  ;;  %4092 = vmatpush1.bf16.msra.mxu1 %v4257_v0  ;;  %2443 = vmatprep.subr.bf16.mxu0 %v4262_v31  ;;  %v4263_v47 = vld [vmem:[#allocation10 + $0xa0] ss:$8 sps:$4 sm:$0xff]   ;;  %v4271_v0 = vld [vmem:[#allocation10 + $0xc4] ss:$8 sps:$4 sm:$0xff]  }
 0x34b   :  { %4077 = vmatprep.subr.bf16.mxu1 %v4262_v31  ;;  %v4518_v9 = vld [vmem:[#allocation5 + $0x128] sm:$0xff] }
 0x34c   :  { %v5591_v48 = vadd.f32 %v1565_v60, %v1135_v63  ;;  %v1139_v57 = vadd.f32 %v4518_v9, %v5296_v24  ;;  %v4269_v24 = vld [vmem:[#allocation10 + $0xc0] ss:$8 sps:$4 sm:$0xff]  }
 0x34d   :  { %v1344_v18 = vpop.f32.mrb[116].mxu1  ;;  %2444 = vmatpush1.bf16.msra.mxu0 %v4260_v3 }
 0x34e   :  { %v1570_v51 = vadd.f32 %v4054_v10, %v1344_v18  ;;  %v1346_v50 = vpop.f32.mrb[117].mxu1  ;;  %v4058_v6 = vpop.f32.mrb[132].mxu0  ;;  %v1688_v2 = vpack.c.bf16 %v5591_v48, %v5589_v27  ;;  %v4265_v10 = vld [vmem:[#allocation10 + $0xa4] ss:$8 sps:$4 sm:$0xff]   ;;  %4093 = vmatpush1.bf16.msra.mxu1 %v4260_v3 }
 0x34f   :  { %v1347_v35 = vpop.f32.mrb[118].mxu1  ;;  %v1577_v8 = vpop.f32.mrb[133].mxu0  ;;  %2445 = vmatprep.subr.bf16.mxu0 %v4265_v10  ;;  %4078 = vmatprep.subr.bf16.mxu1 %v4265_v10 }
 0x350   :  { %v5597_v56 = vadd.f32 %v1570_v51, %v1136_v22  ;;  %v1573_v55 = vadd.f32 %v4055_v30, %v1347_v35  ;;  %1917 = vmatmul.mubr.bf16.gmra.mrb[176].mxu1 %v1680_v39  ;;  %v1349_v1 = vpop.f32.mrb[119].mxu1  ;;  %v4059_v11 = vpop.f32.mrb[134].mxu0  ;;  %v1138_v39 = vadd.f32 %v4517_v19, %v5291_v58  ;;  %v7185_v22 = vld [vmem:[#allocation78_spill] sm:$0xff] }
 0x351   :  { %v1580_v41 = vpop.f32.mrb[135].mxu0  ;;  %1926 = vmatprep.mubr.bf16.mxu1 %v7101_v36  ;;  %2446 = vmatpush1.bf16.msra.mxu0 %v4263_v47  ;;  %v7186_v1 = vld [vmem:[#allocation79_spill] sm:$0xff] }
 0x352   :  { %v5603_v45 = vadd.f32 %v1573_v55, %v1137_v21  ;;  %4094 = vmatpush1.bf16.msra.mxu1 %v4263_v47  ;;  %2447 = vmatprep.subr.bf16.mxu0 %v4268_v44  ;;  %v4272_v21 = vld [vmem:[#allocation10 + $0xd0] ss:$8 sps:$4 sm:$0xff]  }
 0x353   :  { %4079 = vmatprep.subr.bf16.mxu1 %v4268_v44  ;;  %v4520_v55 = vld [vmem:[#allocation5 + $0x138] sm:$0xff] }
 0x354   :  { %v1689_v20 = vpack.c.bf16 %v5603_v45, %v5597_v56  ;;  %v1141_v10 = vadd.f32 %v4520_v55, %v7186_v1 }
 0x355   :  { %v1352_v28 = vpop.f32.mrb[120].mxu1  ;;  %2448 = vmatpush1.bf16.msra.mxu0 %v4266_v5 }
 0x356   :  { %v1578_v49 = vadd.f32 %v1577_v8, %v1352_v28  ;;  %v1354_v40 = vpop.f32.mrb[121].mxu1  ;;  %v5608_v30 = vpop.f32.mrb[136].mxu0  ;;  %4095 = vmatpush1.bf16.msra.mxu1 %v4266_v5  ;;  %2449 = vmatprep.subr.bf16.mxu0 %v4271_v0 }
 0x357   :  { %v1355_v15 = vpop.f32.mrb[122].mxu1  ;;  %v1593_v32 = vpop.f32.mrb[137].mxu0  ;;  %4080 = vmatprep.subr.bf16.mxu1 %v4271_v0  ;;  %v4275_v40 = vld [vmem:[#allocation10 + $0xe0] ss:$8 sps:$4 sm:$0xff]  }
 0x358   :  { %v5611_v34 = vadd.f32 %v1578_v49, %v1138_v39  ;;  %v1581_v63 = vadd.f32 %v1580_v41, %v1355_v15  ;;  %1927 = vmatmul.mubr.bf16.gmra.mrb[180].mxu1 %v1681_v52  ;;  %v1357_v58 = vpop.f32.mrb[123].mxu1  ;;  %v5616_v60 = vpop.f32.mrb[138].mxu0  ;;  %v4519_v52 = vld [vmem:[#allocation5 + $0x130] sm:$0xff] }
 0x359   :  { %1936 = vmatprep.mubr.bf16.mxu1 %v7101_v36  ;;  %v1596_v31 = vpop.f32.mrb[139].mxu0  ;;  %v1140_v51 = vadd.f32 %v4519_v52, %v7185_v22  ;;  %2450 = vmatpush1.bf16.msra.mxu0 %v4269_v24 }
 0x35a   :  { %v5619_v18 = vadd.f32 %v1581_v63, %v1139_v57  ;;  %4096 = vmatpush1.bf16.msra.mxu1 %v4269_v24  ;;  %2451 = vmatprep.subr.bf16.mxu0 %v4274_v29  ;;  %v4522_v57 = vld [vmem:[#allocation5 + $0x148] sm:$0xff] }
 0x35b   :  { %4081 = vmatprep.subr.bf16.mxu1 %v4274_v29  ;;  %v7188_v63 = vld [vmem:[#allocation81_spill] sm:$0xff] }
 0x35c   :  { %v1690_v53 = vpack.c.bf16 %v5619_v18, %v5611_v34  ;;  %v1143_v58 = vadd.f32 %v4522_v57, %v7188_v63 }
 0x35d   :  { %v1360_v26 = vpop.f32.mrb[124].mxu1  ;;  %2452 = vmatpush1.bf16.msra.mxu0 %v4272_v21 }
 0x35e   :  { %v1586_v50 = vadd.f32 %v4058_v6, %v1360_v26  ;;  %v1362_v35 = vpop.f32.mrb[125].mxu1  ;;  %v5624_v8 = vpop.f32.mrb[140].mxu0  ;;  %4097 = vmatpush1.bf16.msra.mxu1 %v4272_v21  ;;  %v4280_v26 = vld [vmem:[#allocation10 + $0xf4] ss:$8 sps:$4 sm:$0xff]  }
 0x35f   :  { %v1363_v3 = vpop.f32.mrb[126].mxu1  ;;  %v5626_v14 = vpop.f32.mrb[141].mxu0  ;;  %v7189_v35 = vld [vmem:[#allocation82_spill] sm:$0xff]  ;;  %v7190_v21 = vld [vmem:[#allocation83_spill] sm:$0xff] }
 0x360   :  { %v5629_v41 = vadd.f32 %v1586_v50, %v1140_v51  ;;  %v1589_v47 = vadd.f32 %v4059_v11, %v1363_v3  ;;  %1937 = vmatmul.mubr.bf16.gmra.mrb[184].mxu1 %v1682_v54  ;;  %v1365_v6 = vpop.f32.mrb[127].mxu1  ;;  %v5634_v44 = vpop.f32.mrb[142].mxu0  ;;  %v4277_v11 = vld [vmem:[#allocation10 + $0xe4] ss:$8 sps:$4 sm:$0xff]   ;;  %v1142_v54 = vadd.f32 %v4521_v43, %v7187_v46  ;;  %v4523_v50 = vld [vmem:[#allocation5 + $0x150] sm:$0xff] }
 0x361   :  { %1946 = vmatprep.mubr.bf16.mxu1 %v7101_v36  ;;  %v1612_v28 = vpop.f32.mrb[143].mxu0  ;;  %2453 = vmatprep.subr.bf16.mxu0 %v4277_v11 }
 0x362   :  { %v5637_v19 = vadd.f32 %v1589_v47, %v1141_v10  ;;  %4082 = vmatprep.subr.bf16.mxu1 %v4277_v11  ;;  %2454 = vmatpush1.bf16.msra.mxu0 %v4275_v40 }
 0x363   :  { %4098 = vmatpush1.bf16.msra.mxu1 %v4275_v40  ;;  %2455 = vmatprep.subr.bf16.mxu0 %v4280_v26  ;;  %v4525_v40 = vld [vmem:[#allocation5 + $0x160] sm:$0xff] }
 0x364   :  { %v1691_v39 = vpack.c.bf16 %v5637_v19, %v5629_v41  ;;  %4083 = vmatprep.subr.bf16.mxu1 %v4280_v26 }
 0x365   :  { %v1368_v49 = vpop.f32.mrb[128].mxu1 }
 0x366   :  { %v1594_v15 = vadd.f32 %v1593_v32, %v1368_v49  ;;  %v1370_v5 = vpop.f32.mrb[129].mxu1  ;;  %v4278_v32 = vld [vmem:[#allocation10 + $0xf0] ss:$8 sps:$4 sm:$0xff]  }
 0x367   :  { %v1371_v9 = vpop.f32.mrb[130].mxu1  ;;  %2456 = vmatpush1.bf16.msra.mxu0 %v4278_v32  ;;  %4099 = vmatpush1.bf16.msra.mxu1 %v4278_v32  ;;  %v4526_v5 = vld [vmem:[#allocation5 + $0x168] sm:$0xff] }
 0x368   :  { %v5643_v0 = vadd.f32 %v1594_v15, %v1142_v54  ;;  %v1597_v24 = vadd.f32 %v1596_v31, %v1371_v9  ;;  %1947 = vmatmul.mubr.bf16.gmra.mrb[188].mxu1 %v1683_v23  ;;  %v1373_v29 = vpop.f32.mrb[131].mxu1  ;;  %v1144_v31 = vadd.f32 %v4523_v50, %v7189_v35  ;;  %v4524_v23 = vld [vmem:[#allocation5 + $0x158] sm:$0xff]  ;;  %v7192_v9 = vld [vmem:[#allocation85_spill] sm:$0xff] }
 0x369   :  { %1956 = vmatprep.mubr.bf16.mxu1 %v7101_v36  ;;  %v1145_v55 = vadd.f32 %v4524_v23, %v7190_v21 }
 0x36a   :  { %v1665_v52 = vadd.f32 %v1597_v24, %v1143_v58  ;;  %v7193_v24 = vld [vmem:[#allocation86_spill] sm:$0xff] }
 0x36c   :  { %v1692_v22 = vpack.c.bf16 %v1665_v52, %v5643_v0  ;;  %v4527_v0 = vld [vmem:[#allocation5 + $0x170] sm:$0xff]  ;;  %v4528_v52 = vld [vmem:[#allocation5 + $0x178] sm:$0xff] }
 0x36d   :  { %v1376_v51 = vpop.f32.mrb[132].mxu1 }
 0x36e   :  { %v1602_v3 = vadd.f32 %v5608_v30, %v1376_v51  ;;  %v1378_v42 = vpop.f32.mrb[133].mxu1  ;;  %v7191_v30 = vld [vmem:[#allocation84_spill] sm:$0xff]  ;;  %v7194_v51 = vld [vmem:[#allocation87_spill] sm:$0xff] }
 0x36f   :  { %v1379_v16 = vpop.f32.mrb[134].mxu1  ;;  %v1146_v43 = vadd.f32 %v4525_v40, %v7191_v30 }
 0x370   :  { %v1666_v1 = vadd.f32 %v1602_v3, %v1144_v31  ;;  %v1605_v10 = vadd.f32 %v5616_v60, %v1379_v16  ;;  %1957 = vmatmul.mubr.bf16.gmra.mrb[192].mxu1 %v1684_v59  ;;  %v1381_v47 = vpop.f32.mrb[135].mxu1  ;;  %v1147_v60 = vadd.f32 %v4526_v5, %v7192_v9 }
 0x371   :  { %1966 = vmatprep.mubr.bf16.mxu1 %v7101_v36 }
 0x372   :  { %v1667_v6 = vadd.f32 %v1605_v10, %v1145_v55 }
 0x374   :  { %v1693_v11 = vpack.c.bf16 %v1667_v6, %v1666_v1 }
 0x375   :  { %v1384_v49 = vpop.f32.mrb[136].mxu1 }
 0x376   :  { %v1610_v46 = vadd.f32 %v5626_v14, %v1384_v49  ;;  %v1386_v54 = vpop.f32.mrb[137].mxu1  ;;  %v1148_v14 = vadd.f32 %v4527_v0, %v7193_v24 }
 0x377   :  { %v1387_v15 = vpop.f32.mrb[138].mxu1 }
 0x378   :  { %v1668_v57 = vadd.f32 %v1610_v46, %v1146_v43  ;;  %v1613_v63 = vadd.f32 %v1612_v28, %v1387_v15  ;;  %1967 = vmatmul.mubr.bf16.gmra.mrb[196].mxu1 %v1685_v17  ;;  %v1389_v12 = vpop.f32.mrb[139].mxu1  ;;  %v1149_v28 = vadd.f32 %v4528_v52, %v7194_v51 }
 0x379   :  { %1976 = vmatprep.mubr.bf16.mxu1 %v7101_v36 }
 0x37a   :  { %v1669_v61 = vadd.f32 %v1613_v63, %v1147_v60 }
 0x37c   :  { %v1694_v59 = vpack.c.bf16 %v1669_v61, %v1668_v57 }
 0x37d   :  { %v1392_v58 = vpop.f32.mrb[140].mxu1 }
 0x37e   :  { %v1618_v29 = vadd.f32 %v5624_v8, %v1392_v58  ;;  %v1394_v26 = vpop.f32.mrb[141].mxu1 }
 0x37f   :  { %v1395_v32 = vpop.f32.mrb[142].mxu1 }
 0x380   :  { %v1670_v50 = vadd.f32 %v1618_v29, %v1148_v14  ;;  %v1621_v7 = vadd.f32 %v5634_v44, %v1395_v32  ;;  %1977 = vmatmul.mubr.bf16.gmra.mrb[200].mxu1 %v1686_v25  ;;  %v1397_v33 = vpop.f32.mrb[143].mxu1  ;;  %v5705_v25 = vrot.slane %v1712_v4, %v1716_v38 }
 0x381   :  { %1986 = vmatprep.mubr.bf16.mxu1 %v7101_v36 }
 0x382   :  { %v1671_v17 = vadd.f32 %v1621_v7, %v1149_v28 }
 0x384   :  { %v1695_v35 = vpack.c.bf16 %v1671_v17, %v1670_v50 }
 0x388   :  { %1987 = vmatmul.mubr.bf16.gmra.mrb[204].mxu1 %v1687_v13  ;;  %v1720_v13 = vsub.s32 1, %v5696_v37 }
 0x389   :  { %1996 = vmatprep.mubr.bf16.mxu1 %v7101_v36 }
 0x38a   :  { %v5709_v27 = vrot.slane %v1712_v4, %v1720_v13 }
 0x390   :  { %1997 = vmatmul.mubr.bf16.gmra.mrb[208].mxu1 %v1688_v2 }
 0x391   :  { %2006 = vmatprep.mubr.bf16.mxu1 %v7101_v36 }
 0x398   :  { %2007 = vmatmul.mubr.bf16.gmra.mrb[212].mxu1 %v1689_v20 }
 0x399   :  { %2016 = vmatprep.mubr.bf16.mxu1 %v7101_v36 }
 0x3a0   :  { %2017 = vmatmul.mubr.bf16.gmra.mrb[216].mxu1 %v1690_v53 }
 0x3a1   :  { %2026 = vmatprep.mubr.bf16.mxu1 %v7101_v36 }
 0x3a8   :  { %2027 = vmatmul.mubr.bf16.gmra.mrb[220].mxu1 %v1691_v39 }
 0x3a9   :  { %2036 = vmatprep.mubr.bf16.mxu1 %v7101_v36 }
 0x3b0   :  { %2037 = vmatmul.mubr.bf16.gmra.mrb[224].mxu1 %v1692_v22 }
 0x3b1   :  { %2046 = vmatprep.mubr.bf16.mxu1 %v7101_v36 }
 0x3b8   :  { %2047 = vmatmul.mubr.bf16.gmra.mrb[228].mxu1 %v1693_v11 }
 0x3b9   :  { %2056 = vmatprep.mubr.bf16.mxu1 %v7101_v36 }
 0x3c0   :  { %2057 = vmatmul.mubr.bf16.gmra.mrb[232].mxu1 %v1694_v59 }
 0x3c1   :  { %2066 = vmatprep.mubr.bf16.mxu1 %v7101_v36 }
 0x3c8   :  { %2067 = vmatmul.mubr.bf16.gmra.mrb[236].mxu1 %v1695_v35 }
 0x3e3   :  { %v1838_v36 = vpop.f32.mrb[144].mxu1 }
 0x3e4   :  { %v1839_v48 = vadd.f32 %v1838_v36, %v5705_v25  ;;  %v1840_v2 = vpop.f32.mrb[145].mxu1 }
 0x3e5   :  { %v1841_v56 = vadd.f32 %v1840_v2, %v5709_v27  ;;  %v1842_v45 = vpop.f32.mrb[146].mxu1 }
 0x3e6   :  { %v1843_v20 = vadd.f32 %v1842_v45, %v5705_v25  ;;  %v1844_v34 = vpop.f32.mrb[147].mxu1  ;;  %v2077_v53 = vmax.f32 %v1839_v48, 0.0 }
 0x3e7   :  { %v1845_v18 = vadd.f32 %v1844_v34, %v5709_v27  ;;  %v2078_v41 = vmax.f32 %v1841_v56, 0.0 }
 0x3e8   :  { %v2079_v8 = vmax.f32 %v1843_v20, 0.0 }
 0x3e9   :  { %v2080_v44 = vmax.f32 %v1845_v18, 0.0 }
 0x3ea   :  { %v2173_v19 = vpack.c.bf16 %v2079_v8, %v2077_v53 }
 0x3eb   :  { %v2174_v39 = vpack.c.bf16 %v2080_v44, %v2078_v41  ;;  %v1848_v22 = vpop.f32.mrb[148].mxu1 }
 0x3ec   :  { %v1849_v31 = vadd.f32 %v1848_v22, %v5705_v25  ;;  %v1850_v3 = vpop.f32.mrb[149].mxu1 }
 0x3ed   :  { %v1851_v42 = vadd.f32 %v1850_v3, %v5709_v27  ;;  %v1852_v16 = vpop.f32.mrb[150].mxu1  ;;  %2457 = vmatprep.mubr.bf16.mxu0 %v2174_v39 }
 0x3ee   :  { %v1853_v23 = vadd.f32 %v1852_v16, %v5705_v25  ;;  %v1854_v21 = vpop.f32.mrb[151].mxu1  ;;  %2458 = vmatmul.mubr.bf16.vlgmr.msra.gmra.mrb[144].mxu0 %v2173_v19  ;;  %v2081_v1 = vmax.f32 %v1849_v31, 0.0 }
 0x3ef   :  { %v1855_v55 = vadd.f32 %v1854_v21, %v5709_v27  ;;  %v2082_v47 = vmax.f32 %v1851_v42, 0.0 }
 0x3f0   :  { %v2083_v10 = vmax.f32 %v1853_v23, 0.0 }
 0x3f1   :  { %v2084_v6 = vmax.f32 %v1855_v55, 0.0 }
 0x3f2   :  { %v2175_v11 = vpack.c.bf16 %v2083_v10, %v2081_v1 }
 0x3f3   :  { %v2176_v49 = vpack.c.bf16 %v2084_v6, %v2082_v47  ;;  %v1858_v40 = vpop.f32.mrb[152].mxu1 }
 0x3f4   :  { %v1859_v30 = vadd.f32 %v1858_v40, %v5705_v25  ;;  %v1860_v43 = vpop.f32.mrb[153].mxu1 }
 0x3f5   :  { %v1861_v46 = vadd.f32 %v1860_v43, %v5709_v27  ;;  %v1862_v54 = vpop.f32.mrb[154].mxu1  ;;  %2467 = vmatprep.mubr.bf16.mxu0 %v2176_v49 }
 0x3f6   :  { %v1863_v15 = vadd.f32 %v1862_v54, %v5705_v25  ;;  %v1864_v5 = vpop.f32.mrb[155].mxu1  ;;  %2468 = vmatmul.mubr.bf16.gmra.mrb[148].mxu0 %v2175_v11  ;;  %v2085_v60 = vmax.f32 %v1859_v30, 0.0 }
 0x3f7   :  { %v1865_v9 = vadd.f32 %v1864_v5, %v5709_v27  ;;  %v2086_v63 = vmax.f32 %v1861_v46, 0.0 }
 0x3f8   :  { %v2087_v57 = vmax.f32 %v1863_v15, 0.0 }
 0x3f9   :  { %v2088_v12 = vmax.f32 %v1865_v9, 0.0 }
 0x3fa   :  { %v2177_v61 = vpack.c.bf16 %v2087_v57, %v2085_v60 }
 0x3fb   :  { %v2178_v59 = vpack.c.bf16 %v2088_v12, %v2086_v63  ;;  %v1868_v58 = vpop.f32.mrb[156].mxu1 }
 0x3fc   :  { %v1869_v0 = vadd.f32 %v1868_v58, %v5705_v25  ;;  %v1870_v24 = vpop.f32.mrb[157].mxu1 }
 0x3fd   :  { %v1871_v14 = vadd.f32 %v1870_v24, %v5709_v27  ;;  %v1872_v29 = vpop.f32.mrb[158].mxu1  ;;  %2477 = vmatprep.mubr.bf16.mxu0 %v2178_v59 }
 0x3fe   :  { %v1873_v26 = vadd.f32 %v1872_v29, %v5705_v25  ;;  %v1874_v32 = vpop.f32.mrb[159].mxu1  ;;  %2478 = vmatmul.mubr.bf16.gmra.mrb[152].mxu0 %v2177_v61  ;;  %v2089_v51 = vmax.f32 %v1869_v0, 0.0 }
 0x3ff   :  { %v1875_v52 = vadd.f32 %v1874_v32, %v5709_v27  ;;  %v2090_v50 = vmax.f32 %v1871_v14, 0.0 }
 0x400   :  { %v2091_v28 = vmax.f32 %v1873_v26, 0.0 }
 0x401   :  { %v2092_v7 = vmax.f32 %v1875_v52, 0.0 }
 0x402   :  { %v2179_v33 = vpack.c.bf16 %v2091_v28, %v2089_v51 }
 0x403   :  { %v2180_v17 = vpack.c.bf16 %v2092_v7, %v2090_v50  ;;  %v1878_v35 = vpop.f32.mrb[160].mxu1 }
 0x404   :  { %v1879_v62 = vadd.f32 %v1878_v35, %v5705_v25  ;;  %v1880_v4 = vpop.f32.mrb[161].mxu1 }
 0x405   :  { %v1881_v36 = vadd.f32 %v1880_v4, %v5709_v27  ;;  %v1882_v48 = vpop.f32.mrb[162].mxu1  ;;  %2487 = vmatprep.mubr.bf16.mxu0 %v2180_v17 }
 0x406   :  { %v1883_v2 = vadd.f32 %v1882_v48, %v5705_v25  ;;  %v1884_v56 = vpop.f32.mrb[163].mxu1  ;;  %2488 = vmatmul.mubr.bf16.gmra.mrb[156].mxu0 %v2179_v33  ;;  %v2093_v20 = vmax.f32 %v1879_v62, 0.0 }
 0x407   :  { %v1885_v45 = vadd.f32 %v1884_v56, %v5709_v27  ;;  %v2094_v18 = vmax.f32 %v1881_v36, 0.0 }
 0x408   :  { %v2095_v34 = vmax.f32 %v1883_v2, 0.0 }
 0x409   :  { %v2096_v53 = vmax.f32 %v1885_v45, 0.0 }
 0x40a   :  { %v2181_v8 = vpack.c.bf16 %v2095_v34, %v2093_v20 }
 0x40b   :  { %v2182_v41 = vpack.c.bf16 %v2096_v53, %v2094_v18  ;;  %v1888_v44 = vpop.f32.mrb[164].mxu1 }
 0x40c   :  { %v1889_v19 = vadd.f32 %v1888_v44, %v5705_v25  ;;  %v1890_v39 = vpop.f32.mrb[165].mxu1 }
 0x40d   :  { %v1891_v22 = vadd.f32 %v1890_v39, %v5709_v27  ;;  %v1892_v31 = vpop.f32.mrb[166].mxu1  ;;  %2497 = vmatprep.mubr.bf16.mxu0 %v2182_v41 }
 0x40e   :  { %v1893_v3 = vadd.f32 %v1892_v31, %v5705_v25  ;;  %v1894_v42 = vpop.f32.mrb[167].mxu1  ;;  %2498 = vmatmul.mubr.bf16.gmra.mrb[160].mxu0 %v2181_v8  ;;  %v2097_v23 = vmax.f32 %v1889_v19, 0.0 }
 0x40f   :  { %v1895_v16 = vadd.f32 %v1894_v42, %v5709_v27  ;;  %v2098_v55 = vmax.f32 %v1891_v22, 0.0 }
 0x410   :  { %v2099_v21 = vmax.f32 %v1893_v3, 0.0 }
 0x411   :  { %v2100_v1 = vmax.f32 %v1895_v16, 0.0 }
 0x412   :  { %v2183_v10 = vpack.c.bf16 %v2099_v21, %v2097_v23 }
 0x413   :  { %v2184_v47 = vpack.c.bf16 %v2100_v1, %v2098_v55  ;;  %v1898_v6 = vpop.f32.mrb[168].mxu1 }
 0x414   :  { %v1899_v11 = vadd.f32 %v1898_v6, %v5705_v25  ;;  %v1900_v49 = vpop.f32.mrb[169].mxu1 }
 0x415   :  { %v1901_v40 = vadd.f32 %v1900_v49, %v5709_v27  ;;  %v1902_v30 = vpop.f32.mrb[170].mxu1  ;;  %2507 = vmatprep.mubr.bf16.mxu0 %v2184_v47 }
 0x416   :  { %v1903_v43 = vadd.f32 %v1902_v30, %v5705_v25  ;;  %v1904_v46 = vpop.f32.mrb[171].mxu1  ;;  %2508 = vmatmul.mubr.bf16.gmra.mrb[164].mxu0 %v2183_v10  ;;  %v2101_v15 = vmax.f32 %v1899_v11, 0.0 }
 0x417   :  { %v1905_v54 = vadd.f32 %v1904_v46, %v5709_v27  ;;  %v2102_v9 = vmax.f32 %v1901_v40, 0.0 }
 0x418   :  { %v2103_v5 = vmax.f32 %v1903_v43, 0.0 }
 0x419   :  { %v2104_v60 = vmax.f32 %v1905_v54, 0.0 }
 0x41a   :  { %v2185_v57 = vpack.c.bf16 %v2103_v5, %v2101_v15 }
 0x41b   :  { %v2186_v63 = vpack.c.bf16 %v2104_v60, %v2102_v9  ;;  %v1908_v12 = vpop.f32.mrb[172].mxu1 }
 0x41c   :  { %v1909_v61 = vadd.f32 %v1908_v12, %v5705_v25  ;;  %v1910_v59 = vpop.f32.mrb[173].mxu1 }
 0x41d   :  { %v1911_v58 = vadd.f32 %v1910_v59, %v5709_v27  ;;  %v1912_v0 = vpop.f32.mrb[174].mxu1  ;;  %2517 = vmatprep.mubr.bf16.mxu0 %v2186_v63 }
 0x41e   :  { %v1913_v24 = vadd.f32 %v1912_v0, %v5705_v25  ;;  %v1914_v14 = vpop.f32.mrb[175].mxu1  ;;  %2518 = vmatmul.mubr.bf16.gmra.mrb[168].mxu0 %v2185_v57  ;;  %v2105_v26 = vmax.f32 %v1909_v61, 0.0 }
 0x41f   :  { %v1915_v29 = vadd.f32 %v1914_v14, %v5709_v27  ;;  %v2106_v52 = vmax.f32 %v1911_v58, 0.0 }
 0x420   :  { %v2107_v32 = vmax.f32 %v1913_v24, 0.0 }
 0x421   :  { %v2108_v51 = vmax.f32 %v1915_v29, 0.0 }
 0x422   :  { %v2187_v28 = vpack.c.bf16 %v2107_v32, %v2105_v26 }
 0x423   :  { %v2188_v50 = vpack.c.bf16 %v2108_v51, %v2106_v52  ;;  %v1918_v7 = vpop.f32.mrb[176].mxu1 }
 0x424   :  { %v1919_v33 = vadd.f32 %v1918_v7, %v5705_v25  ;;  %v1920_v17 = vpop.f32.mrb[177].mxu1 }
 0x425   :  { %v1921_v35 = vadd.f32 %v1920_v17, %v5709_v27  ;;  %v1922_v62 = vpop.f32.mrb[178].mxu1  ;;  %2527 = vmatprep.mubr.bf16.mxu0 %v2188_v50 }
 0x426   :  { %v1923_v4 = vadd.f32 %v1922_v62, %v5705_v25  ;;  %v1924_v36 = vpop.f32.mrb[179].mxu1  ;;  %2528 = vmatmul.mubr.bf16.gmra.mrb[172].mxu0 %v2187_v28  ;;  %v2109_v2 = vmax.f32 %v1919_v33, 0.0 }
 0x427   :  { %v1925_v48 = vadd.f32 %v1924_v36, %v5709_v27  ;;  %v2110_v45 = vmax.f32 %v1921_v35, 0.0 }
 0x428   :  { %v2111_v56 = vmax.f32 %v1923_v4, 0.0 }
 0x429   :  { %v2112_v20 = vmax.f32 %v1925_v48, 0.0 }
 0x42a   :  { %v2189_v34 = vpack.c.bf16 %v2111_v56, %v2109_v2 }
 0x42b   :  { %v2190_v18 = vpack.c.bf16 %v2112_v20, %v2110_v45  ;;  %v1928_v53 = vpop.f32.mrb[180].mxu1 }
 0x42c   :  { %v1929_v8 = vadd.f32 %v1928_v53, %v5705_v25  ;;  %v1930_v41 = vpop.f32.mrb[181].mxu1 }
 0x42d   :  { %v1931_v44 = vadd.f32 %v1930_v41, %v5709_v27  ;;  %v1932_v19 = vpop.f32.mrb[182].mxu1  ;;  %2537 = vmatprep.mubr.bf16.mxu0 %v2190_v18 }
 0x42e   :  { %v1933_v39 = vadd.f32 %v1932_v19, %v5705_v25  ;;  %v1934_v22 = vpop.f32.mrb[183].mxu1  ;;  %2538 = vmatmul.mubr.bf16.gmra.mrb[176].mxu0 %v2189_v34  ;;  %v2113_v3 = vmax.f32 %v1929_v8, 0.0 }
 0x42f   :  { %v1935_v31 = vadd.f32 %v1934_v22, %v5709_v27  ;;  %v2114_v16 = vmax.f32 %v1931_v44, 0.0 }
 0x430   :  { %v2115_v42 = vmax.f32 %v1933_v39, 0.0 }
 0x431   :  { %v2116_v23 = vmax.f32 %v1935_v31, 0.0 }
 0x432   :  { %v2191_v21 = vpack.c.bf16 %v2115_v42, %v2113_v3 }
 0x433   :  { %v2192_v55 = vpack.c.bf16 %v2116_v23, %v2114_v16  ;;  %v1938_v1 = vpop.f32.mrb[184].mxu1 }
 0x434   :  { %v1939_v10 = vadd.f32 %v1938_v1, %v5705_v25  ;;  %v1940_v47 = vpop.f32.mrb[185].mxu1 }
 0x435   :  { %v1941_v6 = vadd.f32 %v1940_v47, %v5709_v27  ;;  %v1942_v11 = vpop.f32.mrb[186].mxu1  ;;  %2547 = vmatprep.mubr.bf16.mxu0 %v2192_v55 }
 0x436   :  { %v1943_v49 = vadd.f32 %v1942_v11, %v5705_v25  ;;  %v1944_v40 = vpop.f32.mrb[187].mxu1  ;;  %2548 = vmatmul.mubr.bf16.gmra.mrb[180].mxu0 %v2191_v21  ;;  %v2117_v43 = vmax.f32 %v1939_v10, 0.0 }
 0x437   :  { %v1945_v30 = vadd.f32 %v1944_v40, %v5709_v27  ;;  %v2118_v54 = vmax.f32 %v1941_v6, 0.0 }
 0x438   :  { %v2119_v46 = vmax.f32 %v1943_v49, 0.0 }
 0x439   :  { %v2120_v15 = vmax.f32 %v1945_v30, 0.0 }
 0x43a   :  { %v2193_v5 = vpack.c.bf16 %v2119_v46, %v2117_v43 }
 0x43b   :  { %v2194_v9 = vpack.c.bf16 %v2120_v15, %v2118_v54  ;;  %v1948_v60 = vpop.f32.mrb[188].mxu1 }
 0x43c   :  { %v1949_v57 = vadd.f32 %v1948_v60, %v5705_v25  ;;  %v1950_v63 = vpop.f32.mrb[189].mxu1 }
 0x43d   :  { %v1951_v12 = vadd.f32 %v1950_v63, %v5709_v27  ;;  %v1952_v61 = vpop.f32.mrb[190].mxu1  ;;  %2557 = vmatprep.mubr.bf16.mxu0 %v2194_v9 }
 0x43e   :  { %v1953_v59 = vadd.f32 %v1952_v61, %v5705_v25  ;;  %v1954_v58 = vpop.f32.mrb[191].mxu1  ;;  %2558 = vmatmul.mubr.bf16.gmra.mrb[184].mxu0 %v2193_v5  ;;  %v2121_v24 = vmax.f32 %v1949_v57, 0.0 }
 0x43f   :  { %v1955_v0 = vadd.f32 %v1954_v58, %v5709_v27  ;;  %v2122_v29 = vmax.f32 %v1951_v12, 0.0 }
 0x440   :  { %v2123_v14 = vmax.f32 %v1953_v59, 0.0 }
 0x441   :  { %v2124_v26 = vmax.f32 %v1955_v0, 0.0 }
 0x442   :  { %v2195_v32 = vpack.c.bf16 %v2123_v14, %v2121_v24 }
 0x443   :  { %v2196_v52 = vpack.c.bf16 %v2124_v26, %v2122_v29  ;;  %v1958_v51 = vpop.f32.mrb[192].mxu1 }
 0x444   :  { %v1959_v28 = vadd.f32 %v1958_v51, %v5705_v25  ;;  %v1960_v50 = vpop.f32.mrb[193].mxu1 }
 0x445   :  { %v1961_v7 = vadd.f32 %v1960_v50, %v5709_v27  ;;  %v1962_v33 = vpop.f32.mrb[194].mxu1  ;;  %2567 = vmatprep.mubr.bf16.mxu0 %v2196_v52 }
 0x446   :  { %v1963_v17 = vadd.f32 %v1962_v33, %v5705_v25  ;;  %v1964_v35 = vpop.f32.mrb[195].mxu1  ;;  %2568 = vmatmul.mubr.bf16.gmra.mrb[188].mxu0 %v2195_v32  ;;  %v2125_v4 = vmax.f32 %v1959_v28, 0.0 }
 0x447   :  { %v1965_v62 = vadd.f32 %v1964_v35, %v5709_v27  ;;  %v2126_v48 = vmax.f32 %v1961_v7, 0.0 }
 0x448   :  { %v2127_v36 = vmax.f32 %v1963_v17, 0.0 }
 0x449   :  { %v2128_v2 = vmax.f32 %v1965_v62, 0.0 }
 0x44a   :  { %v2197_v56 = vpack.c.bf16 %v2127_v36, %v2125_v4 }
 0x44b   :  { %v2198_v45 = vpack.c.bf16 %v2128_v2, %v2126_v48  ;;  %v1968_v20 = vpop.f32.mrb[196].mxu1 }
 0x44c   :  { %v1969_v34 = vadd.f32 %v1968_v20, %v5705_v25  ;;  %v1970_v18 = vpop.f32.mrb[197].mxu1 }
 0x44d   :  { %v1971_v53 = vadd.f32 %v1970_v18, %v5709_v27  ;;  %v1972_v8 = vpop.f32.mrb[198].mxu1  ;;  %2577 = vmatprep.mubr.bf16.mxu0 %v2198_v45 }
 0x44e   :  { %v1973_v41 = vadd.f32 %v1972_v8, %v5705_v25  ;;  %v1974_v44 = vpop.f32.mrb[199].mxu1  ;;  %2578 = vmatmul.mubr.bf16.gmra.mrb[192].mxu0 %v2197_v56  ;;  %v2129_v39 = vmax.f32 %v1969_v34, 0.0 }
 0x44f   :  { %v1975_v19 = vadd.f32 %v1974_v44, %v5709_v27  ;;  %v2130_v31 = vmax.f32 %v1971_v53, 0.0 }
 0x450   :  { %v2131_v22 = vmax.f32 %v1973_v41, 0.0 }
 0x451   :  { %v2132_v3 = vmax.f32 %v1975_v19, 0.0 }
 0x452   :  { %v2199_v42 = vpack.c.bf16 %v2131_v22, %v2129_v39 }
 0x453   :  { %v2200_v16 = vpack.c.bf16 %v2132_v3, %v2130_v31  ;;  %v1978_v23 = vpop.f32.mrb[200].mxu1 }
 0x454   :  { %v1979_v21 = vadd.f32 %v1978_v23, %v5705_v25  ;;  %v1980_v55 = vpop.f32.mrb[201].mxu1 }
 0x455   :  { %v1981_v1 = vadd.f32 %v1980_v55, %v5709_v27  ;;  %v1982_v10 = vpop.f32.mrb[202].mxu1  ;;  %2587 = vmatprep.mubr.bf16.mxu0 %v2200_v16 }
 0x456   :  { %v1983_v47 = vadd.f32 %v1982_v10, %v5705_v25  ;;  %v1984_v6 = vpop.f32.mrb[203].mxu1  ;;  %2588 = vmatmul.mubr.bf16.gmra.mrb[196].mxu0 %v2199_v42  ;;  %v2133_v49 = vmax.f32 %v1979_v21, 0.0 }
 0x457   :  { %v1985_v11 = vadd.f32 %v1984_v6, %v5709_v27  ;;  %v2134_v30 = vmax.f32 %v1981_v1, 0.0 }
 0x458   :  { %v2135_v40 = vmax.f32 %v1983_v47, 0.0 }
 0x459   :  { %v2136_v43 = vmax.f32 %v1985_v11, 0.0 }
 0x45a   :  { %v2201_v46 = vpack.c.bf16 %v2135_v40, %v2133_v49 }
 0x45b   :  { %v2202_v54 = vpack.c.bf16 %v2136_v43, %v2134_v30  ;;  %v1988_v15 = vpop.f32.mrb[204].mxu1 }
 0x45c   :  { %v1989_v5 = vadd.f32 %v1988_v15, %v5705_v25  ;;  %v1990_v9 = vpop.f32.mrb[205].mxu1 }
 0x45d   :  { %v1991_v60 = vadd.f32 %v1990_v9, %v5709_v27  ;;  %v1992_v57 = vpop.f32.mrb[206].mxu1  ;;  %2597 = vmatprep.mubr.bf16.mxu0 %v2202_v54 }
 0x45e   :  { %v1993_v63 = vadd.f32 %v1992_v57, %v5705_v25  ;;  %v1994_v12 = vpop.f32.mrb[207].mxu1  ;;  %2598 = vmatmul.mubr.bf16.gmra.mrb[200].mxu0 %v2201_v46  ;;  %v2137_v59 = vmax.f32 %v1989_v5, 0.0 }
 0x45f   :  { %v1995_v61 = vadd.f32 %v1994_v12, %v5709_v27  ;;  %v2138_v0 = vmax.f32 %v1991_v60, 0.0 }
 0x460   :  { %v2139_v58 = vmax.f32 %v1993_v63, 0.0 }
 0x461   :  { %v2140_v24 = vmax.f32 %v1995_v61, 0.0 }
 0x462   :  { %v2203_v14 = vpack.c.bf16 %v2139_v58, %v2137_v59 }
 0x463   :  { %v2204_v29 = vpack.c.bf16 %v2140_v24, %v2138_v0  ;;  %v1998_v26 = vpop.f32.mrb[208].mxu1 }
 0x464   :  { %v1999_v32 = vadd.f32 %v1998_v26, %v5705_v25  ;;  %v2000_v52 = vpop.f32.mrb[209].mxu1 }
 0x465   :  { %v2001_v51 = vadd.f32 %v2000_v52, %v5709_v27  ;;  %v2002_v28 = vpop.f32.mrb[210].mxu1  ;;  %2607 = vmatprep.mubr.bf16.mxu0 %v2204_v29 }
 0x466   :  { %v2003_v50 = vadd.f32 %v2002_v28, %v5705_v25  ;;  %v2004_v7 = vpop.f32.mrb[211].mxu1  ;;  %2608 = vmatmul.mubr.bf16.gmra.mrb[204].mxu0 %v2203_v14  ;;  %v2141_v17 = vmax.f32 %v1999_v32, 0.0 }
 0x467   :  { %v2005_v33 = vadd.f32 %v2004_v7, %v5709_v27  ;;  %v2142_v62 = vmax.f32 %v2001_v51, 0.0 }
 0x468   :  { %v2143_v35 = vmax.f32 %v2003_v50, 0.0 }
 0x469   :  { %v2144_v4 = vmax.f32 %v2005_v33, 0.0 }
 0x46a   :  { %v2205_v36 = vpack.c.bf16 %v2143_v35, %v2141_v17 }
 0x46b   :  { %v2206_v48 = vpack.c.bf16 %v2144_v4, %v2142_v62  ;;  %v2008_v2 = vpop.f32.mrb[212].mxu1 }
 0x46c   :  { %v2009_v56 = vadd.f32 %v2008_v2, %v5705_v25  ;;  %v2010_v45 = vpop.f32.mrb[213].mxu1 }
 0x46d   :  { %v2011_v20 = vadd.f32 %v2010_v45, %v5709_v27  ;;  %v2012_v34 = vpop.f32.mrb[214].mxu1  ;;  %2617 = vmatprep.mubr.bf16.mxu0 %v2206_v48 }
 0x46e   :  { %v2013_v18 = vadd.f32 %v2012_v34, %v5705_v25  ;;  %v2014_v53 = vpop.f32.mrb[215].mxu1  ;;  %2618 = vmatmul.mubr.bf16.gmra.mrb[208].mxu0 %v2205_v36  ;;  %v2145_v41 = vmax.f32 %v2009_v56, 0.0 }
 0x46f   :  { %v2015_v8 = vadd.f32 %v2014_v53, %v5709_v27  ;;  %v2146_v19 = vmax.f32 %v2011_v20, 0.0 }
 0x470   :  { %v2147_v44 = vmax.f32 %v2013_v18, 0.0 }
 0x471   :  { %v2148_v39 = vmax.f32 %v2015_v8, 0.0 }
 0x472   :  { %v2207_v22 = vpack.c.bf16 %v2147_v44, %v2145_v41 }
 0x473   :  { %v2208_v31 = vpack.c.bf16 %v2148_v39, %v2146_v19  ;;  %v2018_v3 = vpop.f32.mrb[216].mxu1 }
 0x474   :  { %v2019_v42 = vadd.f32 %v2018_v3, %v5705_v25  ;;  %v2020_v16 = vpop.f32.mrb[217].mxu1 }
 0x475   :  { %v2021_v23 = vadd.f32 %v2020_v16, %v5709_v27  ;;  %v2022_v21 = vpop.f32.mrb[218].mxu1  ;;  %2627 = vmatprep.mubr.bf16.mxu0 %v2208_v31 }
 0x476   :  { %v2023_v55 = vadd.f32 %v2022_v21, %v5705_v25  ;;  %v2024_v1 = vpop.f32.mrb[219].mxu1  ;;  %2628 = vmatmul.mubr.bf16.gmra.mrb[212].mxu0 %v2207_v22  ;;  %v2149_v47 = vmax.f32 %v2019_v42, 0.0 }
 0x477   :  { %v2025_v10 = vadd.f32 %v2024_v1, %v5709_v27  ;;  %v2150_v11 = vmax.f32 %v2021_v23, 0.0 }
 0x478   :  { %v2151_v6 = vmax.f32 %v2023_v55, 0.0 }
 0x479   :  { %v2152_v49 = vmax.f32 %v2025_v10, 0.0 }
 0x47a   :  { %v2209_v40 = vpack.c.bf16 %v2151_v6, %v2149_v47 }
 0x47b   :  { %v2210_v30 = vpack.c.bf16 %v2152_v49, %v2150_v11  ;;  %v2028_v43 = vpop.f32.mrb[220].mxu1 }
 0x47c   :  { %v2029_v46 = vadd.f32 %v2028_v43, %v5705_v25  ;;  %v2030_v54 = vpop.f32.mrb[221].mxu1 }
 0x47d   :  { %v2031_v15 = vadd.f32 %v2030_v54, %v5709_v27  ;;  %v2032_v5 = vpop.f32.mrb[222].mxu1  ;;  %2637 = vmatprep.mubr.bf16.mxu0 %v2210_v30 }
 0x47e   :  { %v2033_v9 = vadd.f32 %v2032_v5, %v5705_v25  ;;  %v2034_v60 = vpop.f32.mrb[223].mxu1  ;;  %2638 = vmatmul.mubr.bf16.gmra.mrb[216].mxu0 %v2209_v40  ;;  %v2153_v63 = vmax.f32 %v2029_v46, 0.0 }
 0x47f   :  { %v2035_v57 = vadd.f32 %v2034_v60, %v5709_v27  ;;  %v2154_v61 = vmax.f32 %v2031_v15, 0.0 }
 0x480   :  { %v2155_v12 = vmax.f32 %v2033_v9, 0.0 }
 0x481   :  { %v2156_v59 = vmax.f32 %v2035_v57, 0.0 }
 0x482   :  { %v2211_v58 = vpack.c.bf16 %v2155_v12, %v2153_v63 }
 0x483   :  { %v2212_v0 = vpack.c.bf16 %v2156_v59, %v2154_v61  ;;  %v2038_v24 = vpop.f32.mrb[224].mxu1  ;;  %v2253_v59 = vld [vmem:[%s6984_s6] sm:$0x3]  ;;  %s4725_s6 = smov [#allocation12]  }
 0x484   :  { %v2039_v14 = vadd.f32 %v2038_v24, %v5705_v25  ;;  %v2040_v29 = vpop.f32.mrb[225].mxu1  ;;  %s3723_s12 = sshll.u32 %s4725_s6, 4  ;;  %s6866_s12 = int_to_ptr.vmem [resolvable:$true] %s3723_s12 }
 0x485   :  { %v2041_v26 = vadd.f32 %v2040_v29, %v5709_v27  ;;  %v2042_v32 = vpop.f32.mrb[226].mxu1  ;;  %2647 = vmatprep.mubr.bf16.mxu0 %v2212_v0  ;;  %s4639_s13 = scalar_lea.vmem %s6866_s12, 6144  ;;  %p4644_p13 = scmp.lt.s32.totalorder %s6866_s12, %s6866_s12 }
 0x486   :  { %v2043_v52 = vadd.f32 %v2042_v32, %v5705_v25  ;;  %v2044_v51 = vpop.f32.mrb[227].mxu1  ;;  %2648 = vmatmul.mubr.bf16.gmra.mrb[220].mxu0 %v2211_v58  ;;  %v2157_v50 = vmax.f32 %v2039_v14, 0.0  ;;  %v5812_v58 = vrot.slane %v2253_v59, %v1716_v38  ;;  %p4640_p12 = scmp.ne.s32.totalorder %s6866_s12, %s4639_s13  ;;  %p4645_p0 = scmp.lt.s32.totalorder %s4639_s13, %s4639_s13 }
 0x487   :  { %v2045_v28 = vadd.f32 %v2044_v51, %v5709_v27  ;;  %v2158_v33 = vmax.f32 %v2041_v26, 0.0 }
 0x488   :  { %v2159_v7 = vmax.f32 %v2043_v52, 0.0  ;;  %p4646_p1 = por %p4645_p0, %p4644_p13 }
 0x489   :  { %v2160_v17 = vmax.f32 %v2045_v28, 0.0 }
 0x48a   :  { %v2213_v35 = vpack.c.bf16 %v2159_v7, %v2157_v50  ;;  %p4647_p2 = pnand %p4646_p1, %p4640_p12 }
 0x48b   :  { %v2214_v62 = vpack.c.bf16 %v2160_v17, %v2158_v33  ;;  %v2048_v4 = vpop.f32.mrb[228].mxu1 }
 0x48c   :  { %v2049_v36 = vadd.f32 %v2048_v4, %v5705_v25  ;;  %v2050_v48 = vpop.f32.mrb[229].mxu1 }
 0x48d   :  { %v2051_v2 = vadd.f32 %v2050_v48, %v5709_v27  ;;  %v2052_v56 = vpop.f32.mrb[230].mxu1  ;;  %2657 = vmatprep.mubr.bf16.mxu0 %v2214_v62 }
 0x48e   :  { %v2053_v45 = vadd.f32 %v2052_v56, %v5705_v25  ;;  %v2054_v20 = vpop.f32.mrb[231].mxu1  ;;  %2658 = vmatmul.mubr.bf16.gmra.mrb[224].mxu0 %v2213_v35  ;;  %v2161_v18 = vmax.f32 %v2049_v36, 0.0 }
 0x48f   :  { %v2055_v34 = vadd.f32 %v2054_v20, %v5709_v27  ;;  %v2162_v8 = vmax.f32 %v2051_v2, 0.0 }
 0x490   :  { %v2163_v53 = vmax.f32 %v2053_v45, 0.0 }
 0x491   :  { %v2164_v41 = vmax.f32 %v2055_v34, 0.0 }
 0x492   :  { %v2215_v44 = vpack.c.bf16 %v2163_v53, %v2161_v18 }
 0x493   :  { %v2216_v19 = vpack.c.bf16 %v2164_v41, %v2162_v8  ;;  %v2058_v39 = vpop.f32.mrb[232].mxu1 }
 0x494   :  { %v2059_v22 = vadd.f32 %v2058_v39, %v5705_v25  ;;  %v2060_v31 = vpop.f32.mrb[233].mxu1 }
 0x495   :  { %v2061_v3 = vadd.f32 %v2060_v31, %v5709_v27  ;;  %v2062_v42 = vpop.f32.mrb[234].mxu1  ;;  %2667 = vmatprep.mubr.bf16.mxu0 %v2216_v19 }
 0x496   :  { %v2063_v16 = vadd.f32 %v2062_v42, %v5705_v25  ;;  %v2064_v23 = vpop.f32.mrb[235].mxu1  ;;  %2668 = vmatmul.mubr.bf16.gmra.mrb[228].mxu0 %v2215_v44  ;;  %v2165_v55 = vmax.f32 %v2059_v22, 0.0 }
 0x497   :  { %v2065_v21 = vadd.f32 %v2064_v23, %v5709_v27  ;;  %v2166_v10 = vmax.f32 %v2061_v3, 0.0 }
 0x498   :  { %v2167_v1 = vmax.f32 %v2063_v16, 0.0 }
 0x499   :  { %v2168_v47 = vmax.f32 %v2065_v21, 0.0 }
 0x49a   :  { %v2217_v6 = vpack.c.bf16 %v2167_v1, %v2165_v55 }
 0x49b   :  { %v2218_v11 = vpack.c.bf16 %v2168_v47, %v2166_v10  ;;  %v2068_v49 = vpop.f32.mrb[236].mxu1 }
 0x49c   :  { %v2069_v40 = vadd.f32 %v2068_v49, %v5705_v25  ;;  %v2070_v30 = vpop.f32.mrb[237].mxu1 }
 0x49d   :  { %v2071_v43 = vadd.f32 %v2070_v30, %v5709_v27  ;;  %v2072_v46 = vpop.f32.mrb[238].mxu1  ;;  %2677 = vmatprep.mubr.bf16.mxu1 %v2218_v11 }
 0x49e   :  { %v2073_v54 = vadd.f32 %v2072_v46, %v5705_v25  ;;  %v2074_v15 = vpop.f32.mrb[239].mxu1  ;;  %2678 = vmatmul.mubr.bf16.vlgmr.msra.gmra.mrb[240].mxu1 %v2217_v6  ;;  %v2169_v9 = vmax.f32 %v2069_v40, 0.0  ;;  %v5816_v25 = vrot.slane %v2253_v59, %v1720_v13 }
 0x49f   :  { %v2075_v5 = vadd.f32 %v2074_v15, %v5709_v27  ;;  %v2170_v57 = vmax.f32 %v2071_v43, 0.0 }
 0x4a0   :  { %v2171_v60 = vmax.f32 %v2073_v54, 0.0 }
 0x4a1   :  { %v2172_v63 = vmax.f32 %v2075_v5, 0.0 }
 0x4a2   :  { %v2219_v12 = vpack.c.bf16 %v2171_v60, %v2169_v9 }
 0x4a3   :  { %v2220_v61 = vpack.c.bf16 %v2172_v63, %v2170_v57 }
 0x4a5   :  { %2687 = vmatprep.mubr.bf16.mxu1 %v2220_v61 }
 0x4a6   :  { %2688 = vmatmul.mubr.bf16.gmra.mrb[244].mxu1 %v2219_v12 }
 0x4c1   :  { %v2459_v27 = vpop.f32.mrb[144].mxu0 }
 0x4c2   :  { %v5819_v0 = vadd.f32 %v2459_v27, %v5812_v58  ;;  %v2461_v24 = vpop.f32.mrb[145].mxu0 }
 0x4c3   :  { %v5822_v14 = vadd.f32 %v2461_v24, %v5816_v25  ;;  %v2463_v29 = vpop.f32.mrb[146].mxu0 }
 0x4c4   :  { %3418 = vst [vmem:[#allocation12] sm:$0xff] %v5819_v0  ;;  %v5826_v26 = vadd.f32 %v2463_v29, %v5812_v58  ;;  %v2465_v38 = vpop.f32.mrb[147].mxu0 }
 0x4c5   :  { %v2746_v32 = vand.u32 2147483647, %v5822_v14  ;;  %v5830_v37 = vadd.f32 %v2465_v38, %v5816_v25  ;;  %v2698_v24 = vmax.f32 %v5822_v14, 0.0 }
 0x4c6   :  { %3419 = vst [vmem:[#allocation12 + $0x8] sm:$0xff] %v5826_v26 }
 0x4c7   :  { %v2794_v13 = vsub.f32 0.0, %v2746_v32  ;;  %v2747_v52 = vand.u32 2147483647, %v5830_v37  ;;  %v2699_v29 = vmax.f32 %v5830_v37, 0.0 }
 0x4c9   :  { %v2842_v51 = vmul.f32 1.442695, %v2794_v13  ;;  %v2795_v28 = vsub.f32 0.0, %v2747_v52  ;;  %v2469_v50 = vpop.f32.mrb[148].mxu0 }
 0x4ca   :  { %v5835_v7 = vadd.f32 %v2469_v50, %v5812_v58  ;;  %v2471_v33 = vpop.f32.mrb[149].mxu0 }
 0x4cb   :  { %4281 = vpow2.f32 %v2842_v51  ;;  %v2844_v17 = vmul.f32 1.442695, %v2795_v28  ;;  %v5838_v35 = vadd.f32 %v2471_v33, %v5816_v25  ;;  %v2473_v62 = vpop.f32.mrb[150].mxu0 }
 0x4cc   :  { %3420 = vst [vmem:[#allocation12 + $0x10] sm:$0xff] %v5835_v7  ;;  %v5842_v4 = vadd.f32 %v2473_v62, %v5812_v58  ;;  %v2475_v36 = vpop.f32.mrb[151].mxu0 }
 0x4cd   :  { %4283 = vpow2.f32 %v2844_v17  ;;  %v2748_v48 = vand.u32 2147483647, %v5838_v35  ;;  %v5846_v2 = vadd.f32 %v2475_v36, %v5816_v25  ;;  %v2700_v13 = vmax.f32 %v5838_v35, 0.0 }
 0x4ce   :  { %3421 = vst [vmem:[#allocation12 + $0x18] sm:$0xff] %v5842_v4 }
 0x4cf   :  { %v2796_v56 = vsub.f32 0.0, %v2748_v48  ;;  %v2749_v45 = vand.u32 2147483647, %v5846_v2 }
 0x4d1   :  { %v2846_v20 = vmul.f32 1.442695, %v2796_v56  ;;  %v2797_v34 = vsub.f32 0.0, %v2749_v45  ;;  %v2479_v18 = vpop.f32.mrb[152].mxu0 }
 0x4d2   :  { %v5851_v53 = vadd.f32 %v2479_v18, %v5812_v58  ;;  %v2481_v8 = vpop.f32.mrb[153].mxu0 }
 0x4d3   :  { %4285 = vpow2.f32 %v2846_v20  ;;  %v2848_v41 = vmul.f32 1.442695, %v2797_v34  ;;  %v5854_v44 = vadd.f32 %v2481_v8, %v5816_v25  ;;  %v2483_v19 = vpop.f32.mrb[154].mxu0 }
 0x4d4   :  { %3422 = vst [vmem:[#allocation12 + $0x20] sm:$0xff] %v5851_v53  ;;  %v5858_v39 = vadd.f32 %v2483_v19, %v5812_v58  ;;  %v2485_v22 = vpop.f32.mrb[155].mxu0 }
 0x4d5   :  { %v4282_v31 = vpop.eup %4281  ;;  %4287 = vpow2.f32 %v2848_v41  ;;  %v2750_v3 = vand.u32 2147483647, %v5854_v44  ;;  %v5862_v42 = vadd.f32 %v2485_v22, %v5816_v25 }
 0x4d6   :  { %v2938_v16 = vadd.f32 1.0, %v4282_v31  ;;  %3423 = vst [vmem:[#allocation12 + $0x28] sm:$0xff] %v5858_v39  ;;  %v2941_v11 = vmul.f32 -0.5, %v4282_v31  ;;  %v2944_v5 = vand.u32 2147483647, %v4282_v31 }
 0x4d7   :  { %v5865_v23 = vpop.eup %4283  ;;  %v2798_v21 = vsub.f32 0.0, %v2750_v3  ;;  %v2751_v55 = vand.u32 2147483647, %v5862_v42  ;;  %v3514_v3 = vld [vmem:[#allocation7] sm:$0xff] }
 0x4d8   :  { %4289 = vlog2.f32 %v2938_v16  ;;  %v2947_v1 = vadd.f32 1.0, %v5865_v23  ;;  %v2950_v49 = vmul.f32 -0.5, %v5865_v23  ;;  %v2942_v12 = vadd.f32 1.0, %v2941_v11  ;;  %v3515_v11 = vld [vmem:[#allocation7 + $0x8] sm:$0xff] }
 0x4d9   :  { %v2850_v10 = vmul.f32 1.442695, %v2798_v21  ;;  %v2799_v47 = vsub.f32 0.0, %v2751_v55  ;;  %v2489_v6 = vpop.f32.mrb[156].mxu0  ;;  %vm5893_vm0 = vcmp.lt.f32.partialorder %v2944_v5, 0.0004427343 }
 0x4da   :  { %4291 = vlog2.f32 %v2947_v1  ;;  %v2491_v30 = vpop.f32.mrb[157].mxu0  ;;  %v5871_v43 = vadd.f32 %v2489_v6, %v5812_v58  ;;  %v2951_v61 = vadd.f32 1.0, %v2950_v49  ;;  %v2953_v33 = vand.u32 2147483647, %v5865_v23 }
 0x4db   :  { %4293 = vpow2.f32 %v2850_v10  ;;  %v2852_v40 = vmul.f32 1.442695, %v2799_v47  ;;  %v5874_v46 = vadd.f32 %v2491_v30, %v5816_v25  ;;  %v2493_v54 = vpop.f32.mrb[158].mxu0  ;;  %v2943_v36 = vmul.f32 %v4282_v31, %v2942_v12 }
 0x4dc   :  { %v5879_v9 = vadd.f32 %v2493_v54, %v5812_v58  ;;  %v2495_v60 = vpop.f32.mrb[159].mxu0  ;;  %3424 = vst [vmem:[#allocation12 + $0x30] sm:$0xff] %v5871_v43  ;;  %v2952_v48 = vmul.f32 %v5865_v23, %v2951_v61  ;;  %vm2954_vm1 = vcmp.lt.f32.partialorder %v2953_v33, 0.0004427343  ;;  %v2701_v12 = vmax.f32 %v5846_v2, 0.0 }
 0x4dd   :  { %v5876_v15 = vpop.eup %4285  ;;  %4295 = vpow2.f32 %v2852_v40  ;;  %v2752_v59 = vand.u32 2147483647, %v5874_v46  ;;  %v5888_v27 = vadd.f32 %v2495_v60, %v5816_v25 }
 0x4de   :  { %v2956_v57 = vadd.f32 1.0, %v5876_v15  ;;  %3425 = vst [vmem:[#allocation12 + $0x38] sm:$0xff] %v5879_v9  ;;  %v2959_v52 = vmul.f32 -0.5, %v5876_v15  ;;  %v2962_v21 = vand.u32 2147483647, %v5876_v15 }
 0x4df   :  { %v5883_v63 = vpop.eup %4287  ;;  %v2800_v51 = vsub.f32 0.0, %v2752_v59  ;;  %v2753_v14 = vand.u32 2147483647, %v5888_v27 }
 0x4e0   :  { %4297 = vlog2.f32 %v2956_v57  ;;  %v2965_v38 = vadd.f32 1.0, %v5883_v63  ;;  %v2968_v56 = vmul.f32 -0.5, %v5883_v63  ;;  %v2960_v23 = vadd.f32 1.0, %v2959_v52 }
 0x4e1   :  { %v2499_v28 = vpop.f32.mrb[160].mxu0  ;;  %v2854_v34 = vmul.f32 1.442695, %v2800_v51  ;;  %v2801_v18 = vsub.f32 0.0, %v2753_v14  ;;  %v2971_v1 = vand.u32 2147483647, %v5883_v63 }
 0x4e2   :  { %v4290_v50 = vpop.eup %4289  ;;  %4299 = vlog2.f32 %v2965_v38  ;;  %v5902_v37 = vadd.f32 %v2499_v28, %v5812_v58  ;;  %v2501_v17 = vpop.f32.mrb[161].mxu0  ;;  %v2969_v49 = vadd.f32 1.0, %v2968_v56  ;;  %v2961_v60 = vmul.f32 %v5876_v15, %v2960_v23 }
 0x4e3   :  { %v2940_v62 = vmul.f32 0.6931472, %v4290_v50  ;;  %v2503_v45 = vpop.f32.mrb[162].mxu0  ;;  %v5908_v8 = vadd.f32 %v2501_v17, %v5816_v25  ;;  %4301 = vpow2.f32 %v2854_v34  ;;  %v2856_v40 = vmul.f32 1.442695, %v2801_v18 }
 0x4e4   :  { %v4292_v20 = vpop.eup %4291  ;;  %3426 = vst [vmem:[#allocation12 + $0x40] sm:$0xff] %v5902_v37  ;;  %v5911_v41 = vadd.f32 %v2503_v45, %v5812_v58  ;;  %v2505_v19 = vpop.f32.mrb[163].mxu0  ;;  %vm5925_vm2 = vcmp.lt.f32.partialorder %v2962_v21, 0.0004427343  ;;  %vm5932_vm3 = vcmp.lt.f32.partialorder %v2971_v1, 0.0004427343  ;;  %v2970_v52 = vmul.f32 %v5883_v63, %v2969_v49 }
 0x4e5   :  { %v5913_v22 = vpop.eup %4293  ;;  %v2946_v31 = vsel %vm5893_vm0, %v2943_v36, %v2940_v62  ;;  %v2949_v16 = vmul.f32 0.6931472, %v4292_v20  ;;  %v2754_v5 = vand.u32 2147483647, %v5908_v8  ;;  %v5940_v33 = vadd.f32 %v2505_v19, %v5816_v25  ;;  %v3516_v63 = vld [vmem:[#allocation7 + $0x10] sm:$0xff] }
 0x4e6   :  { %v3370_v55 = vadd.f32 %v2946_v31, %v2698_v24  ;;  %v2974_v10 = vadd.f32 1.0, %v5913_v22  ;;  %3427 = vst [vmem:[#allocation12 + $0x48] sm:$0xff] %v5911_v41  ;;  %v2977_v51 = vmul.f32 -0.5, %v5913_v22  ;;  %v3517_v31 = vld [vmem:[#allocation7 + $0x18] sm:$0xff]  ;;  %v2702_v1 = vmax.f32 %v5854_v44, 0.0 }
 0x4e7   :  { %v5921_v47 = vpop.eup %4295  ;;  %v2955_v6 = vsel %vm2954_vm1, %v2952_v48, %v2949_v16  ;;  %v2980_v48 = vand.u32 2147483647, %v5913_v22  ;;  %v2755_v18 = vand.u32 2147483647, %v5940_v33 }
 0x4e8   :  { %3466 = vst [vmem:[#allocation14] sm:$0xff] %v3370_v55  ;;  %v3562_v30 = vmul.f32 %v3514_v3, %v3370_v55  ;;  %v3371_v54 = vadd.f32 %v2955_v6, %v2699_v29  ;;  %4303 = vlog2.f32 %v2974_v10  ;;  %v2983_v61 = vadd.f32 1.0, %v5921_v47 }
 0x4e9   :  { %4305 = vpow2.f32 %v2856_v40  ;;  %v2509_v32 = vpop.f32.mrb[164].mxu0  ;;  %v2986_v20 = vmul.f32 -0.5, %v5921_v47  ;;  %v2978_v3 = vadd.f32 1.0, %v2977_v51  ;;  %v2803_v21 = vsub.f32 0.0, %v2755_v18 }
 0x4ea   :  { %v4298_v59 = vpop.eup %4297  ;;  %v3610_v24 = vadd.f32 %v3562_v30, %v5819_v0  ;;  %3467 = vst [vmem:[#allocation14 + $0x8] sm:$0xff] %v3371_v54  ;;  %v3563_v38 = vmul.f32 %v3515_v11, %v3371_v54  ;;  %4307 = vlog2.f32 %v2983_v61  ;;  %v2511_v2 = vpop.f32.mrb[165].mxu0  ;;  %v2802_v0 = vsub.f32 0.0, %v2754_v5 }
 0x4eb   :  { %v2958_v15 = vmul.f32 0.6931472, %v4298_v59  ;;  %v5943_v14 = vadd.f32 %v2509_v32, %v5812_v58  ;;  %v2513_v17 = vpop.f32.mrb[166].mxu0  ;;  %v5949_v56 = vadd.f32 %v2511_v2, %v5816_v25  ;;  %v2989_v10 = vand.u32 2147483647, %v5921_v47 }
 0x4ec   :  { %v4300_v28 = vpop.eup %4299  ;;  %3658 = vst [vmem:[#allocation11] sm:$0xff] %v3610_v24  ;;  %v3611_v50 = vadd.f32 %v3563_v38, %v5826_v26  ;;  %v2515_v45 = vpop.f32.mrb[167].mxu0  ;;  %v2858_v34 = vmul.f32 1.442695, %v2802_v0  ;;  %v5960_v23 = vadd.f32 %v2513_v17, %v5812_v58  ;;  %v2987_v54 = vadd.f32 1.0, %v2986_v20 }
 0x4ed   :  { %v2964_v62 = vsel %vm5925_vm2, %v2961_v60, %v2958_v15  ;;  %v2967_v36 = vmul.f32 0.6931472, %v4300_v28  ;;  %3428 = vst [vmem:[#allocation12 + $0x50] sm:$0xff] %v5943_v14  ;;  %v2756_v16 = vand.u32 2147483647, %v5949_v56  ;;  %v5962_v55 = vpop.eup %4301  ;;  %v5971_v44 = vadd.f32 %v2515_v45, %v5816_v25  ;;  %v3518_v15 = vld [vmem:[#allocation7 + $0x20] sm:$0xff] }
 0x4ee   :  { %3659 = vst [vmem:[#allocation11 + $0x8] sm:$0xff] %v3611_v50  ;;  %v3372_v26 = vadd.f32 %v2964_v62, %v2700_v13  ;;  %4309 = vpow2.f32 %v2858_v34  ;;  %3429 = vst [vmem:[#allocation12 + $0x58] sm:$0xff] %v5960_v23  ;;  %v2992_v5 = vadd.f32 1.0, %v5962_v55  ;;  %vm2981_vm4 = vcmp.lt.f32.partialorder %v2980_v48, 0.0004427343 }
 0x4ef   :  { %v2973_v19 = vsel %vm5932_vm3, %v2970_v52, %v2967_v36  ;;  %v2804_v6 = vsub.f32 0.0, %v2756_v16  ;;  %v2860_v24 = vmul.f32 1.442695, %v2803_v21  ;;  %v2704_v0 = vmax.f32 %v5874_v46, 0.0  ;;  %v3519_v36 = vld [vmem:[#allocation7 + $0x28] sm:$0xff] }
 0x4f0   :  { %3468 = vst [vmem:[#allocation14 + $0x10] sm:$0xff] %v3372_v26  ;;  %v3564_v35 = vmul.f32 %v3516_v63, %v3372_v26  ;;  %v3373_v13 = vadd.f32 %v2973_v19, %v2701_v12  ;;  %v2979_v12 = vmul.f32 %v5913_v22, %v2978_v3  ;;  %4311 = vlog2.f32 %v2992_v5 }
 0x4f1   :  { %v2519_v11 = vpop.f32.mrb[168].mxu0  ;;  %v2703_v22 = vmax.f32 %v5862_v42, 0.0  ;;  %v2862_v51 = vmul.f32 1.442695, %v2804_v6  ;;  %vm2990_vm5 = vcmp.lt.f32.partialorder %v2989_v10, 0.0004427343 }
 0x4f2   :  { %v4304_v49 = vpop.eup %4303  ;;  %v3612_v40 = vadd.f32 %v3564_v35, %v5835_v7  ;;  %3469 = vst [vmem:[#allocation14 + $0x18] sm:$0xff] %v3373_v13  ;;  %v3565_v30 = vmul.f32 %v3517_v31, %v3373_v13  ;;  %v2521_v60 = vpop.f32.mrb[169].mxu0  ;;  %v5974_v61 = vadd.f32 %v2519_v11, %v5812_v58  ;;  %v2995_v17 = vmul.f32 -0.5, %v5962_v55 }
 0x4f3   :  { %v2976_v57 = vmul.f32 0.6931472, %v4304_v49  ;;  %v5976_v59 = vpop.eup %4305  ;;  %v2523_v38 = vpop.f32.mrb[170].mxu0  ;;  %v2757_v62 = vand.u32 2147483647, %v5971_v44  ;;  %v2705_v48 = vmax.f32 %v5888_v27, 0.0  ;;  %v5992_v18 = vadd.f32 %v2521_v60, %v5816_v25 }
 0x4f4   :  { %3660 = vst [vmem:[#allocation11 + $0x10] sm:$0xff] %v3612_v40  ;;  %v3613_v7 = vadd.f32 %v3565_v30, %v5842_v4  ;;  %v4308_v29 = vpop.eup %4307  ;;  %v3001_v52 = vadd.f32 1.0, %v5976_v59  ;;  %3430 = vst [vmem:[#allocation12 + $0x60] sm:$0xff] %v5974_v61  ;;  %v2525_v2 = vpop.f32.mrb[171].mxu0  ;;  %v2988_v4 = vmul.f32 %v5921_v47, %v2987_v54  ;;  %v3004_v26 = vmul.f32 -0.5, %v5976_v59 }
 0x4f5   :  { %v2982_v32 = vsel %vm2981_vm4, %v2979_v12, %v2976_v57  ;;  %v2985_v50 = vmul.f32 0.6931472, %v4308_v29  ;;  %v2805_v47 = vsub.f32 0.0, %v2757_v62  ;;  %v5995_v19 = vadd.f32 %v2523_v38, %v5812_v58 }
 0x4f6   :  { %3661 = vst [vmem:[#allocation11 + $0x18] sm:$0xff] %v3613_v7  ;;  %v3374_v28 = vadd.f32 %v2982_v32, %v2702_v1  ;;  %4313 = vlog2.f32 %v3001_v52  ;;  %v5998_v31 = vadd.f32 %v2525_v2, %v5816_v25  ;;  %v2996_v35 = vadd.f32 1.0, %v2995_v17  ;;  %v3520_v52 = vld [vmem:[#allocation7 + $0x30] sm:$0xff] }
 0x4f7   :  { %v2991_v63 = vsel %vm2990_vm5, %v2988_v4, %v2985_v50  ;;  %4315 = vpow2.f32 %v2860_v24  ;;  %v2706_v13 = vmax.f32 %v5908_v8, 0.0  ;;  %v2864_v10 = vmul.f32 1.442695, %v2805_v47  ;;  %3431 = vst [vmem:[#allocation12 + $0x68] sm:$0xff] %v5995_v19 }
 0x4f8   :  { %3470 = vst [vmem:[#allocation14 + $0x20] sm:$0xff] %v3374_v28  ;;  %v3566_v42 = vmul.f32 %v3518_v15, %v3374_v28  ;;  %v3375_v45 = vadd.f32 %v2991_v63, %v2703_v22  ;;  %4317 = vpow2.f32 %v2862_v51  ;;  %v5988_v46 = vpop.eup %4309  ;;  %v2758_v6 = vand.u32 2147483647, %v5992_v18 }
 0x4f9   :  { %v2529_v20 = vpop.f32.mrb[172].mxu0  ;;  %v3010_v21 = vadd.f32 1.0, %v5988_v46  ;;  %v3005_v49 = vadd.f32 1.0, %v3004_v26  ;;  %v3007_v40 = vand.u32 2147483647, %v5976_v59  ;;  %v2997_v7 = vmul.f32 %v5962_v55, %v2996_v35 }
 0x4fa   :  { %v3614_v34 = vadd.f32 %v3566_v42, %v5851_v53  ;;  %v2531_v3 = vpop.f32.mrb[173].mxu0  ;;  %3471 = vst [vmem:[#allocation14 + $0x28] sm:$0xff] %v3375_v45  ;;  %v3567_v16 = vmul.f32 %v3519_v36, %v3375_v45  ;;  %v2998_v53 = vand.u32 2147483647, %v5962_v55  ;;  %v4312_v54 = vpop.eup %4311  ;;  %v2806_v5 = vsub.f32 0.0, %v2758_v6 }
 0x4fb   :  { %v2533_v1 = vpop.f32.mrb[174].mxu0  ;;  %4319 = vlog2.f32 %v3010_v21  ;;  %v2759_v60 = vand.u32 2147483647, %v5998_v31  ;;  %v6009_v57 = vadd.f32 %v2529_v20, %v5812_v58  ;;  %v2994_v12 = vmul.f32 0.6931472, %v4312_v54 }
 0x4fc   :  { %3662 = vst [vmem:[#allocation11 + $0x20] sm:$0xff] %v3614_v34  ;;  %v3615_v11 = vadd.f32 %v3567_v16, %v5858_v39  ;;  %v2535_v30 = vpop.f32.mrb[175].mxu0  ;;  %4321 = vpow2.f32 %v2864_v10  ;;  %v6013_v24 = vadd.f32 %v2531_v3, %v5816_v25  ;;  %v6016_v39 = vadd.f32 %v2533_v1, %v5812_v58 }
 0x4fd   :  { %vm2999_vm6 = vcmp.lt.f32.partialorder %v2998_v53, 0.0004427343  ;;  %v3013_v38 = vmul.f32 -0.5, %v5988_v46  ;;  %v2866_v29 = vmul.f32 1.442695, %v2806_v5  ;;  %v2807_v32 = vsub.f32 0.0, %v2759_v60 }
 0x4fe   :  { %3663 = vst [vmem:[#allocation11 + $0x28] sm:$0xff] %v3615_v11  ;;  %3432 = vst [vmem:[#allocation12 + $0x70] sm:$0xff] %v6009_v57  ;;  %v3000_v22 = vsel %vm2999_vm6, %v2997_v7, %v2994_v12  ;;  %v3006_v51 = vmul.f32 %v5976_v59, %v3005_v49  ;;  %vm6021_vm7 = vcmp.lt.f32.partialorder %v3007_v40, 0.0004427343  ;;  %v2760_v2 = vand.u32 2147483647, %v6013_v24 }
 0x4ff   :  { %3433 = vst [vmem:[#allocation12 + $0x78] sm:$0xff] %v6016_v39  ;;  %v3376_v4 = vadd.f32 %v3000_v22, %v2704_v0  ;;  %v3016_v62 = vand.u32 2147483647, %v5988_v46  ;;  %4323 = vpow2.f32 %v2866_v29  ;;  %v2707_v59 = vmax.f32 %v5940_v33, 0.0  ;;  %v3521_v0 = vld [vmem:[#allocation7 + $0x38] sm:$0xff] }
 0x500   :  { %v4314_v15 = vpop.eup %4313  ;;  %v2868_v45 = vmul.f32 1.442695, %v2807_v32  ;;  %v2808_v26 = vsub.f32 0.0, %v2760_v2  ;;  %v3014_v3 = vadd.f32 1.0, %v3013_v38  ;;  %v2708_v6 = vmax.f32 %v5949_v56, 0.0 }
 0x501   :  { %v2539_v28 = vpop.f32.mrb[176].mxu0  ;;  %v6027_v50 = vpop.eup %4315  ;;  %v3003_v17 = vmul.f32 0.6931472, %v4314_v15  ;;  %3472 = vst [vmem:[#allocation14 + $0x30] sm:$0xff] %v3376_v4  ;;  %v3568_v20 = vmul.f32 %v3520_v52, %v3376_v4  ;;  %v6044_v11 = vadd.f32 %v2535_v30, %v5816_v25  ;;  %v2709_v54 = vmax.f32 %v5971_v44, 0.0  ;;  %v3522_v15 = vld [vmem:[#allocation7 + $0x40] sm:$0xff] }
 0x502   :  { %v2541_v42 = vpop.f32.mrb[177].mxu0  ;;  %v6030_v63 = vpop.eup %4317  ;;  %v3019_v36 = vadd.f32 1.0, %v6027_v50  ;;  %v3022_v1 = vmul.f32 -0.5, %v6027_v50  ;;  %v2870_v27 = vmul.f32 1.442695, %v2808_v26  ;;  %v3015_v60 = vmul.f32 %v5988_v46, %v3014_v3 }
 0x503   :  { %v2543_v47 = vpop.f32.mrb[178].mxu0  ;;  %v3009_v34 = vsel %vm6021_vm7, %v3006_v51, %v3003_v17  ;;  %v3028_v16 = vadd.f32 1.0, %v6030_v63  ;;  %v3031_v53 = vmul.f32 -0.5, %v6030_v63  ;;  %v3616_v10 = vadd.f32 %v3568_v20, %v5871_v43 }
 0x504   :  { %v2545_v35 = vpop.f32.mrb[179].mxu0  ;;  %v3377_v21 = vadd.f32 %v3009_v34, %v2705_v48  ;;  %4325 = vlog2.f32 %v3019_v36  ;;  %vm3017_vm8 = vcmp.lt.f32.partialorder %v3016_v62, 0.0004427343  ;;  %v3025_v43 = vand.u32 2147483647, %v6027_v50 }
 0x505   :  { %4327 = vlog2.f32 %v3028_v16  ;;  %v4320_v49 = vpop.eup %4319  ;;  %3664 = vst [vmem:[#allocation11 + $0x30] sm:$0xff] %v3616_v10  ;;  %v3023_v30 = vadd.f32 1.0, %v3022_v1  ;;  %v3032_v7 = vadd.f32 1.0, %v3031_v53  ;;  %v2761_v22 = vand.u32 2147483647, %v6044_v11 }
 0x506   :  { %3473 = vst [vmem:[#allocation14 + $0x38] sm:$0xff] %v3377_v21  ;;  %v3569_v40 = vmul.f32 %v3521_v0, %v3377_v21  ;;  %4329 = vpow2.f32 %v2868_v45  ;;  %v6047_v48 = vpop.eup %4321  ;;  %v3012_v5 = vmul.f32 0.6931472, %v4320_v49  ;;  %v6055_v52 = vadd.f32 %v2539_v28, %v5812_v58 }
 0x507   :  { %v3037_v38 = vadd.f32 1.0, %v6047_v48  ;;  %4331 = vpow2.f32 %v2870_v27  ;;  %v2710_v55 = vmax.f32 %v5992_v18, 0.0  ;;  %v2809_v17 = vsub.f32 0.0, %v2761_v22 }
 0x508   :  { %v3617_v12 = vadd.f32 %v3569_v40, %v5879_v9  ;;  %v3018_v32 = vsel %vm3017_vm8, %v3015_v60, %v3012_v5  ;;  %v3040_v9 = vmul.f32 -0.5, %v6047_v48  ;;  %3434 = vst [vmem:[#allocation12 + $0x80] sm:$0xff] %v6055_v52  ;;  %v6069_v28 = vadd.f32 %v2541_v42, %v5816_v25 }
 0x509   :  { %v2549_v29 = vpop.f32.mrb[180].mxu0  ;;  %v3378_v46 = vadd.f32 %v3018_v32, %v2706_v13  ;;  %4333 = vlog2.f32 %v3037_v38  ;;  %v6065_v4 = vpop.eup %4323  ;;  %v6072_v62 = vadd.f32 %v2543_v47, %v5812_v58  ;;  %v6075_v8 = vadd.f32 %v2545_v35, %v5816_v25 }
 0x50a   :  { %v6057_v51 = vpop.f32.mrb[181].mxu0  ;;  %3665 = vst [vmem:[#allocation11 + $0x38] sm:$0xff] %v3617_v12  ;;  %vm6079_vm9 = vcmp.lt.f32.partialorder %v3025_v43, 0.0004427343  ;;  %v3046_v26 = vadd.f32 1.0, %v6065_v4  ;;  %v2711_v20 = vmax.f32 %v5998_v31, 0.0  ;;  %v3024_v42 = vmul.f32 %v6027_v50, %v3023_v30 }
 0x50b   :  { %v6063_v2 = vpop.f32.mrb[182].mxu0  ;;  %3474 = vst [vmem:[#allocation14 + $0x40] sm:$0xff] %v3378_v46  ;;  %v3570_v36 = vmul.f32 %v3522_v15, %v3378_v46  ;;  %v3033_v47 = vmul.f32 %v6030_v63, %v3032_v7  ;;  %v3034_v34 = vand.u32 2147483647, %v6030_v63  ;;  %v2872_v0 = vmul.f32 1.442695, %v2809_v17 }
 0x50c   :  { %v6077_v13 = vpop.f32.mrb[183].mxu0  ;;  %3435 = vst [vmem:[#allocation12 + $0x88] sm:$0xff] %v6072_v62  ;;  %v3043_v35 = vand.u32 2147483647, %v6047_v48  ;;  %4335 = vlog2.f32 %v3046_v26  ;;  %v2762_v21 = vand.u32 2147483647, %v6069_v28 }
 0x50d   :  { %v3618_v16 = vadd.f32 %v3570_v36, %v5902_v37  ;;  %v3041_v10 = vadd.f32 1.0, %v3040_v9  ;;  %4337 = vpow2.f32 %v2872_v0  ;;  %v2763_v50 = vand.u32 2147483647, %v6075_v8  ;;  %v3523_v43 = vld [vmem:[#allocation7 + $0x48] sm:$0xff]  ;;  %v3524_v15 = vld [vmem:[#allocation7 + $0x50] sm:$0xff] }
 0x50e   :  { %v4326_v3 = vpop.eup %4325  ;;  %v3049_v40 = vmul.f32 -0.5, %v6065_v4  ;;  %v2810_v27 = vsub.f32 0.0, %v2762_v21  ;;  %v6097_v37 = vadd.f32 %v2549_v29, %v5812_v58  ;;  %vm3035_vm10 = vcmp.lt.f32.partialorder %v3034_v34, 0.0004427343 }
 0x50f   :  { %v4328_v1 = vpop.eup %4327  ;;  %v3021_v53 = vmul.f32 0.6931472, %v4326_v3  ;;  %3666 = vst [vmem:[#allocation11 + $0x40] sm:$0xff] %v3618_v16  ;;  %v2712_v30 = vmax.f32 %v6013_v24, 0.0  ;;  %vm6109_vm11 = vcmp.lt.f32.partialorder %v3043_v35, 0.0004427343  ;;  %v3042_v36 = vmul.f32 %v6047_v48, %v3041_v10 }
 0x510   :  { %v6093_v49 = vpop.eup %4329  ;;  %v3030_v63 = vmul.f32 0.6931472, %v4328_v1  ;;  %v2874_v22 = vmul.f32 1.442695, %v2810_v27  ;;  %3436 = vst [vmem:[#allocation12 + $0x90] sm:$0xff] %v6097_v37  ;;  %v2811_v33 = vsub.f32 0.0, %v2763_v50  ;;  %v6134_v10 = vadd.f32 %v6057_v51, %v5816_v25 }
 0x511   :  { %v6099_v5 = vpop.f32.mrb[184].mxu0  ;;  %v3027_v60 = vsel %vm6079_vm9, %v3024_v42, %v3021_v53  ;;  %v3055_v12 = vadd.f32 1.0, %v6093_v49  ;;  %v6116_v9 = vpop.eup %4331  ;;  %v3050_v42 = vadd.f32 1.0, %v3049_v40  ;;  %v3058_v56 = vmul.f32 -0.5, %v6093_v49  ;;  %v3525_v1 = vld [vmem:[#allocation7 + $0x58] sm:$0xff] }
 0x512   :  { %v6105_v7 = vpop.f32.mrb[185].mxu0  ;;  %v3379_v38 = vadd.f32 %v3027_v60, %v2707_v59  ;;  %v3036_v32 = vsel %vm3035_vm10, %v3033_v47, %v3030_v63  ;;  %v3052_v47 = vand.u32 2147483647, %v6065_v4  ;;  %v3064_v34 = vadd.f32 1.0, %v6116_v9 }
 0x513   :  { %v6114_v46 = vpop.f32.mrb[186].mxu0  ;;  %v3380_v17 = vadd.f32 %v3036_v32, %v2708_v6  ;;  %4339 = vlog2.f32 %v3055_v12  ;;  %v4334_v45 = vpop.eup %4333  ;;  %v3061_v48 = vand.u32 2147483647, %v6093_v49  ;;  %v3067_v16 = vmul.f32 -0.5, %v6116_v9  ;;  %v3526_v32 = vld [vmem:[#allocation7 + $0x60] sm:$0xff] }
 0x514   :  { %v6121_v59 = vpop.f32.mrb[187].mxu0  ;;  %3475 = vst [vmem:[#allocation14 + $0x48] sm:$0xff] %v3379_v38  ;;  %v3571_v26 = vmul.f32 %v3523_v43, %v3379_v38  ;;  %v3039_v3 = vmul.f32 0.6931472, %v4334_v45  ;;  %4341 = vpow2.f32 %v2874_v22  ;;  %v2876_v53 = vmul.f32 1.442695, %v2811_v33 }
 0x515   :  { %3476 = vst [vmem:[#allocation14 + $0x50] sm:$0xff] %v3380_v17  ;;  %v3572_v0 = vmul.f32 %v3524_v15, %v3380_v17  ;;  %4343 = vlog2.f32 %v3064_v34  ;;  %v3051_v63 = vmul.f32 %v6065_v4, %v3050_v42  ;;  %v6141_v40 = vadd.f32 %v6063_v2, %v5812_v58 }
 0x516   :  { %v3619_v6 = vadd.f32 %v3571_v26, %v5911_v41  ;;  %v3045_v21 = vsel %vm6109_vm11, %v3042_v36, %v3039_v3  ;;  %v4336_v50 = vpop.eup %4335  ;;  %v3059_v43 = vadd.f32 1.0, %v3058_v56  ;;  %4345 = vpow2.f32 %v2876_v53 }
 0x517   :  { %v3620_v35 = vadd.f32 %v3572_v0, %v5943_v14  ;;  %v3381_v41 = vadd.f32 %v3045_v21, %v2709_v54  ;;  %v6145_v14 = vadd.f32 %v6077_v13, %v5816_v25  ;;  %v6149_v60 = vpop.eup %4337  ;;  %v3048_v51 = vmul.f32 0.6931472, %v4336_v50  ;;  %3437 = vst [vmem:[#allocation12 + $0x98] sm:$0xff] %v6141_v40 }
 0x518   :  { %3667 = vst [vmem:[#allocation11 + $0x48] sm:$0xff] %v3619_v6  ;;  %v2764_v44 = vand.u32 2147483647, %v6134_v10  ;;  %vm3053_vm12 = vcmp.lt.f32.partialorder %v3052_v47, 0.0004427343  ;;  %v3073_v13 = vadd.f32 1.0, %v6149_v60  ;;  %v3060_v42 = vmul.f32 %v6093_v49, %v3059_v43 }
 0x519   :  { %v6147_v27 = vpop.f32.mrb[188].mxu0  ;;  %3668 = vst [vmem:[#allocation11 + $0x50] sm:$0xff] %v3620_v35  ;;  %3477 = vst [vmem:[#allocation14 + $0x58] sm:$0xff] %v3381_v41  ;;  %v3573_v4 = vmul.f32 %v3525_v1, %v3381_v41  ;;  %vm6154_vm13 = vcmp.lt.f32.partialorder %v3061_v48, 0.0004427343  ;;  %v3054_v38 = vsel %vm3053_vm12, %v3051_v63, %v3048_v51  ;;  %v3068_v15 = vadd.f32 1.0, %v3067_v16 }
 0x51a   :  { %v6152_v54 = vpop.f32.mrb[189].mxu0  ;;  %v2812_v29 = vsub.f32 0.0, %v2764_v44  ;;  %v2765_v22 = vand.u32 2147483647, %v6145_v14  ;;  %v3382_v33 = vadd.f32 %v3054_v38, %v2710_v55  ;;  %v3070_v45 = vand.u32 2147483647, %v6116_v9 }
 0x51b   :  { %v6160_v12 = vpop.f32.mrb[190].mxu0  ;;  %v3621_v36 = vadd.f32 %v3573_v4, %v5960_v23  ;;  %4347 = vlog2.f32 %v3073_v13  ;;  %v6172_v0 = vadd.f32 %v6099_v5, %v5812_v58  ;;  %v3076_v23 = vmul.f32 -0.5, %v6149_v60  ;;  %v3528_v44 = vld [vmem:[#allocation7 + $0x70] sm:$0xff] }
 0x51c   :  { %v6163_v17 = vpop.f32.mrb[191].mxu0  ;;  %v2878_v47 = vmul.f32 1.442695, %v2812_v29  ;;  %v2813_v34 = vsub.f32 0.0, %v2765_v22  ;;  %3478 = vst [vmem:[#allocation14 + $0x60] sm:$0xff] %v3382_v33  ;;  %v3574_v3 = vmul.f32 %v3526_v32, %v3382_v33  ;;  %v6177_v18 = vadd.f32 %v6105_v7, %v5816_v25  ;;  %v3527_v7 = vld [vmem:[#allocation7 + $0x68] sm:$0xff] }
 0x51d   :  { %v4340_v26 = vpop.eup %4339  ;;  %3669 = vst [vmem:[#allocation11 + $0x58] sm:$0xff] %v3621_v36  ;;  %v3069_v49 = vmul.f32 %v6116_v9, %v3068_v15  ;;  %3438 = vst [vmem:[#allocation12 + $0xa0] sm:$0xff] %v6172_v0  ;;  %v6185_v5 = vadd.f32 %v6114_v46, %v5812_v58  ;;  %v3079_v21 = vand.u32 2147483647, %v6149_v60  ;;  %vm3071_vm14 = vcmp.lt.f32.partialorder %v3070_v45, 0.0004427343 }
 0x51e   :  { %v3057_v56 = vmul.f32 0.6931472, %v4340_v26  ;;  %v6179_v55 = vpop.eup %4341  ;;  %4349 = vpow2.f32 %v2878_v47  ;;  %v2880_v6 = vmul.f32 1.442695, %v2813_v34  ;;  %v3622_v16 = vadd.f32 %v3574_v3, %v5974_v61 }
 0x51f   :  { %v4344_v48 = vpop.eup %4343  ;;  %v3082_v1 = vadd.f32 1.0, %v6179_v55  ;;  %3439 = vst [vmem:[#allocation12 + $0xa8] sm:$0xff] %v6185_v5  ;;  %v6199_v61 = vadd.f32 %v6121_v59, %v5816_v25  ;;  %v3077_v41 = vadd.f32 1.0, %v3076_v23  ;;  %v2766_v63 = vand.u32 2147483647, %v6177_v18 }
 0x520   :  { %v3063_v35 = vsel %vm6154_vm13, %v3060_v42, %v3057_v56  ;;  %v3066_v50 = vmul.f32 0.6931472, %v4344_v48  ;;  %4351 = vpow2.f32 %v2880_v6  ;;  %3670 = vst [vmem:[#allocation11 + $0x60] sm:$0xff] %v3622_v16  ;;  %v6206_v31 = vpop.eup %4345  ;;  %v2713_v4 = vmax.f32 %v6044_v11, 0.0 }
 0x521   :  { %v6192_v9 = vpop.f32.mrb[192].mxu0  ;;  %v3383_v53 = vadd.f32 %v3063_v35, %v2711_v20  ;;  %4353 = vlog2.f32 %v3082_v1  ;;  %vm6213_vm15 = vcmp.lt.f32.partialorder %v3079_v21, 0.0004427343  ;;  %v2714_v38 = vmax.f32 %v6069_v28, 0.0 }
 0x522   :  { %v6201_v46 = vpop.f32.mrb[193].mxu0  ;;  %v3072_v43 = vsel %vm3071_vm14, %v3069_v49, %v3066_v50  ;;  %v3091_v32 = vadd.f32 1.0, %v6206_v31  ;;  %v3085_v29 = vmul.f32 -0.5, %v6179_v55  ;;  %v2814_v22 = vsub.f32 0.0, %v2766_v63  ;;  %v3529_v49 = vld [vmem:[#allocation7 + $0x78] sm:$0xff] }
 0x523   :  { %v6204_v51 = vpop.f32.mrb[194].mxu0  ;;  %3479 = vst [vmem:[#allocation14 + $0x68] sm:$0xff] %v3383_v53  ;;  %v3575_v20 = vmul.f32 %v3527_v7, %v3383_v53  ;;  %v3384_v2 = vadd.f32 %v3072_v43, %v2712_v30  ;;  %v2767_v11 = vand.u32 2147483647, %v6199_v61  ;;  %v3078_v24 = vmul.f32 %v6149_v60, %v3077_v41 }
 0x524   :  { %v6209_v59 = vpop.f32.mrb[195].mxu0  ;;  %4355 = vlog2.f32 %v3091_v32  ;;  %v6225_v30 = vadd.f32 %v6147_v27, %v5812_v58  ;;  %v3094_v26 = vmul.f32 -0.5, %v6206_v31  ;;  %v6230_v42 = vadd.f32 %v6152_v54, %v5816_v25 }
 0x525   :  { %v3623_v15 = vadd.f32 %v3575_v20, %v5995_v19  ;;  %v4348_v36 = vpop.eup %4347  ;;  %3480 = vst [vmem:[#allocation14 + $0x70] sm:$0xff] %v3384_v2  ;;  %v3576_v33 = vmul.f32 %v3528_v44, %v3384_v2  ;;  %v2882_v19 = vmul.f32 1.442695, %v2814_v22  ;;  %v3088_v34 = vand.u32 2147483647, %v6179_v55  ;;  %v3530_v22 = vld [vmem:[#allocation7 + $0x80] sm:$0xff] }
 0x526   :  { %v3075_v45 = vmul.f32 0.6931472, %v4348_v36  ;;  %v2815_v3 = vsub.f32 0.0, %v2767_v11  ;;  %3440 = vst [vmem:[#allocation12 + $0xb0] sm:$0xff] %v6225_v30  ;;  %v6237_v27 = vadd.f32 %v6160_v12, %v5812_v58  ;;  %v3086_v54 = vadd.f32 1.0, %v3085_v29 }
 0x527   :  { %3671 = vst [vmem:[#allocation11 + $0x68] sm:$0xff] %v3623_v15  ;;  %v3624_v47 = vadd.f32 %v3576_v33, %v6009_v57  ;;  %4357 = vpow2.f32 %v2882_v19  ;;  %v2768_v57 = vand.u32 2147483647, %v6230_v42  ;;  %v2715_v16 = vmax.f32 %v6075_v8, 0.0 }
 0x528   :  { %v6239_v56 = vpop.eup %4349  ;;  %v3081_v23 = vsel %vm6213_vm15, %v3078_v24, %v3075_v45  ;;  %v3097_v12 = vand.u32 2147483647, %v6206_v31  ;;  %3441 = vst [vmem:[#allocation12 + $0xb8] sm:$0xff] %v6237_v27  ;;  %v3095_v1 = vadd.f32 1.0, %v3094_v26  ;;  %v2884_v53 = vmul.f32 1.442695, %v2815_v3 }
 0x529   :  { %v2589_v60 = vpop.f32.mrb[196].mxu0  ;;  %3672 = vst [vmem:[#allocation11 + $0x70] sm:$0xff] %v3624_v47  ;;  %v3385_v48 = vadd.f32 %v3081_v23, %v2713_v4  ;;  %v3100_v35 = vadd.f32 1.0, %v6239_v56  ;;  %v2816_v50 = vsub.f32 0.0, %v2768_v57  ;;  %v6256_v41 = vadd.f32 %v6192_v9, %v5812_v58 }
 0x52a   :  { %v6244_v6 = vpop.f32.mrb[197].mxu0  ;;  %v6252_v21 = vpop.eup %4351  ;;  %v2716_v43 = vmax.f32 %v6134_v10, 0.0  ;;  %v6263_v44 = vadd.f32 %v6163_v17, %v5816_v25  ;;  %v3087_v2 = vmul.f32 %v6179_v55, %v3086_v54  ;;  %vm3089_vm0 = vcmp.lt.f32.partialorder %v3088_v34, 0.0004427343 }
 0x52b   :  { %v6250_v7 = vpop.f32.mrb[198].mxu0  ;;  %v4354_v8 = vpop.eup %4353  ;;  %3481 = vst [vmem:[#allocation14 + $0x78] sm:$0xff] %v3385_v48  ;;  %v3577_v20 = vmul.f32 %v3529_v49, %v3385_v48  ;;  %4359 = vlog2.f32 %v3100_v35  ;;  %v3109_v13 = vadd.f32 1.0, %v6252_v21  ;;  %3442 = vst [vmem:[#allocation12 + $0xc0] sm:$0xff] %v6256_v41  ;;  %vm6269_vm1 = vcmp.lt.f32.partialorder %v3097_v12, 0.0004427343 }
 0x52c   :  { %v6258_v63 = vpop.f32.mrb[199].mxu0  ;;  %v3084_v4 = vmul.f32 0.6931472, %v4354_v8  ;;  %4361 = vpow2.f32 %v2884_v53  ;;  %v2886_v15 = vmul.f32 1.442695, %v2816_v50  ;;  %v3096_v17 = vmul.f32 %v6206_v31, %v3095_v1  ;;  %v3531_v49 = vld [vmem:[#allocation7 + $0x88] sm:$0xff] }
 0x52d   :  { %v3625_v9 = vadd.f32 %v3577_v20, %v6016_v39  ;;  %v3103_v11 = vmul.f32 -0.5, %v6239_v56  ;;  %4363 = vlog2.f32 %v3109_v13  ;;  %v3112_v39 = vmul.f32 -0.5, %v6252_v21 }
 0x52e   :  { %v3090_v29 = vsel %vm3089_vm0, %v3087_v2, %v3084_v4  ;;  %v4356_v55 = vpop.eup %4355  ;;  %4365 = vpow2.f32 %v2886_v15  ;;  %v2769_v33 = vand.u32 2147483647, %v6263_v44  ;;  %v3106_v26 = vand.u32 2147483647, %v6239_v56 }
 0x52f   :  { %3673 = vst [vmem:[#allocation11 + $0x78] sm:$0xff] %v3625_v9  ;;  %v3386_v36 = vadd.f32 %v3090_v29, %v2714_v38  ;;  %v3093_v45 = vmul.f32 0.6931472, %v4356_v55  ;;  %v6284_v31 = vadd.f32 %v6201_v46, %v5816_v25  ;;  %v6288_v19 = vadd.f32 %v6204_v51, %v5812_v58 }
 0x530   :  { %v2817_v47 = vsub.f32 0.0, %v2769_v33  ;;  %v6294_v34 = vadd.f32 %v6209_v59, %v5816_v25  ;;  %v6297_v3 = vadd.f32 %v2589_v60, %v5812_v58  ;;  %v3104_v54 = vadd.f32 1.0, %v3103_v11 }
 0x531   :  { %v6279_v24 = vpop.f32.mrb[200].mxu0  ;;  %3482 = vst [vmem:[#allocation14 + $0x80] sm:$0xff] %v3386_v36  ;;  %v3578_v38 = vmul.f32 %v3530_v22, %v3386_v36  ;;  %v6301_v46 = vpop.eup %4357  ;;  %v3099_v51 = vsel %vm6269_vm1, %v3096_v17, %v3093_v45  ;;  %v2717_v57 = vmax.f32 %v6145_v14, 0.0  ;;  %v2770_v48 = vand.u32 2147483647, %v6284_v31  ;;  %3443 = vst [vmem:[#allocation12 + $0xc8] sm:$0xff] %v6288_v19 }
 0x532   :  { %v6290_v28 = vpop.f32.mrb[201].mxu0  ;;  %v3387_v12 = vadd.f32 %v3099_v51, %v2715_v16  ;;  %v3113_v35 = vadd.f32 1.0, %v3112_v39  ;;  %v3118_v1 = vadd.f32 1.0, %v6301_v46  ;;  %3444 = vst [vmem:[#allocation12 + $0xd0] sm:$0xff] %v6297_v3  ;;  %vm6313_vm2 = vcmp.lt.f32.partialorder %v3106_v26, 0.0004427343 }
 0x533   :  { %v6299_v23 = vpop.f32.mrb[202].mxu0  ;;  %v3626_v60 = vadd.f32 %v3578_v38, %v6055_v52  ;;  %v2718_v14 = vmax.f32 %v6177_v18, 0.0  ;;  %v2888_v50 = vmul.f32 1.442695, %v2817_v47  ;;  %v2818_v8 = vsub.f32 0.0, %v2770_v48  ;;  %v3532_v39 = vld [vmem:[#allocation7 + $0x90] sm:$0xff] }
 0x534   :  { %v6308_v59 = vpop.f32.mrb[203].mxu0  ;;  %3483 = vst [vmem:[#allocation14 + $0x88] sm:$0xff] %v3387_v12  ;;  %v3579_v4 = vmul.f32 %v3531_v49, %v3387_v12  ;;  %v3115_v52 = vand.u32 2147483647, %v6252_v21  ;;  %4367 = vlog2.f32 %v3118_v1  ;;  %v2771_v16 = vand.u32 2147483647, %v6294_v34 }
 0x535   :  { %v4360_v20 = vpop.eup %4359  ;;  %3674 = vst [vmem:[#allocation11 + $0x80] sm:$0xff] %v3626_v60  ;;  %v3105_v13 = vmul.f32 %v6239_v56, %v3104_v54  ;;  %4369 = vpow2.f32 %v2888_v50  ;;  %v2890_v9 = vmul.f32 1.442695, %v2818_v8  ;;  %v3114_v29 = vmul.f32 %v6252_v21, %v3113_v35  ;;  %v3533_v12 = vld [vmem:[#allocation7 + $0x98] sm:$0xff] }
 0x536   :  { %v3102_v2 = vmul.f32 0.6931472, %v4360_v20  ;;  %v6321_v32 = vpop.eup %4361  ;;  %v3627_v15 = vadd.f32 %v3579_v4, %v6072_v62  ;;  %v3121_v22 = vmul.f32 -0.5, %v6301_v46  ;;  %v2819_v17 = vsub.f32 0.0, %v2771_v16 }
 0x537   :  { %v4364_v55 = vpop.eup %4363  ;;  %v3124_v56 = vand.u32 2147483647, %v6301_v46  ;;  %v3127_v33 = vadd.f32 1.0, %v6321_v32  ;;  %v6334_v45 = vadd.f32 %v6244_v6, %v5816_v25  ;;  %4371 = vpow2.f32 %v2890_v9 }
 0x538   :  { %v3108_v36 = vsel %vm6313_vm2, %v3105_v13, %v3102_v2  ;;  %v6338_v21 = vpop.eup %4365  ;;  %3675 = vst [vmem:[#allocation11 + $0x88] sm:$0xff] %v3627_v15  ;;  %v3111_v38 = vmul.f32 0.6931472, %v4364_v55  ;;  %v2892_v47 = vmul.f32 1.442695, %v2819_v17  ;;  %v2719_v49 = vmax.f32 %v6199_v61, 0.0 }
 0x539   :  { %v6326_v11 = vpop.f32.mrb[204].mxu0  ;;  %v3388_v26 = vadd.f32 %v3108_v36, %v2716_v43  ;;  %vm3116_vm3 = vcmp.lt.f32.partialorder %v3115_v52, 0.0004427343  ;;  %4373 = vlog2.f32 %v3127_v33  ;;  %v3136_v6 = vadd.f32 1.0, %v6338_v21 }
 0x53a   :  { %v6336_v62 = vpop.f32.mrb[205].mxu0  ;;  %v3117_v60 = vsel %vm3116_vm3, %v3114_v29, %v3111_v38  ;;  %v3122_v35 = vadd.f32 1.0, %v3121_v22  ;;  %v2720_v10 = vmax.f32 %v6230_v42, 0.0  ;;  %vm6349_vm4 = vcmp.lt.f32.partialorder %v3124_v56, 0.0004427343 }
 0x53b   :  { %v6342_v51 = vpop.f32.mrb[206].mxu0  ;;  %3484 = vst [vmem:[#allocation14 + $0x90] sm:$0xff] %v3388_v26  ;;  %v3580_v48 = vmul.f32 %v3532_v39, %v3388_v26  ;;  %v3389_v43 = vadd.f32 %v3117_v60, %v2717_v57  ;;  %4375 = vlog2.f32 %v3136_v6  ;;  %v2772_v53 = vand.u32 2147483647, %v6334_v45 }
 0x53c   :  { %v6346_v54 = vpop.f32.mrb[207].mxu0  ;;  %v3130_v8 = vmul.f32 -0.5, %v6321_v32  ;;  %v3139_v20 = vmul.f32 -0.5, %v6338_v21  ;;  %4377 = vpow2.f32 %v2892_v47  ;;  %v6359_v57 = vadd.f32 %v6250_v7, %v5812_v58 }
 0x53d   :  { %v3628_v50 = vadd.f32 %v3580_v48, %v6097_v37  ;;  %3485 = vst [vmem:[#allocation14 + $0x98] sm:$0xff] %v3389_v43  ;;  %v3581_v4 = vmul.f32 %v3533_v12, %v3389_v43  ;;  %v2820_v52 = vsub.f32 0.0, %v2772_v53  ;;  %v6363_v16 = vadd.f32 %v6258_v63, %v5816_v25 }
 0x53e   :  { %v4368_v2 = vpop.eup %4367  ;;  %v3133_v37 = vand.u32 2147483647, %v6321_v32  ;;  %v6368_v13 = vadd.f32 %v6279_v24, %v5812_v58  ;;  %v6372_v9 = vadd.f32 %v6290_v28, %v5816_v25  ;;  %v6376_v7 = vadd.f32 %v6299_v23, %v5812_v58  ;;  %3445 = vst [vmem:[#allocation12 + $0xd8] sm:$0xff] %v6359_v57 }
 0x53f   :  { %3676 = vst [vmem:[#allocation11 + $0x90] sm:$0xff] %v3628_v50  ;;  %v6380_v63 = vpop.eup %4369  ;;  %v3629_v29 = vadd.f32 %v3581_v4, %v6141_v40  ;;  %v3120_v22 = vmul.f32 0.6931472, %v4368_v2  ;;  %v3123_v17 = vmul.f32 %v6301_v46, %v3122_v35  ;;  %v2894_v55 = vmul.f32 1.442695, %v2820_v52  ;;  %v3534_v46 = vld [vmem:[#allocation7 + $0xa0] sm:$0xff] }
 0x540   :  { %v3131_v28 = vadd.f32 1.0, %v3130_v8  ;;  %v3142_v36 = vand.u32 2147483647, %v6338_v21  ;;  %v3145_v23 = vadd.f32 1.0, %v6380_v63  ;;  %v2773_v39 = vand.u32 2147483647, %v6363_v16 }
 0x541   :  { %v6378_v15 = vpop.f32.mrb[208].mxu0  ;;  %3446 = vst [vmem:[#allocation12 + $0xe0] sm:$0xff] %v6368_v13  ;;  %3447 = vst [vmem:[#allocation12 + $0xe8] sm:$0xff] %v6376_v7  ;;  %v3126_v40 = vsel %vm6349_vm4, %v3123_v17, %v3120_v22  ;;  %v3140_v56 = vadd.f32 1.0, %v3139_v20  ;;  %4379 = vpow2.f32 %v2894_v55  ;;  %v2774_v33 = vand.u32 2147483647, %v6372_v9  ;;  %v6397_v38 = vpop.eup %4371 }
 0x542   :  { %v6385_v24 = vpop.f32.mrb[209].mxu0  ;;  %3677 = vst [vmem:[#allocation11 + $0x98] sm:$0xff] %v3629_v29  ;;  %v3390_v47 = vadd.f32 %v3126_v40, %v2718_v14  ;;  %v2721_v6 = vmax.f32 %v6263_v44, 0.0  ;;  %4381 = vlog2.f32 %v3145_v23  ;;  %v2722_v48 = vmax.f32 %v6284_v31, 0.0  ;;  %v3535_v17 = vld [vmem:[#allocation7 + $0xa8] sm:$0xff] }
 0x543   :  { %v6395_v26 = vpop.f32.mrb[210].mxu0  ;;  %v4374_v12 = vpop.eup %4373  ;;  %vm6405_vm5 = vcmp.lt.f32.partialorder %v3133_v37, 0.0004427343  ;;  %v3148_v43 = vmul.f32 -0.5, %v6380_v63  ;;  %v3154_v1 = vadd.f32 1.0, %v6397_v38  ;;  %v2821_v53 = vsub.f32 0.0, %v2773_v39 }
 0x544   :  { %v6403_v60 = vpop.f32.mrb[211].mxu0  ;;  %3486 = vst [vmem:[#allocation14 + $0xa0] sm:$0xff] %v3390_v47  ;;  %v3582_v18 = vmul.f32 %v3534_v46, %v3390_v47  ;;  %v3129_v14 = vmul.f32 0.6931472, %v4374_v12  ;;  %v3132_v50 = vmul.f32 %v6321_v32, %v3131_v28  ;;  %v2822_v8 = vsub.f32 0.0, %v2774_v33  ;;  %v3536_v46 = vld [vmem:[#allocation7 + $0xb0] sm:$0xff] }
 0x545   :  { %v4376_v20 = vpop.eup %4375  ;;  %v3141_v4 = vmul.f32 %v6338_v21, %v3140_v56  ;;  %vm6413_vm6 = vcmp.lt.f32.partialorder %v3142_v36, 0.0004427343  ;;  %4383 = vlog2.f32 %v3154_v1  ;;  %v2896_v2 = vmul.f32 1.442695, %v2821_v53 }
 0x546   :  { %v6417_v37 = vpop.eup %4377  ;;  %v3630_v29 = vadd.f32 %v3582_v18, %v6172_v0  ;;  %v3135_v22 = vsel %vm6405_vm5, %v3132_v50, %v3129_v14  ;;  %v3138_v55 = vmul.f32 0.6931472, %v4376_v20  ;;  %v2898_v32 = vmul.f32 1.442695, %v2822_v8 }
 0x547   :  { %v3391_v21 = vadd.f32 %v3135_v22, %v2719_v49  ;;  %v3149_v36 = vadd.f32 1.0, %v3148_v43  ;;  %v3151_v23 = vand.u32 2147483647, %v6380_v63  ;;  %v3163_v39 = vadd.f32 1.0, %v6417_v37 }
 0x548   :  { %3678 = vst [vmem:[#allocation11 + $0xa0] sm:$0xff] %v3630_v29  ;;  %v3144_v0 = vsel %vm6413_vm6, %v3141_v4, %v3138_v55  ;;  %v3157_v56 = vmul.f32 -0.5, %v6397_v38  ;;  %4385 = vpow2.f32 %v2896_v2  ;;  %v6435_v33 = vadd.f32 %v6308_v59, %v5816_v25 }
 0x549   :  { %v6422_v28 = vpop.f32.mrb[212].mxu0  ;;  %3487 = vst [vmem:[#allocation14 + $0xa8] sm:$0xff] %v3391_v21  ;;  %v3583_v49 = vmul.f32 %v3535_v17, %v3391_v21  ;;  %v3392_v47 = vadd.f32 %v3144_v0, %v2720_v10  ;;  %v2723_v12 = vmax.f32 %v6294_v34, 0.0  ;;  %4387 = vlog2.f32 %v3163_v39 }
 0x54a   :  { %v6428_v40 = vpop.f32.mrb[213].mxu0  ;;  %v3160_v43 = vand.u32 2147483647, %v6397_v38  ;;  %v3166_v1 = vmul.f32 -0.5, %v6417_v37  ;;  %4389 = vpow2.f32 %v2898_v32  ;;  %v2775_v59 = vand.u32 2147483647, %v6435_v33 }
 0x54b   :  { %v6437_v61 = vpop.f32.mrb[214].mxu0  ;;  %v6447_v53 = vpop.eup %4379  ;;  %v3631_v18 = vadd.f32 %v3583_v49, %v6185_v5  ;;  %3488 = vst [vmem:[#allocation14 + $0xb0] sm:$0xff] %v3392_v47  ;;  %v3584_v14 = vmul.f32 %v3536_v46, %v3392_v47  ;;  %vm6450_vm7 = vcmp.lt.f32.partialorder %v3151_v23, 0.0004427343  ;;  %v6456_v10 = vadd.f32 %v6326_v11, %v5812_v58 }
 0x54c   :  { %v6442_v35 = vpop.f32.mrb[215].mxu0  ;;  %v4382_v50 = vpop.eup %4381  ;;  %v3150_v8 = vmul.f32 %v6380_v63, %v3149_v36  ;;  %v3158_v20 = vadd.f32 1.0, %v3157_v56  ;;  %v3172_v4 = vadd.f32 1.0, %v6447_v53  ;;  %v2823_v52 = vsub.f32 0.0, %v2775_v59  ;;  %v3539_v63 = vld [vmem:[#allocation7 + $0xc8] sm:$0xff] }
 0x54d   :  { %3679 = vst [vmem:[#allocation11 + $0xa8] sm:$0xff] %v3631_v18  ;;  %v3632_v5 = vadd.f32 %v3584_v14, %v6225_v30  ;;  %v3147_v2 = vmul.f32 0.6931472, %v4382_v50  ;;  %3448 = vst [vmem:[#allocation12 + $0xf0] sm:$0xff] %v6456_v10  ;;  %v6464_v29 = vadd.f32 %v6336_v62, %v5816_v25  ;;  %v6468_v11 = vadd.f32 %v6342_v51, %v5812_v58  ;;  %v3537_v62 = vld [vmem:[#allocation7 + $0xb8] sm:$0xff] }
 0x54e   :  { %vm6470_vm8 = vcmp.lt.f32.partialorder %v3160_v43, 0.0004427343  ;;  %v3167_v22 = vadd.f32 1.0, %v3166_v1  ;;  %4391 = vlog2.f32 %v3172_v4  ;;  %v2900_v17 = vmul.f32 1.442695, %v2823_v52 }
 0x54f   :  { %v4384_v30 = vpop.eup %4383  ;;  %3680 = vst [vmem:[#allocation11 + $0xb0] sm:$0xff] %v3632_v5  ;;  %v3153_v32 = vsel %vm6450_vm7, %v3150_v8, %v3147_v2  ;;  %v3175_v21 = vmul.f32 -0.5, %v6447_v53  ;;  %v2776_v51 = vand.u32 2147483647, %v6464_v29  ;;  %3449 = vst [vmem:[#allocation12 + $0xf8] sm:$0xff] %v6468_v11  ;;  %v6483_v36 = vadd.f32 %v6346_v54, %v5816_v25 }
 0x550   :  { %v3393_v39 = vadd.f32 %v3153_v32, %v2721_v6  ;;  %v3156_v0 = vmul.f32 0.6931472, %v4384_v30  ;;  %v3159_v46 = vmul.f32 %v6397_v38, %v3158_v20  ;;  %4393 = vpow2.f32 %v2900_v17  ;;  %v3538_v6 = vld [vmem:[#allocation7 + $0xc0] sm:$0xff] }
 0x551   :  { %v6474_v55 = vpop.f32.mrb[216].mxu0  ;;  %v3169_v49 = vand.u32 2147483647, %v6417_v37  ;;  %v2824_v47 = vsub.f32 0.0, %v2776_v51  ;;  %v2777_v43 = vand.u32 2147483647, %v6483_v36  ;;  %v6496_v54 = vadd.f32 %v6378_v15, %v5812_v58 }
 0x552   :  { %v6485_v23 = vpop.f32.mrb[217].mxu0  ;;  %v6500_v59 = vpop.eup %4385  ;;  %3489 = vst [vmem:[#allocation14 + $0xb8] sm:$0xff] %v3393_v39  ;;  %v3585_v44 = vmul.f32 %v3537_v62, %v3393_v39  ;;  %v3162_v38 = vsel %vm6470_vm8, %v3159_v46, %v3156_v0  ;;  %v3168_v18 = vmul.f32 %v6417_v37, %v3167_v22  ;;  %v6507_v14 = vadd.f32 %v6395_v26, %v5812_v58 }
 0x553   :  { %v6490_v56 = vpop.f32.mrb[218].mxu0  ;;  %v4388_v42 = vpop.eup %4387  ;;  %v3394_v15 = vadd.f32 %v3162_v38, %v2722_v48  ;;  %v3176_v50 = vadd.f32 1.0, %v3175_v21  ;;  %v3178_v8 = vand.u32 2147483647, %v6447_v53  ;;  %v3181_v20 = vadd.f32 1.0, %v6500_v59  ;;  %3450 = vst [vmem:[#allocation12 + $0x100] sm:$0xff] %v6496_v54 }
 0x554   :  { %v6498_v1 = vpop.f32.mrb[219].mxu0  ;;  %v6514_v4 = vpop.eup %4389  ;;  %v3633_v52 = vadd.f32 %v3585_v44, %v6237_v27  ;;  %v3165_v37 = vmul.f32 0.6931472, %v4388_v42  ;;  %v2902_v5 = vmul.f32 1.442695, %v2824_v47  ;;  %v2825_v2 = vsub.f32 0.0, %v2777_v43 }
 0x555   :  { %3451 = vst [vmem:[#allocation12 + $0x108] sm:$0xff] %v6507_v14  ;;  %3490 = vst [vmem:[#allocation14 + $0xc0] sm:$0xff] %v3394_v15  ;;  %v3586_v26 = vmul.f32 %v3538_v6, %v3394_v15  ;;  %vm3170_vm9 = vcmp.lt.f32.partialorder %v3169_v49, 0.0004427343  ;;  %4395 = vlog2.f32 %v3181_v20  ;;  %v6520_v31 = vadd.f32 %v6385_v24, %v5816_v25  ;;  %v3540_v42 = vld [vmem:[#allocation7 + $0xd0] sm:$0xff] }
 0x556   :  { %3681 = vst [vmem:[#allocation11 + $0xb8] sm:$0xff] %v3633_v52  ;;  %v3171_v48 = vsel %vm3170_vm9, %v3168_v18, %v3165_v37  ;;  %v2724_v22 = vmax.f32 %v6334_v45, 0.0  ;;  %v2725_v27 = vmax.f32 %v6363_v16, 0.0  ;;  %v3190_v17 = vadd.f32 1.0, %v6514_v4 }
 0x557   :  { %v3634_v32 = vadd.f32 %v3586_v26, %v6256_v41  ;;  %v3395_v62 = vadd.f32 %v3171_v48, %v2723_v12  ;;  %v3184_v21 = vmul.f32 -0.5, %v6500_v59  ;;  %4397 = vpow2.f32 %v2902_v5 }
 0x558   :  { %v4392_v51 = vpop.eup %4391  ;;  %v3177_v39 = vmul.f32 %v6447_v53, %v3176_v50  ;;  %vm6534_vm10 = vcmp.lt.f32.partialorder %v3178_v8, 0.0004427343  ;;  %4399 = vlog2.f32 %v3190_v17  ;;  %v2904_v0 = vmul.f32 1.442695, %v2825_v2  ;;  %v3545_v2 = vld [vmem:[#allocation7 + $0xf8] sm:$0xff] }
 0x559   :  { %v6525_v30 = vpop.f32.mrb[220].mxu0  ;;  %3682 = vst [vmem:[#allocation11 + $0xc0] sm:$0xff] %v3634_v32  ;;  %3491 = vst [vmem:[#allocation14 + $0xc8] sm:$0xff] %v3395_v62  ;;  %v3587_v41 = vmul.f32 %v3539_v63, %v3395_v62  ;;  %v3174_v34 = vmul.f32 0.6931472, %v4392_v51  ;;  %v3193_v12 = vmul.f32 -0.5, %v6514_v4  ;;  %v6549_v44 = vadd.f32 %v6403_v60, %v5816_v25 }
 0x55a   :  { %v6531_v24 = vpop.f32.mrb[221].mxu0  ;;  %v2778_v49 = vand.u32 2147483647, %v6520_v31  ;;  %v6544_v43 = vpop.eup %4393  ;;  %v3187_v53 = vand.u32 2147483647, %v6500_v59  ;;  %4401 = vpow2.f32 %v2904_v0  ;;  %v6553_v38 = vadd.f32 %v6422_v28, %v5812_v58 }
 0x55b   :  { %v6538_v46 = vpop.f32.mrb[222].mxu0  ;;  %v3635_v6 = vadd.f32 %v3587_v41, %v6288_v19  ;;  %v3180_v18 = vsel %vm6534_vm10, %v3177_v39, %v3174_v34  ;;  %v3185_v15 = vadd.f32 1.0, %v3184_v21  ;;  %v3199_v50 = vadd.f32 1.0, %v6544_v43 }
 0x55c   :  { %v6542_v47 = vpop.f32.mrb[223].mxu0  ;;  %v3396_v8 = vadd.f32 %v3180_v18, %v2724_v22  ;;  %v2726_v20 = vmax.f32 %v6372_v9, 0.0  ;;  %v2727_v52 = vmax.f32 %v6435_v33, 0.0  ;;  %v2826_v60 = vsub.f32 0.0, %v2778_v49  ;;  %3452 = vst [vmem:[#allocation12 + $0x110] sm:$0xff] %v6553_v38 }
 0x55d   :  { %3683 = vst [vmem:[#allocation11 + $0xc8] sm:$0xff] %v3635_v6  ;;  %v3194_v28 = vadd.f32 1.0, %v3193_v12  ;;  %4403 = vlog2.f32 %v3199_v50  ;;  %v2779_v19 = vand.u32 2147483647, %v6549_v44  ;;  %v6565_v37 = vadd.f32 %v6428_v40, %v5816_v25 }
 0x55e   :  { %3492 = vst [vmem:[#allocation14 + $0xd0] sm:$0xff] %v3396_v8  ;;  %v3588_v5 = vmul.f32 %v3540_v42, %v3396_v8  ;;  %vm6567_vm11 = vcmp.lt.f32.partialorder %v3187_v53, 0.0004427343  ;;  %v2906_v9 = vmul.f32 1.442695, %v2826_v60  ;;  %v6573_v26 = vadd.f32 %v6437_v61, %v5812_v58  ;;  %v3541_v53 = vld [vmem:[#allocation7 + $0xd8] sm:$0xff] }
 0x55f   :  { %v4396_v63 = vpop.eup %4395  ;;  %v3186_v22 = vmul.f32 %v6500_v59, %v3185_v15  ;;  %v3196_v17 = vand.u32 2147483647, %v6514_v4  ;;  %v2827_v40 = vsub.f32 0.0, %v2779_v19  ;;  %v2780_v32 = vand.u32 2147483647, %v6565_v37 }
 0x560   :  { %v3636_v21 = vadd.f32 %v3588_v5, %v6297_v3  ;;  %v3183_v51 = vmul.f32 0.6931472, %v4396_v63  ;;  %v3202_v39 = vmul.f32 -0.5, %v6544_v43  ;;  %4405 = vpow2.f32 %v2906_v9  ;;  %3453 = vst [vmem:[#allocation12 + $0x118] sm:$0xff] %v6573_v26 }
 0x561   :  { %v6575_v48 = vpop.f32.mrb[224].mxu0  ;;  %v6587_v45 = vpop.eup %4397  ;;  %v3195_v59 = vmul.f32 %v6514_v4, %v3194_v28  ;;  %v2908_v0 = vmul.f32 1.442695, %v2827_v40  ;;  %v2828_v41 = vsub.f32 0.0, %v2780_v32  ;;  %v6592_v34 = vadd.f32 %v6474_v55, %v5812_v58 }
 0x562   :  { %v6580_v62 = vpop.f32.mrb[225].mxu0  ;;  %v4400_v3 = vpop.eup %4399  ;;  %3684 = vst [vmem:[#allocation11 + $0xd0] sm:$0xff] %v3636_v21  ;;  %v3189_v49 = vsel %vm6567_vm11, %v3186_v22, %v3183_v51  ;;  %v3205_v6 = vand.u32 2147483647, %v6544_v43  ;;  %v3208_v18 = vadd.f32 1.0, %v6587_v45  ;;  %v6602_v4 = vadd.f32 %v6442_v35, %v5816_v25  ;;  %v3542_v35 = vld [vmem:[#allocation7 + $0xe0] sm:$0xff] }
 0x563   :  { %v6585_v61 = vpop.f32.mrb[226].mxu0  ;;  %v3397_v55 = vadd.f32 %v3189_v49, %v2725_v27  ;;  %v3192_v42 = vmul.f32 0.6931472, %v4400_v3  ;;  %4407 = vpow2.f32 %v2908_v0  ;;  %v2910_v15 = vmul.f32 1.442695, %v2828_v41  ;;  %3454 = vst [vmem:[#allocation12 + $0x120] sm:$0xff] %v6592_v34 }
 0x564   :  { %v6594_v12 = vpop.f32.mrb[227].mxu0  ;;  %v6607_v50 = vpop.eup %4401  ;;  %vm3197_vm12 = vcmp.lt.f32.partialorder %v3196_v17, 0.0004427343  ;;  %v3203_v8 = vadd.f32 1.0, %v3202_v39  ;;  %v2728_v60 = vmax.f32 %v6464_v29, 0.0  ;;  %4409 = vlog2.f32 %v3208_v18  ;;  %v3543_v18 = vld [vmem:[#allocation7 + $0xe8] sm:$0xff] }
 0x565   :  { %3493 = vst [vmem:[#allocation14 + $0xd8] sm:$0xff] %v3397_v55  ;;  %v3589_v28 = vmul.f32 %v3541_v53, %v3397_v55  ;;  %v3198_v19 = vsel %vm3197_vm12, %v3195_v59, %v3192_v42  ;;  %v3217_v5 = vadd.f32 1.0, %v6607_v50  ;;  %v6613_v16 = vadd.f32 %v6485_v23, %v5816_v25 }
 0x566   :  { %v3398_v27 = vadd.f32 %v3198_v19, %v2726_v20  ;;  %vm6615_vm13 = vcmp.lt.f32.partialorder %v3205_v6, 0.0004427343  ;;  %v2729_v9 = vmax.f32 %v6483_v36, 0.0  ;;  %4411 = vpow2.f32 %v2910_v15 }
 0x567   :  { %v4404_v22 = vpop.eup %4403  ;;  %v3637_v17 = vadd.f32 %v3589_v28, %v6359_v57  ;;  %v3211_v40 = vmul.f32 -0.5, %v6587_v45  ;;  %4413 = vlog2.f32 %v3217_v5  ;;  %v2781_v32 = vand.u32 2147483647, %v6602_v4 }
 0x568   :  { %3494 = vst [vmem:[#allocation14 + $0xe0] sm:$0xff] %v3398_v27  ;;  %v3590_v20 = vmul.f32 %v3542_v35, %v3398_v27  ;;  %v3201_v21 = vmul.f32 0.6931472, %v4404_v22  ;;  %v3204_v51 = vmul.f32 %v6544_v43, %v3203_v8  ;;  %v3220_v39 = vmul.f32 -0.5, %v6607_v50 }
 0x569   :  { %v6620_v63 = vpop.f32.mrb[228].mxu0  ;;  %3685 = vst [vmem:[#allocation11 + $0xd8] sm:$0xff] %v3637_v17  ;;  %v3214_v0 = vand.u32 2147483647, %v6587_v45  ;;  %v2829_v57 = vsub.f32 0.0, %v2781_v32  ;;  %v6635_v3 = vadd.f32 %v6490_v56, %v5812_v58  ;;  %v6646_v55 = vadd.f32 %v6498_v1, %v5816_v25 }
 0x56a   :  { %v6625_v23 = vpop.f32.mrb[229].mxu0  ;;  %v2782_v41 = vand.u32 2147483647, %v6613_v16  ;;  %v6639_v53 = vpop.eup %4405  ;;  %v3638_v43 = vadd.f32 %v3590_v20, %v6368_v13  ;;  %v3207_v6 = vsel %vm6615_vm13, %v3204_v51, %v3201_v21  ;;  %v6650_v42 = vadd.f32 %v6525_v30, %v5812_v58 }
 0x56b   :  { %v6629_v59 = vpop.f32.mrb[230].mxu0  ;;  %v3399_v56 = vadd.f32 %v3207_v6, %v2727_v52  ;;  %v3212_v15 = vadd.f32 1.0, %v3211_v40  ;;  %v3223_v8 = vand.u32 2147483647, %v6607_v50  ;;  %v3226_v13 = vadd.f32 1.0, %v6639_v53  ;;  %3455 = vst [vmem:[#allocation12 + $0x128] sm:$0xff] %v6635_v3 }
 0x56c   :  { %v6637_v49 = vpop.f32.mrb[231].mxu0  ;;  %3686 = vst [vmem:[#allocation11 + $0xe0] sm:$0xff] %v3638_v43  ;;  %v3221_v28 = vadd.f32 1.0, %v3220_v39  ;;  %v2912_v19 = vmul.f32 1.442695, %v2829_v57  ;;  %v2830_v35 = vsub.f32 0.0, %v2782_v41  ;;  %v6699_v29 = vadd.f32 %v6531_v24, %v5816_v25 }
 0x56d   :  { %v2783_v1 = vand.u32 2147483647, %v6646_v55  ;;  %3456 = vst [vmem:[#allocation12 + $0x130] sm:$0xff] %v6650_v42  ;;  %v6659_v30 = vpop.eup %4407  ;;  %3495 = vst [vmem:[#allocation14 + $0xe8] sm:$0xff] %v3399_v56  ;;  %v3591_v33 = vmul.f32 %v3543_v18, %v3399_v56  ;;  %v2730_v52 = vmax.f32 %v6520_v31, 0.0  ;;  %4415 = vlog2.f32 %v3226_v13 }
 0x56e   :  { %v3229_v5 = vmul.f32 -0.5, %v6639_v53  ;;  %v4410_v27 = vpop.eup %4409  ;;  %vm6663_vm14 = vcmp.lt.f32.partialorder %v3214_v0, 0.0004427343  ;;  %v2731_v22 = vmax.f32 %v6549_v44, 0.0  ;;  %v3235_v17 = vadd.f32 1.0, %v6659_v30 }
 0x56f   :  { %4417 = vpow2.f32 %v2912_v19  ;;  %v3639_v32 = vadd.f32 %v3591_v33, %v6376_v7  ;;  %v3210_v20 = vmul.f32 0.6931472, %v4410_v27  ;;  %v3213_v21 = vmul.f32 %v6587_v45, %v3212_v15  ;;  %v3544_v45 = vld [vmem:[#allocation7 + $0xf0] sm:$0xff] }
 0x570   :  { %v2914_v51 = vmul.f32 1.442695, %v2830_v35  ;;  %v6675_v57 = vpop.eup %4411  ;;  %v3222_v0 = vmul.f32 %v6607_v50, %v3221_v28  ;;  %vm6678_vm15 = vcmp.lt.f32.partialorder %v3223_v8, 0.0004427343  ;;  %4419 = vlog2.f32 %v3235_v17 }
 0x571   :  { %v6669_v40 = vpop.f32.mrb[240].mxu1  ;;  %v2831_v43 = vsub.f32 0.0, %v2783_v1  ;;  %v4414_v18 = vpop.eup %4413  ;;  %3687 = vst [vmem:[#allocation11 + $0xe8] sm:$0xff] %v3639_v32  ;;  %v3216_v7 = vsel %vm6663_vm14, %v3213_v21, %v3210_v20  ;;  %v3230_v56 = vadd.f32 1.0, %v3229_v5  ;;  %v3232_v15 = vand.u32 2147483647, %v6639_v53 }
 0x572   :  { %v6673_v39 = vpop.f32.mrb[241].mxu1  ;;  %v3244_v13 = vadd.f32 1.0, %v6675_v57  ;;  %v3400_v8 = vadd.f32 %v3216_v7, %v2728_v60  ;;  %v3219_v28 = vmul.f32 0.6931472, %v4414_v18  ;;  %v3238_v19 = vmul.f32 -0.5, %v6659_v30 }
 0x573   :  { %v6682_v6 = vpop.f32.mrb[242].mxu1  ;;  %4421 = vpow2.f32 %v2914_v51  ;;  %v3241_v35 = vand.u32 2147483647, %v6659_v30  ;;  %v3247_v1 = vmul.f32 -0.5, %v6675_v57  ;;  %v2916_v33 = vmul.f32 1.442695, %v2831_v43 }
 0x574   :  { %v6688_v50 = vpop.f32.mrb[243].mxu1  ;;  %4423 = vlog2.f32 %v3244_v13  ;;  %3496 = vst [vmem:[#allocation14 + $0xf0] sm:$0xff] %v3400_v8  ;;  %v3592_v5 = vmul.f32 %v3544_v45, %v3400_v8  ;;  %v3225_v27 = vsel %vm6678_vm15, %v3222_v0, %v3219_v28  ;;  %v6703_v60 = vadd.f32 %v6538_v46, %v5812_v58 }
 0x575   :  { %v3401_v17 = vadd.f32 %v3225_v27, %v2729_v9  ;;  %v3231_v32 = vmul.f32 %v6639_v53, %v3230_v56  ;;  %4425 = vpow2.f32 %v2916_v33  ;;  %v6710_v20 = vadd.f32 %v6542_v47, %v5816_v25 }
 0x576   :  { %v3640_v21 = vadd.f32 %v3592_v5, %v6456_v10  ;;  %v3239_v51 = vadd.f32 1.0, %v3238_v19  ;;  %v2784_v24 = vand.u32 2147483647, %v6699_v29  ;;  %3457 = vst [vmem:[#allocation12 + $0x138] sm:$0xff] %v6703_v60  ;;  %v6717_v46 = vadd.f32 %v6575_v48, %v5812_v58  ;;  %v3546_v5 = vld [vmem:[#allocation7 + $0x100] sm:$0xff] }
 0x577   :  { %v4416_v9 = vpop.eup %4415  ;;  %3497 = vst [vmem:[#allocation14 + $0xf8] sm:$0xff] %v3401_v17  ;;  %v3593_v53 = vmul.f32 %v3545_v2, %v3401_v17  ;;  %v3248_v0 = vadd.f32 1.0, %v3247_v1  ;;  %v3250_v47 = vand.u32 2147483647, %v6675_v57  ;;  %v2785_v41 = vand.u32 2147483647, %v6710_v20 }
 0x578   :  { %3688 = vst [vmem:[#allocation11 + $0xf0] sm:$0xff] %v3640_v21  ;;  %v3228_v18 = vmul.f32 0.6931472, %v4416_v9  ;;  %v2832_v7 = vsub.f32 0.0, %v2784_v24  ;;  %3458 = vst [vmem:[#allocation12 + $0x140] sm:$0xff] %v6717_v46  ;;  %v6730_v48 = vadd.f32 %v6580_v62, %v5816_v25  ;;  %v6734_v45 = vadd.f32 %v6585_v61, %v5812_v58 }
 0x579   :  { %v6719_v36 = vpop.f32.mrb[244].mxu1  ;;  %v6725_v43 = vpop.eup %4417  ;;  %v3641_v13 = vadd.f32 %v3593_v53, %v6468_v11  ;;  %vm3233_vm0 = vcmp.lt.f32.partialorder %v3232_v15, 0.0004427343  ;;  %v2732_v8 = vmax.f32 %v6565_v37, 0.0  ;;  %vm6743_vm1 = vcmp.lt.f32.partialorder %v3241_v35, 0.0004427343 }
 0x57a   :  { %v6723_v10 = vpop.f32.mrb[245].mxu1  ;;  %v3253_v28 = vadd.f32 1.0, %v6725_v43  ;;  %v4420_v1 = vpop.eup %4419  ;;  %v3234_v33 = vsel %vm3233_vm0, %v3231_v32, %v3228_v18  ;;  %v2918_v61 = vmul.f32 1.442695, %v2832_v7  ;;  %v2833_v27 = vsub.f32 0.0, %v2785_v41  ;;  %3459 = vst [vmem:[#allocation12 + $0x148] sm:$0xff] %v6734_v45 }
 0x57b   :  { %v6736_v56 = vpop.f32.mrb[246].mxu1  ;;  %3689 = vst [vmem:[#allocation11 + $0xf8] sm:$0xff] %v3641_v13  ;;  %v3402_v11 = vadd.f32 %v3234_v33, %v2730_v52  ;;  %v3237_v37 = vmul.f32 0.6931472, %v4420_v1  ;;  %v3240_v15 = vmul.f32 %v6659_v30, %v3239_v51  ;;  %v3249_v17 = vmul.f32 %v6675_v57, %v3248_v0  ;;  %v3547_v52 = vld [vmem:[#allocation7 + $0x108] sm:$0xff]  ;;  %v3548_v1 = vld [vmem:[#allocation7 + $0x110] sm:$0xff] }
 0x57c   :  { %v6741_v19 = vpop.f32.mrb[247].mxu1  ;;  %4427 = vlog2.f32 %v3253_v28  ;;  %vm6754_vm2 = vcmp.lt.f32.partialorder %v3250_v47, 0.0004427343  ;;  %v2786_v32 = vand.u32 2147483647, %v6730_v48  ;;  %v3256_v30 = vmul.f32 -0.5, %v6725_v43 }
 0x57d   :  { %v6751_v2 = vpop.eup %4421  ;;  %4429 = vpow2.f32 %v2918_v61  ;;  %3498 = vst [vmem:[#allocation14 + $0x100] sm:$0xff] %v3402_v11  ;;  %v3594_v24 = vmul.f32 %v3546_v5, %v3402_v11  ;;  %v3243_v31 = vsel %vm6743_vm1, %v3240_v15, %v3237_v37  ;;  %v3259_v53 = vand.u32 2147483647, %v6725_v43 }
 0x57e   :  { %v4424_v21 = vpop.eup %4423  ;;  %v3262_v51 = vadd.f32 1.0, %v6751_v2  ;;  %v3403_v57 = vadd.f32 %v3243_v31, %v2731_v22  ;;  %v2920_v0 = vmul.f32 1.442695, %v2833_v27  ;;  %v3265_v18 = vmul.f32 -0.5, %v6751_v2 }
 0x57f   :  { %v3246_v9 = vmul.f32 0.6931472, %v4424_v21  ;;  %v6766_v47 = vpop.eup %4425  ;;  %v3642_v41 = vadd.f32 %v3594_v24, %v6496_v54  ;;  %v2834_v7 = vsub.f32 0.0, %v2786_v32  ;;  %v6774_v44 = vadd.f32 %v6594_v12, %v5816_v25 }
 0x580   :  { %4431 = vlog2.f32 %v3262_v51  ;;  %3499 = vst [vmem:[#allocation14 + $0x108] sm:$0xff] %v3403_v57  ;;  %v3595_v13 = vmul.f32 %v3547_v52, %v3403_v57  ;;  %v2733_v33 = vmax.f32 %v6602_v4, 0.0  ;;  %v2734_v54 = vmax.f32 %v6613_v16, 0.0 }
 0x581   :  { %v3252_v28 = vsel %vm6754_vm2, %v3249_v17, %v3246_v9  ;;  %3690 = vst [vmem:[#allocation11 + $0x100] sm:$0xff] %v3642_v41  ;;  %v3271_v5 = vadd.f32 1.0, %v6766_v47  ;;  %v3257_v61 = vadd.f32 1.0, %v3256_v30  ;;  %4433 = vpow2.f32 %v2920_v0 }
 0x582   :  { %v3404_v22 = vadd.f32 %v3252_v28, %v2732_v8  ;;  %v3643_v62 = vadd.f32 %v3595_v13, %v6507_v14  ;;  %v2922_v27 = vmul.f32 1.442695, %v2834_v7  ;;  %vm6780_vm3 = vcmp.lt.f32.partialorder %v3259_v53, 0.0004427343 }
 0x583   :  { %v3266_v12 = vadd.f32 1.0, %v3265_v18  ;;  %4435 = vlog2.f32 %v3271_v5  ;;  %v2787_v4 = vand.u32 2147483647, %v6774_v44  ;;  %v6787_v16 = vadd.f32 %v6620_v63, %v5812_v58 }
 0x584   :  { %3500 = vst [vmem:[#allocation14 + $0x110] sm:$0xff] %v3404_v22  ;;  %v3596_v11 = vmul.f32 %v3548_v1, %v3404_v22  ;;  %3691 = vst [vmem:[#allocation11 + $0x108] sm:$0xff] %v3643_v62  ;;  %4437 = vpow2.f32 %v2922_v27  ;;  %v6791_v14 = vadd.f32 %v6625_v23, %v5816_v25  ;;  %v3274_v17 = vmul.f32 -0.5, %v6766_v47  ;;  %v3550_v62 = vld [vmem:[#allocation7 + $0x120] sm:$0xff] }
 0x585   :  { %v6797_v35 = vadd.f32 %v6629_v59, %v5812_v58  ;;  %v6801_v32 = vadd.f32 %v6637_v49, %v5816_v25  ;;  %v3258_v24 = vmul.f32 %v6725_v43, %v3257_v61  ;;  %v2835_v23 = vsub.f32 0.0, %v2787_v4  ;;  %3460 = vst [vmem:[#allocation12 + $0x150] sm:$0xff] %v6787_v16  ;;  %v3549_v43 = vld [vmem:[#allocation7 + $0x118] sm:$0xff] }
 0x586   :  { %v4428_v8 = vpop.eup %4427  ;;  %v3644_v15 = vadd.f32 %v3596_v11, %v6553_v38  ;;  %v2788_v38 = vand.u32 2147483647, %v6791_v14  ;;  %v3268_v31 = vand.u32 2147483647, %v6751_v2  ;;  %v2735_v59 = vmax.f32 %v6646_v55, 0.0 }
 0x587   :  { %v6803_v21 = vpop.eup %4429  ;;  %v3255_v63 = vmul.f32 0.6931472, %v4428_v8  ;;  %v3277_v52 = vand.u32 2147483647, %v6766_v47  ;;  %3461 = vst [vmem:[#allocation12 + $0x158] sm:$0xff] %v6797_v35  ;;  %v3267_v41 = vmul.f32 %v6751_v2, %v3266_v12  ;;  %v3275_v18 = vadd.f32 1.0, %v3274_v17 }
 0x588   :  { %3692 = vst [vmem:[#allocation11 + $0x110] sm:$0xff] %v3644_v15  ;;  %v3280_v49 = vadd.f32 1.0, %v6803_v21  ;;  %v2924_v51 = vmul.f32 1.442695, %v2835_v23  ;;  %v2836_v57 = vsub.f32 0.0, %v2788_v38  ;;  %v3283_v1 = vmul.f32 -0.5, %v6803_v21 }
 0x589   :  { %v3261_v30 = vsel %vm6780_vm3, %v3258_v24, %v3255_v63  ;;  %v2789_v9 = vand.u32 2147483647, %v6801_v32  ;;  %vm3269_vm4 = vcmp.lt.f32.partialorder %v3268_v31, 0.0004427343  ;;  %v6820_v22 = vadd.f32 %v6669_v40, %v5812_v58  ;;  %v3551_v24 = vld [vmem:[#allocation7 + $0x128] sm:$0xff] }
 0x58a   :  { %v4432_v53 = vpop.eup %4431  ;;  %v3405_v0 = vadd.f32 %v3261_v30, %v2733_v33  ;;  %4439 = vlog2.f32 %v3280_v49  ;;  %v2926_v7 = vmul.f32 1.442695, %v2836_v57  ;;  %v6826_v61 = vadd.f32 %v6682_v6, %v5812_v58 }
 0x58b   :  { %v3264_v55 = vmul.f32 0.6931472, %v4432_v53  ;;  %4441 = vpow2.f32 %v2924_v51  ;;  %v2837_v13 = vsub.f32 0.0, %v2789_v9  ;;  %v6822_v5 = vpop.eup %4433  ;;  %vm6829_vm5 = vcmp.lt.f32.partialorder %v3277_v52, 0.0004427343  ;;  %3462 = vst [vmem:[#allocation12 + $0x160] sm:$0xff] %v6820_v22 }
 0x58c   :  { %3501 = vst [vmem:[#allocation14 + $0x118] sm:$0xff] %v3405_v0  ;;  %v3597_v28 = vmul.f32 %v3549_v43, %v3405_v0  ;;  %4443 = vpow2.f32 %v2926_v7  ;;  %v3289_v40 = vadd.f32 1.0, %v6822_v5  ;;  %v3276_v15 = vmul.f32 %v6766_v47, %v3275_v18  ;;  %3463 = vst [vmem:[#allocation12 + $0x168] sm:$0xff] %v6826_v61  ;;  %v3552_v0 = vld [vmem:[#allocation7 + $0x130] sm:$0xff] }
 0x58d   :  { %v3270_v33 = vsel %vm3269_vm4, %v3267_v41, %v3264_v55  ;;  %v2928_v2 = vmul.f32 1.442695, %v2837_v13  ;;  %v4436_v27 = vpop.eup %4435  ;;  %v6840_v6 = vadd.f32 %v6673_v39, %v5816_v25  ;;  %v3286_v38 = vand.u32 2147483647, %v6803_v21 }
 0x58e   :  { %v3645_v11 = vadd.f32 %v3597_v28, %v6573_v26  ;;  %v3406_v37 = vadd.f32 %v3270_v33, %v2734_v54  ;;  %v6835_v4 = vpop.eup %4437  ;;  %v3273_v8 = vmul.f32 0.6931472, %v4436_v27  ;;  %v3284_v54 = vadd.f32 1.0, %v3283_v1 }
 0x58f   :  { %4445 = vpow2.f32 %v2928_v2  ;;  %v3298_v17 = vadd.f32 1.0, %v6835_v4  ;;  %v3292_v39 = vmul.f32 -0.5, %v6822_v5  ;;  %v2790_v31 = vand.u32 2147483647, %v6840_v6 }
 0x590   :  { %3693 = vst [vmem:[#allocation11 + $0x118] sm:$0xff] %v3645_v11  ;;  %3502 = vst [vmem:[#allocation14 + $0x120] sm:$0xff] %v3406_v37  ;;  %v3598_v26 = vmul.f32 %v3550_v62, %v3406_v37  ;;  %4447 = vlog2.f32 %v3289_v40  ;;  %v3279_v63 = vsel %vm6829_vm5, %v3276_v15, %v3273_v8  ;;  %v3285_v30 = vmul.f32 %v6803_v21, %v3284_v54 }
 0x591   :  { %v3407_v23 = vadd.f32 %v3279_v63, %v2735_v59  ;;  %4449 = vlog2.f32 %v3298_v17  ;;  %v6853_v43 = vadd.f32 %v6719_v36, %v5812_v58  ;;  %v3301_v57 = vmul.f32 -0.5, %v6835_v4 }
 0x592   :  { %v3646_v47 = vadd.f32 %v3598_v26, %v6592_v34  ;;  %v6857_v34 = vadd.f32 %v6736_v56, %v5812_v58  ;;  %v2838_v9 = vsub.f32 0.0, %v2790_v31  ;;  %v6864_v53 = vadd.f32 %v6688_v50, %v5816_v25 }
 0x593   :  { %3503 = vst [vmem:[#allocation14 + $0x128] sm:$0xff] %v3407_v23  ;;  %v3599_v49 = vmul.f32 %v3551_v24, %v3407_v23  ;;  %v2736_v36 = vmax.f32 %v6699_v29, 0.0  ;;  %vm3287_vm6 = vcmp.lt.f32.partialorder %v3286_v38, 0.0004427343  ;;  %3464 = vst [vmem:[#allocation12 + $0x170] sm:$0xff] %v6853_v43  ;;  %v2737_v41 = vmax.f32 %v6710_v20, 0.0 }
 0x594   :  { %v4440_v52 = vpop.eup %4439  ;;  %3694 = vst [vmem:[#allocation11 + $0x120] sm:$0xff] %v3646_v47  ;;  %3465 = vst [vmem:[#allocation12 + $0x178] sm:$0xff] %v6857_v34  ;;  %v3293_v18 = vadd.f32 1.0, %v3292_v39  ;;  %v3295_v55 = vand.u32 2147483647, %v6822_v5 }
 0x595   :  { %v6859_v59 = vpop.eup %4441  ;;  %v3282_v51 = vmul.f32 0.6931472, %v4440_v52  ;;  %v3647_v21 = vadd.f32 %v3599_v49, %v6635_v3  ;;  %v2930_v3 = vmul.f32 1.442695, %v2838_v9  ;;  %v3304_v7 = vand.u32 2147483647, %v6835_v4 }
 0x596   :  { %v3307_v58 = vadd.f32 1.0, %v6859_v59  ;;  %v6873_v56 = vpop.eup %4443 }
 0x597   :  { %v3288_v50 = vsel %vm3287_vm6, %v3285_v30, %v3282_v51  ;;  %3695 = vst [vmem:[#allocation11 + $0x128] sm:$0xff] %v3647_v21 }
 0x598   :  { %v3408_v29 = vadd.f32 %v3288_v50, %v2736_v36  ;;  %4451 = vlog2.f32 %v3307_v58 }
 0x599   :  { %4650 = shalt.err (!%p4647_p2)
}
 0x59a   :  { %s4651_s14 = scalar_lea.hbm %s6986_s8, 6144 }
 0x59b   :  { %p4652_p3 = scmp.ne.s32.totalorder %s6986_s8, %s4651_s14  ;;  %p4655_p4 = scmp.lt.u32.totalorder %s4651_s14, %s6986_s8 }
 0x59d   :  { %p4657_p5 = pnand %p4655_p4, %p4652_p3 }
 0x59f   :  { %4660 = shalt.err (!%p4657_p5)
}
 0x5a0   :  { %3729 = dma.vmem_to_hbm [thread:$0]  %s6866_s12, 6144, %s6986_s8, [#allocation13], %s4716_s19, %s4716_s19, %s4717_s20   ;;  %v6898_v20 = vpop.eup %4445  ;;  %v3302_v13 = vadd.f32 1.0, %v3301_v57  ;;  %v3316_v28 = vadd.f32 1.0, %v6873_v56  ;;  %4453 = vpow2.f32 %v2930_v3  ;;  %v2791_v1 = vand.u32 2147483647, %v6864_v53 }
 0x5a1   :  { %v4448_v33 = vpop.eup %4447  ;;  %3504 = vst [vmem:[#allocation14 + $0x130] sm:$0xff] %v3408_v29  ;;  %v3600_v62 = vmul.f32 %v3552_v0, %v3408_v29  ;;  %v3310_v2 = vmul.f32 -0.5, %v6859_v59  ;;  %v3325_v27 = vadd.f32 1.0, %v6898_v20  ;;  %v6906_v11 = vadd.f32 %v6723_v10, %v5816_v25  ;;  %v3553_v17 = vld [vmem:[#allocation7 + $0x138] sm:$0xff]  ;;  %v3554_v38 = vld [vmem:[#allocation7 + $0x140] sm:$0xff]  ;;  %s4726_s8 = smov [#allocation14]  }
 0x5a2   :  { %v3291_v37 = vmul.f32 0.6931472, %v4448_v33  ;;  %v3294_v12 = vmul.f32 %v6822_v5, %v3293_v18  ;;  %v2738_v40 = vmax.f32 %v6730_v48, 0.0  ;;  %4455 = vlog2.f32 %v3316_v28  ;;  %v4450_v8 = vpop.eup %4449  ;;  %s3735_s21 = sshll.u32 %s4726_s8, 4  ;;  %s4727_s22 = smov [#allocation11]   ;;  %s3736_s21 = int_to_ptr.vmem [resolvable:$true] %s3735_s21 }
 0x5a3   :  { %v3648_v15 = vadd.f32 %v3600_v62, %v6650_v42  ;;  %vm3296_vm7 = vcmp.lt.f32.partialorder %v3295_v55, 0.0004427343  ;;  %vm6911_vm8 = vcmp.lt.f32.partialorder %v3304_v7, 0.0004427343  ;;  %4457 = vlog2.f32 %v3325_v27  ;;  %v4452_v36 = vpop.eup %4451  ;;  %s3711_s23 = sshll.u32 %s4727_s22, 4  ;;  %s4661_s25 = scalar_lea.vmem %s3736_s21, 6144  ;;  %s3712_s23 = int_to_ptr.vmem [resolvable:$true] %s3711_s23 }
 0x5a4   :  { %v3297_v54 = vsel %vm3296_vm7, %v3294_v12, %v3291_v37  ;;  %v3300_v63 = vmul.f32 0.6931472, %v4450_v8  ;;  %v3303_v10 = vmul.f32 %v6835_v4, %v3302_v13  ;;  %v2839_v24 = vsub.f32 0.0, %v2791_v1  ;;  %v3556_v8 = vld [vmem:[#allocation7 + $0x150] sm:$0xff]  ;;  %p4662_p6 = scmp.ne.s32.totalorder %s3736_s21, %s4661_s25  ;;  %p4666_p7 = scmp.lt.s32.totalorder %s3736_s21, %s3736_s21 }
 0x5a5   :  { %3696 = vst [vmem:[#allocation11 + $0x130] sm:$0xff] %v3648_v15  ;;  %v3409_v5 = vadd.f32 %v3297_v54, %v2737_v41  ;;  %v3311_v47 = vadd.f32 1.0, %v3310_v2  ;;  %v3319_v48 = vmul.f32 -0.5, %v6873_v56  ;;  %v2792_v23 = vand.u32 2147483647, %v6906_v11  ;;  %v3557_v54 = vld [vmem:[#allocation7 + $0x158] sm:$0xff]  ;;  %p4667_p8 = scmp.lt.s32.totalorder %s4661_s25, %s4661_s25 }
 0x5a6   :  { %v3306_v42 = vsel %vm6911_vm8, %v3303_v10, %v3300_v63  ;;  %v3328_v39 = vmul.f32 -0.5, %v6898_v20  ;;  %v2932_v31 = vmul.f32 1.442695, %v2839_v24  ;;  %v6923_v52 = vadd.f32 %v6741_v19, %v5816_v25 }
 0x5a7   :  { %3505 = vst [vmem:[#allocation14 + $0x138] sm:$0xff] %v3409_v5  ;;  %v3601_v4 = vmul.f32 %v3553_v17, %v3409_v5  ;;  %v3410_v49 = vadd.f32 %v3306_v42, %v2738_v40  ;;  %v3313_v30 = vand.u32 2147483647, %v6859_v59  ;;  %v2840_v51 = vsub.f32 0.0, %v2792_v23  ;;  %p4668_p9 = por %p4667_p8, %p4666_p7 }
 0x5a8   :  { %v2739_v57 = vmax.f32 %v6774_v44, 0.0  ;;  %v3322_v9 = vand.u32 2147483647, %v6873_v56  ;;  %4459 = vpow2.f32 %v2932_v31  ;;  %v2793_v21 = vand.u32 2147483647, %v6923_v52 }
 0x5a9   :  { %v3649_v58 = vadd.f32 %v3601_v4, %v6703_v60  ;;  %3506 = vst [vmem:[#allocation14 + $0x140] sm:$0xff] %v3410_v49  ;;  %v3602_v50 = vmul.f32 %v3554_v38, %v3410_v49  ;;  %v3320_v25 = vadd.f32 1.0, %v3319_v48  ;;  %v2934_v19 = vmul.f32 1.442695, %v2840_v51  ;;  %v3555_v60 = vld [vmem:[#allocation7 + $0x148] sm:$0xff]  ;;  %p4669_p10 = pnand %p4668_p9, %p4662_p6 }
 0x5aa   :  { %v4454_v0 = vpop.eup %4453  ;;  %v3309_v41 = vmul.f32 0.6931472, %v4452_v36  ;;  %v3312_v18 = vmul.f32 %v6859_v59, %v3311_v47  ;;  %v3329_v3 = vadd.f32 1.0, %v3328_v39  ;;  %v2841_v29 = vsub.f32 0.0, %v2793_v21 }
 0x5ab   :  { %3697 = vst [vmem:[#allocation11 + $0x138] sm:$0xff] %v3649_v58  ;;  %v3650_v44 = vadd.f32 %v3602_v50, %v6717_v46  ;;  %vm3314_vm9 = vcmp.lt.f32.partialorder %v3313_v30, 0.0004427343  ;;  %v3331_v55 = vand.u32 2147483647, %v6898_v20  ;;  %v3334_v7 = vadd.f32 1.0, %v4454_v0 }
 0x5ac   :  { %v4456_v13 = vpop.eup %4455  ;;  %v3315_v28 = vsel %vm3314_vm9, %v3312_v18, %v3309_v41  ;;  %v2740_v1 = vmax.f32 %v6791_v14, 0.0  ;;  %4461 = vpow2.f32 %v2934_v19  ;;  %v2936_v33 = vmul.f32 1.442695, %v2841_v29 }
 0x5ad   :  { %v4458_v62 = vpop.eup %4457  ;;  %3698 = vst [vmem:[#allocation11 + $0x140] sm:$0xff] %v3650_v44  ;;  %v3411_v2 = vadd.f32 %v3315_v28, %v2739_v57  ;;  %v3318_v59 = vmul.f32 0.6931472, %v4456_v13  ;;  %v3321_v27 = vmul.f32 %v6873_v56, %v3320_v25  ;;  %4463 = vlog2.f32 %v3334_v7  ;;  %v3558_v57 = vld [vmem:[#allocation7 + $0x160] sm:$0xff]  ;;  %v3559_v44 = vld [vmem:[#allocation7 + $0x168] sm:$0xff] }
 0x5ae   :  { %vm3323_vm10 = vcmp.lt.f32.partialorder %v3322_v9, 0.0004427343  ;;  %v3327_v46 = vmul.f32 0.6931472, %v4458_v62  ;;  %v3330_v37 = vmul.f32 %v6898_v20, %v3329_v3  ;;  %4465 = vpow2.f32 %v2936_v33 }
 0x5af   :  { %3507 = vst [vmem:[#allocation14 + $0x148] sm:$0xff] %v3411_v2  ;;  %v3603_v12 = vmul.f32 %v3555_v60, %v3411_v2  ;;  %v3324_v40 = vsel %vm3323_vm10, %v3321_v27, %v3318_v59  ;;  %v2741_v14 = vmax.f32 %v6801_v32, 0.0  ;;  %vm3332_vm11 = vcmp.lt.f32.partialorder %v3331_v55, 0.0004427343  ;;  %v3560_v59 = vld [vmem:[#allocation7 + $0x170] sm:$0xff] }
 0x5b0   :  { %v3412_v15 = vadd.f32 %v3324_v40, %v2740_v1  ;;  %v3333_v26 = vsel %vm3332_vm11, %v3330_v37, %v3327_v46  ;;  %v3337_v17 = vmul.f32 -0.5, %v4454_v0  ;;  %v3340_v23 = vand.u32 2147483647, %v4454_v0 }
 0x5b1   :  { %v3651_v63 = vadd.f32 %v3603_v12, %v6734_v45  ;;  %v3413_v56 = vadd.f32 %v3333_v26, %v2741_v14  ;;  %v2742_v30 = vmax.f32 %v6840_v6, 0.0  ;;  %v2743_v6 = vmax.f32 %v6864_v53, 0.0 }
 0x5b2   :  { %v4460_v10 = vpop.eup %4459  ;;  %3508 = vst [vmem:[#allocation14 + $0x150] sm:$0xff] %v3412_v15  ;;  %v3604_v24 = vmul.f32 %v3556_v8, %v3412_v15  ;;  %v3338_v48 = vadd.f32 1.0, %v3337_v17  ;;  %vm3341_vm12 = vcmp.lt.f32.partialorder %v3340_v23, 0.0004427343  ;;  %v2745_v12 = vmax.f32 %v6923_v52, 0.0  ;;  %v3561_v8 = vld [vmem:[#allocation7 + $0x178] sm:$0xff] }
 0x5b3   :  { %3699 = vst [vmem:[#allocation11 + $0x148] sm:$0xff] %v3651_v63  ;;  %3509 = vst [vmem:[#allocation14 + $0x158] sm:$0xff] %v3413_v56  ;;  %v3605_v20 = vmul.f32 %v3557_v54, %v3413_v56  ;;  %v3343_v5 = vadd.f32 1.0, %v4460_v10  ;;  %v3346_v49 = vmul.f32 -0.5, %v4460_v10  ;;  %v3349_v58 = vand.u32 2147483647, %v4460_v10 }
 0x5b4   :  { %v3652_v47 = vadd.f32 %v3604_v24, %v6787_v16  ;;  %v3339_v4 = vmul.f32 %v4454_v0, %v3338_v48 }
 0x5b5   :  { %v3653_v32 = vadd.f32 %v3605_v20, %v6797_v35  ;;  %4467 = vlog2.f32 %v3343_v5  ;;  %v3347_v35 = vadd.f32 1.0, %v3346_v49  ;;  %vm3350_vm13 = vcmp.lt.f32.partialorder %v3349_v58, 0.0004427343 }
 0x5b6   :  { %v4462_v42 = vpop.eup %4461  ;;  %3700 = vst [vmem:[#allocation11 + $0x150] sm:$0xff] %v3652_v47 }
 0x5b7   :  { %v4464_v38 = vpop.eup %4463  ;;  %3701 = vst [vmem:[#allocation11 + $0x158] sm:$0xff] %v3653_v32  ;;  %v3352_v45 = vadd.f32 1.0, %v4462_v42  ;;  %v3355_v21 = vmul.f32 -0.5, %v4462_v42  ;;  %v3348_v41 = vmul.f32 %v4460_v10, %v3347_v35  ;;  %v3358_v3 = vand.u32 2147483647, %v4462_v42 }
 0x5b8   :  { %v4466_v39 = vpop.eup %4465  ;;  %v3336_v31 = vmul.f32 0.6931472, %v4464_v38 }
 0x5b9   :  { %4469 = vlog2.f32 %v3352_v45  ;;  %v3361_v51 = vadd.f32 1.0, %v4466_v39  ;;  %v3364_v50 = vmul.f32 -0.5, %v4466_v39  ;;  %v3356_v18 = vadd.f32 1.0, %v3355_v21 }
 0x5ba   :  { %v3342_v16 = vsel %vm3341_vm12, %v3339_v4, %v3336_v31  ;;  %v3367_v28 = vand.u32 2147483647, %v4466_v39  ;;  %vm3359_vm14 = vcmp.lt.f32.partialorder %v3358_v3, 0.0004427343 }
 0x5bb   :  { %v3414_v9 = vadd.f32 %v3342_v16, %v2742_v30  ;;  %4471 = vlog2.f32 %v3361_v51  ;;  %v3365_v55 = vadd.f32 1.0, %v3364_v50  ;;  %v3357_v1 = vmul.f32 %v4462_v42, %v3356_v18 }
 0x5bc   :  { %vm3368_vm15 = vcmp.lt.f32.partialorder %v3367_v28, 0.0004427343 }
 0x5bd   :  { %3510 = vst [vmem:[#allocation14 + $0x160] sm:$0xff] %v3414_v9  ;;  %v3606_v36 = vmul.f32 %v3558_v57, %v3414_v9  ;;  %v3366_v53 = vmul.f32 %v4466_v39, %v3365_v55 }
 0x5bf   :  { %v4468_v25 = vpop.eup %4467  ;;  %v3654_v19 = vadd.f32 %v3606_v36, %v6820_v22  ;;  %v2744_v22 = vmax.f32 %v6906_v11, 0.0 }
 0x5c0   :  { %v3345_v0 = vmul.f32 0.6931472, %v4468_v25 }
 0x5c1   :  { %3702 = vst [vmem:[#allocation11 + $0x160] sm:$0xff] %v3654_v19 }
 0x5c2   :  { %v3351_v29 = vsel %vm3350_vm13, %v3348_v41, %v3345_v0 }
 0x5c3   :  { %v4470_v7 = vpop.eup %4469  ;;  %v3415_v13 = vadd.f32 %v3351_v29, %v2743_v6 }
 0x5c4   :  { %v3354_v60 = vmul.f32 0.6931472, %v4470_v7 }
 0x5c5   :  { %v4472_v33 = vpop.eup %4471  ;;  %3511 = vst [vmem:[#allocation14 + $0x168] sm:$0xff] %v3415_v13  ;;  %v3607_v62 = vmul.f32 %v3559_v44, %v3415_v13 }
 0x5c6   :  { %v3360_v2 = vsel %vm3359_vm14, %v3357_v1, %v3354_v60  ;;  %v3363_v27 = vmul.f32 0.6931472, %v4472_v33 }
 0x5c7   :  { %v3655_v46 = vadd.f32 %v3607_v62, %v6826_v61  ;;  %v3416_v37 = vadd.f32 %v3360_v2, %v2744_v22 }
 0x5c8   :  { %v3369_v40 = vsel %vm3368_vm15, %v3366_v53, %v3363_v27 }
 0x5c9   :  { %3703 = vst [vmem:[#allocation11 + $0x168] sm:$0xff] %v3655_v46  ;;  %3512 = vst [vmem:[#allocation14 + $0x170] sm:$0xff] %v3416_v37  ;;  %v3608_v14 = vmul.f32 %v3560_v59, %v3416_v37  ;;  %v3417_v15 = vadd.f32 %v3369_v40, %v2745_v12 }
 0x5cb   :  { %v3656_v11 = vadd.f32 %v3608_v14, %v6853_v43  ;;  %3513 = vst [vmem:[#allocation14 + $0x178] sm:$0xff] %v3417_v15  ;;  %v3609_v26 = vmul.f32 %v3561_v8, %v3417_v15 }
 0x5cc   :  { %4672 = shalt.err (!%p4669_p10)
}
 0x5cd   :  { %s4673_s27 = scalar_lea.hbm %s6987_s9, 6144 }
 0x5ce   :  { %p4674_p11 = scmp.ne.s32.totalorder %s6987_s9, %s4673_s27  ;;  %p4677_p12 = scmp.lt.u32.totalorder %s4673_s27, %s6987_s9 }
 0x5d0   :  { %p4679_p13 = pnand %p4677_p12, %p4674_p11 }
 0x5d2   :  { %4682 = shalt.err (!%p4679_p13)
}
 0x5d3   :  { %3741 = dma.vmem_to_hbm [thread:$0]  %s3736_s21, 6144, %s6987_s9, [#allocation13], %s4716_s19, %s4716_s19, %s4717_s20   ;;  %3704 = vst [vmem:[#allocation11 + $0x170] sm:$0xff] %v3656_v11  ;;  %v3657_v61 = vadd.f32 %v3609_v26, %v6857_v34 }
 0x5d4   :  { %s4683_s11 = scalar_lea.vmem %s3712_s23, 6144  ;;  %p4688_p1 = scmp.lt.s32.totalorder %s3712_s23, %s3712_s23 }
 0x5d5   :  { %3705 = vst [vmem:[#allocation11 + $0x178] sm:$0xff] %v3657_v61  ;;  %p4684_p0 = scmp.ne.s32.totalorder %s3712_s23, %s4683_s11  ;;  %p4689_p2 = scmp.lt.s32.totalorder %s4683_s11, %s4683_s11 }
 0x5d7   :  { %p4690_p3 = por %p4689_p2, %p4688_p1 }
 0x5d9   :  { %p4691_p4 = pnand %p4690_p3, %p4684_p0 }
 0x5db   :  { %4694 = shalt.err (!%p4691_p4)
}
 0x5dc   :  { %s4695_s13 = scalar_lea.hbm %s6985_s7, 6144 }
 0x5dd   :  { %p4696_p5 = scmp.ne.s32.totalorder %s6985_s7, %s4695_s13  ;;  %p4699_p6 = scmp.lt.u32.totalorder %s4695_s13, %s6985_s7 }
 0x5df   :  { %p4701_p7 = pnand %p4699_p6, %p4696_p5 }
 0x5e1   :  { %4704 = shalt.err (!%p4701_p7)
}
 0x5e2   :  { %3717 = dma.vmem_to_hbm [thread:$0]  %s3712_s23, 6144, %s6985_s7, [#allocation4], %s4716_s19, %s4716_s19, %s4717_s20  }
 0x5e3   :  { %4711 = dma.done.wait [#allocation4], 6144  }
 0x5e4   :  { %4712 = vsyncadd [#allocation4], 4294961152 }
 0x5e5   :  { %4713 = dma.done.wait [#allocation13], 12288  }
 0x5e6   :  { %4714 = vsyncadd [#allocation13], 4294955008 }
 0x5e7   :  { %3751 = vsyncpa [#allocation3], 1 }
 0x5e8   :  { %3752 = vsyncpa [#allocation6], 1 }
 0x5e9   :  { %3753 = vsyncpa [#allocation9], 1 }
 0x5ea   :  { %3754 = vsyncpa [#allocation4], 1 }
 0x5eb   :  { %3755 = vsyncpa [#allocation13], 1 }

</bundles_post_ra>
